<compile_context>
chip_gen: v6e
topology: v6e:2x2x1
jax: 0.10.0
libtpu: 0.0.40
codegen_flags: <defaults>
</compile_context>

<pallas_src>
import functools

import jax
import jax.numpy as jnp
from jax import lax
from jax.experimental import pallas as pl
from jax.experimental.pallas import tpu as pltpu

LEAKY_SLOPE = 0.01   # F.leaky_relu default
LANE = 128
SUBLANE = 8
MAX_UNROLL_STEPS = 4


def _round_up(x, m):
    return ((x + m - 1) // m) * m


# ----------------------------- fused Pallas kernel ---------------------------
def _fused_kernel(steps, compute_dtype, h_pad, d_pad,
                  x_ref, bias_ref,
                  we1, we2, we3, wd1, wd2, wd3,
                  o_ref):
    """One batch tile: z = enc(x); repeat steps: q = dec(enc(q)); store each q."""
    cd = compute_dtype

    # Packed biases (8, max_pad) loaded ONCE per tile.  Kept as (1, F) rows so
    # each bias add lowers to a sublane-broadcast add instead of a materialized
    # (tile_n, F) temporary (which would blow vreg/VMEM pressure).
    B = bias_ref[...]
    Be1, Be2, Be3 = B[0:1, :h_pad], B[1:2, :h_pad], B[2:3, :d_pad]
    Bd1, Bd2, Bd3 = B[3:4, :h_pad], B[4:5, :h_pad], B[5:6, :d_pad]

    def lrelu(v):
        # leaky_relu(v) == max(v, a*v) for 0 < a < 1: 2 VALU ops vs cmp+mul+sel.
        return jnp.maximum(v, LEAKY_SLOPE * v)

    def mlp(v, w1, w2, w3, b1, b2, b3):
        h = lrelu(jnp.dot(v.astype(cd), w1[...],
                          preferred_element_type=jnp.float32) + b1)
        h = lrelu(jnp.dot(h.astype(cd), w2[...],
                          preferred_element_type=jnp.float32) + b2)
        return jnp.dot(h.astype(cd), w3[...],
                       preferred_element_type=jnp.float32) + b3

    def enc(v):
        return mlp(v, we1, we2, we3, Be1, Be2, Be3)

    def dec(v):
        return mlp(v, wd1, wd2, wd3, Bd1, Bd2, Bd3)

    # TODO(synk): if profiling shows weight-push overhead on v6e/v7x, hold the
    #             6 RHS matrices resident via pltpu.matmul_push_rhs/acc_lhs.

    q = enc(x_ref[...])                       # z = encoder(x); q = z

    if steps <= MAX_UNROLL_STEPS:
        for s in range(steps):                # static unroll for small `steps`
            q = dec(enc(q))
            o_ref[s] = q.astype(o_ref.dtype)
    else:
        def body(s, q):
            q = dec(enc(q))
            o_ref[s] = q.astype(o_ref.dtype)  # dynamic store along first axis
            return q
        lax.fori_loop(0, steps, body, q, unroll=False)


# --------------------------------- wrapper ------------------------------------
@functools.partial(
    jax.jit,
    static_argnames=("steps", "tile_n", "compute_dtype", "out_dtype",
                     "min_tiles", "vmem_cap", "single_buffer_weights"))
def _feed_forward_fused(params, x2d, *, steps, tile_n, compute_dtype,
                        out_dtype, min_tiles, vmem_cap, single_buffer_weights):
    """x2d: (N, input_size).  Returns (steps, N, input_size) in out_dtype."""
    enc_p, dec_p = params["enc"], params["dec"]
    input_size = enc_p["w1"].shape[0]
    hidden = enc_p["w1"].shape[1]
    b = enc_p["w3"].shape[1]
    assert b == input_size, (
        "feedForward forward-mode feeds the (N, b) code back through "
        "encoder.view(-1, input_size); this requires b == input_size.")

    n = x2d.shape[0]
    d_pad = _round_up(max(input_size, b), LANE)   # lane-dense features
    h_pad = _round_up(hidden, LANE)
    max_pad = max(h_pad, d_pad)

    # ------------------------------ tiling -----------------------------------
    n_req = _round_up(max(n, SUBLANE), SUBLANE)
    tile = min(tile_n, n_req)
    if min_tiles > 1 and n_req >= min_tiles * SUBLANE:
        # Ensure >=2 grid tiles so the "parallel" axis shards across both
        # TensorCores (v7x); on 1-TC chips min_tiles == 1 keeps one big tile.
        tile = min(tile, _round_up(-(-n_req // min_tiles), SUBLANE))
    tile = max(SUBLANE, _round_up(tile, SUBLANE))

    cd_bytes = jnp.dtype(compute_dtype).itemsize
    o_bytes = jnp.dtype(out_dtype).itemsize
    weight_elems = 2 * (d_pad * h_pad + h_pad * h_pad + h_pad * d_pad)
    weight_bytes = weight_elems * cd_bytes * (1 if single_buffer_weights else 2)
    bias_bytes = SUBLANE * max_pad * 4

    def tile_vmem(t):
        return (2 * t * d_pad * cd_bytes            # x tile, double-buffered
                + 2 * steps * t * d_pad * o_bytes   # out slab, double-buffered
                + 4 * t * max_pad * 4               # f32 activation temporaries
                + weight_bytes + bias_bytes)

    budget = int(vmem_cap * 0.75)                   # leave headroom
    while tile > SUBLANE and tile_vmem(tile) > budget:
        tile = max(SUBLANE, _round_up(tile // 2, SUBLANE))

    # n_pad rounds up to a tile multiple (<= tile-1 padded rows of waste).
    n_pad = _round_up(n_req, tile)
    num_tiles = n_pad // tile
    vmem_limit = int(min(vmem_cap - (2 << 20),
                         max(tile_vmem(tile) + (8 << 20), 32 << 20)))

    # --------------------- pad & cast operands once --------------------------
    xp = jnp.pad(x2d.astype(jnp.float32),
                 ((0, n_pad - n), (0, d_pad - input_size))).astype(compute_dtype)

    def padw(a, rows, cols):
        return jnp.pad(a, ((0, rows - a.shape[0]),
                           (0, cols - a.shape[1]))).astype(compute_dtype)

    we1 = padw(enc_p["w1"], d_pad, h_pad)
    we2 = padw(enc_p["w2"], h_pad, h_pad)
    we3 = padw(enc_p["w3"], h_pad, d_pad)
    wd1 = padw(dec_p["w1"], d_pad, h_pad)
    wd2 = padw(dec_p["w2"], h_pad, h_pad)
    wd3 = padw(dec_p["w3"], h_pad, d_pad)

    def bias_row(bvec):
        row = jnp.reshape(bvec, (1, -1)).astype(jnp.float32)
        return jnp.pad(row, ((0, 0), (0, max_pad - row.shape[1])))

    # All six biases packed into ONE (8, max_pad) input -> one small DMA.
    bias_pack = jnp.concatenate(
        [bias_row(enc_p["b1"]), bias_row(enc_p["b2"]), bias_row(enc_p["b3"]),
         bias_row(dec_p["b1"]), bias_row(dec_p["b2"]), bias_row(dec_p["b3"]),
         jnp.zeros((SUBLANE - 6, max_pad), jnp.float32)], axis=0)

    def whole_spec(shape):
        # Whole (small) array; constant block index => DMA'd once, resident in
        # VMEM across all batch tiles.  Single-buffered (never changes).
        if single_buffer_weights:
            return pl.BlockSpec(shape, lambda i: (0,) * len(shape),
                                pipeline_mode=pl.Buffered(1))
        return pl.BlockSpec(shape, lambda i: (0,) * len(shape))

    x_spec = pl.BlockSpec((tile, d_pad), lambda i: (i, 0))
    out_spec = pl.BlockSpec((steps, tile, d_pad), lambda i: (0, i, 0))

    mlp_flops = 2 * n_pad * (d_pad * h_pad + h_pad * h_pad + h_pad * d_pad)
    total_flops = (2 * steps + 1) * mlp_flops

    kernel = functools.partial(_fused_kernel, steps, compute_dtype, h_pad, d_pad)

    out = pl.pallas_call(
        kernel,
        out_shape=jax.ShapeDtypeStruct((steps, n_pad, d_pad), out_dtype),
        grid=(num_tiles,),
        in_specs=[
            x_spec,
            whole_spec(bias_pack.shape),
            whole_spec(we1.shape), whole_spec(we2.shape), whole_spec(we3.shape),
            whole_spec(wd1.shape), whole_spec(wd2.shape), whole_spec(wd3.shape),
        ],
        out_specs=out_spec,
        compiler_params=pltpu.CompilerParams(
            dimension_semantics=("parallel",),     # batch tiles are independent
            vmem_limit_bytes=vmem_limit),
        cost_estimate=pl.CostEstimate(
            flops=int(total_flops),
            transcendentals=0,
            bytes_accessed=int(n_pad * d_pad * cd_bytes
                               + steps * n_pad * d_pad * o_bytes
                               + weight_elems * cd_bytes + bias_bytes)),
    )(xp, bias_pack, we1, we2, we3, wd1, wd2, wd3)

    # Strip batch / feature padding.
    return out[:, :n, :input_size]


# ----------------------- device defaults & public API -------------------------
def _device_defaults():
    kind = ""
    try:
        kind = jax.devices()[0].device_kind.lower()
    except Exception:
        pass
    is_v7 = ("v7" in kind) or ("7x" in kind)
    is_v6 = "v6" in kind
    default_cd = jnp.bfloat16 if (is_v6 or is_v7) else jnp.float32
    vmem_cap = (64 << 20) if is_v7 else (128 << 20)
    try:
        vmem_cap = int(pltpu.get_tpu_info().vmem_capacity_bytes)
    except Exception:
        pass
    min_tiles = 2 if is_v7 else 1        # 2 TensorCores per chip on v7x
    return default_cd, vmem_cap, min_tiles


_SINGLE_BUFFER_WEIGHTS = None   # cached: does this jax build accept Buffered(1)?


def feed_forward(params, x, *, steps=4, tile_n=1024, compute_dtype=None,
                 out_dtype=jnp.float32):
    """mode='forward' of feedForward.  Returns (out_list, out_back_list)."""
    global _SINGLE_BUFFER_WEIGHTS
    default_cd, vmem_cap, min_tiles = _device_defaults()
    if compute_dtype is None:
        compute_dtype = default_cd

    input_size = params["enc"]["w1"].shape[0]
    x2d = jnp.reshape(x, (-1, input_size))

    kw = dict(steps=steps, tile_n=tile_n, compute_dtype=compute_dtype,
              out_dtype=out_dtype, min_tiles=min_tiles, vmem_cap=vmem_cap)

    if _SINGLE_BUFFER_WEIGHTS is None:
        try:
            slab = _feed_forward_fused(params, x2d,
                                       single_buffer_weights=True, **kw)
            jax.block_until_ready(slab)
            _SINGLE_BUFFER_WEIGHTS = True
        except Exception:
            _SINGLE_BUFFER_WEIGHTS = False
            slab = _feed_forward_fused(params, x2d,
                                       single_buffer_weights=False, **kw)
    else:
        slab = _feed_forward_fused(
            params, x2d, single_buffer_weights=_SINGLE_BUFFER_WEIGHTS, **kw)

    out = []
    for s in range(steps):
        q = slab[s]
        if input_size == 400:   # decoderNetSimple special-cases 20x20 images
            out.append(q.reshape(-1, 1, 20, 20))
        else:
            out.append(q.reshape(-1, 1, input_size))
    out_back = []
    # TODO(synk): mode='backward' (nonlinearDynamicsBack + decoder chain) is not
    #             exercised by forward mode; add a fused kernel if needed.
    return out, out_back


# ----------------------------- parameter init --------------------------------
def _xavier_normal(key, fan_in, fan_out):
    std = (2.0 / (fan_in + fan_out)) ** 0.5
    # stored as (in, out) so the kernel computes x @ W
    return std * jax.random.normal(key, (fan_in, fan_out), dtype=jnp.float32)


def init_params(key, alpha, b, input_size):
    h = 16 * alpha
    ks = jax.random.split(key, 6)
    return {
        # encoderNetSimple: input_size -> h -> h -> b
        "enc": dict(
            w1=_xavier_normal(ks[0], input_size, h), b1=jnp.zeros((1, h), jnp.float32),
            w2=_xavier_normal(ks[1], h, h),          b2=jnp.zeros((1, h), jnp.float32),
            w3=_xavier_normal(ks[2], h, b),          b3=jnp.zeros((1, b), jnp.float32),
        ),
        # decoderNetSimple: b -> h -> h -> input_size
        "dec": dict(
            w1=_xavier_normal(ks[3], b, h),          b1=jnp.zeros((1, h), jnp.float32),
            w2=_xavier_normal(ks[4], h, h),          b2=jnp.zeros((1, h), jnp.float32),
            w3=_xavier_normal(ks[5], h, input_size), b3=jnp.zeros((1, input_size), jnp.float32),
        ),
        # nonlinearDynamics / nonlinearDynamicsBack are built in __init__ but
        # unused in mode='forward'.
    }


# ------------------------------ pure-JAX reference ----------------------------
def _ref_mlp3(x, p, cd=jnp.float32):
    def mm(a, w):
        return jnp.dot(a.astype(cd), w.astype(cd),
                       preferred_element_type=jnp.float32)
    h = mm(x, p["w1"]) + p["b1"]
    h = jnp.maximum(h, LEAKY_SLOPE * h)
    h = mm(h, p["w2"]) + p["b2"]
    h = jnp.maximum(h, LEAKY_SLOPE * h)
    return mm(h, p["w3"]) + p["b3"]


def _ref_feed_forward(params, x, *, b, input_size, steps=4, cd=jnp.float32):
    out = []
    q = _ref_mlp3(jnp.reshape(x, (-1, input_size)), params["enc"], cd)
    for _ in range(steps):
        e = _ref_mlp3(jnp.reshape(q, (-1, input_size)), params["enc"], cd)
        d = _ref_mlp3(jnp.reshape(e, (-1, b)), params["dec"], cd)
        q = d
        out.append(jnp.reshape(d, (-1, 1, input_size)))
    return out, []


# -------------------------------- main ----------------------------------------
if __name__ == "__main__":
    # Small, self-consistent shapes.  The forward loop feeds the (N, b)
    # encoder output back through encoder.view(-1, input_size), so b must
    # equal input_size (as the original code implicitly requires).
    alpha = 2          # hidden = 16 * alpha = 32
    input_size = 16
    b = 16
    steps = 4
    batch = 2

    key = jax.random.PRNGKey(0)
    k_param, k_x = jax.random.split(key)
    params = init_params(k_param, alpha, b, input_size)
    x = jax.random.normal(k_x, (batch, input_size), dtype=jnp.float32)

    # --- f32 path (static unroll): exact-semantics check against reference ----
    out, out_back = feed_forward(params, x, steps=steps,
                                 compute_dtype=jnp.float32)
    out = [jax.block_until_ready(o) for o in out]
    ref_out, _ = _ref_feed_forward(params, x, b=b, input_size=input_size,
                                   steps=steps)
    for o, r in zip(out, ref_out):
        assert o.shape == (batch, 1, input_size), o.shape
        assert jnp.allclose(o, r, atol=1e-3, rtol=1e-3), float(
            jnp.max(jnp.abs(o - r)))
    assert out_back == []

    # --- f32 path with steps > MAX_UNROLL_STEPS: exercises the fori_loop body -
    steps_long = 6
    out_long, _ = feed_forward(params, x, steps=steps_long,
                               compute_dtype=jnp.float32)
    out_long = [jax.block_until_ready(o) for o in out_long]
    ref_long, _ = _ref_feed_forward(params, x, b=b, input_size=input_size,
                                    steps=steps_long)
    for o, r in zip(out_long, ref_long):
        assert o.shape == (batch, 1, input_size), o.shape
        assert jnp.allclose(o, r, atol=1e-3, rtol=1e-3), float(
            jnp.max(jnp.abs(o - r)))

    # --- bf16 MXU-operand path (v6e/v7x default): tolerance check vs bf16 ref -
    out_bf16, _ = feed_forward(params, x, steps=steps,
                               compute_dtype=jnp.bfloat16)
    out_bf16 = [jax.block_until_ready(o) for o in out_bf16]
    ref_bf16, _ = _ref_feed_forward(params, x, b=b, input_size=input_size,
                                    steps=steps, cd=jnp.bfloat16)
    for o, r in zip(out_bf16, ref_bf16):
        assert o.shape == (batch, 1, input_size)
        assert bool(jnp.all(jnp.isfinite(o)))
        assert jnp.allclose(o.astype(jnp.float32), r, atol=5e-2, rtol=5e-2), float(
            jnp.max(jnp.abs(o.astype(jnp.float32) - r)))

    print("KERNEL_OK")
</pallas_src>

<mosaic_0001>
module attributes {stable_mosaic.version = 11 : i64} {
  func.func @_fused_kernel(%arg0: i32, %arg1: memref<8x128xf32, #tpu.memory_space<vmem>>, %arg2: memref<8x128xf32, #tpu.memory_space<vmem>>, %arg3: memref<128x128xf32, #tpu.memory_space<vmem>>, %arg4: memref<128x128xf32, #tpu.memory_space<vmem>>, %arg5: memref<128x128xf32, #tpu.memory_space<vmem>>, %arg6: memref<128x128xf32, #tpu.memory_space<vmem>>, %arg7: memref<128x128xf32, #tpu.memory_space<vmem>>, %arg8: memref<128x128xf32, #tpu.memory_space<vmem>>, %arg9: memref<4x8x128xf32, #tpu.memory_space<vmem>>) attributes {dimension_semantics = [#tpu.dimension_semantics<parallel>], iteration_bounds = array<i64: 1>, scalar_prefetch = 0 : i64, scratch_operands = 0 : i64, tpu.core_type = #tpu.core_type<tc>, window_params = [{transform_indices = @transform_0, window_bounds = array<i64: 8, 128>}, {pipeline_mode = #tpu.pipeline_mode<synchronous>, transform_indices = @transform_1, window_bounds = array<i64: 8, 128>}, {pipeline_mode = #tpu.pipeline_mode<synchronous>, transform_indices = @transform_2, window_bounds = array<i64: 128, 128>}, {pipeline_mode = #tpu.pipeline_mode<synchronous>, transform_indices = @transform_3, window_bounds = array<i64: 128, 128>}, {pipeline_mode = #tpu.pipeline_mode<synchronous>, transform_indices = @transform_4, window_bounds = array<i64: 128, 128>}, {pipeline_mode = #tpu.pipeline_mode<synchronous>, transform_indices = @transform_5, window_bounds = array<i64: 128, 128>}, {pipeline_mode = #tpu.pipeline_mode<synchronous>, transform_indices = @transform_6, window_bounds = array<i64: 128, 128>}, {pipeline_mode = #tpu.pipeline_mode<synchronous>, transform_indices = @transform_7, window_bounds = array<i64: 128, 128>}, {transform_indices = @transform_8, window_bounds = array<i64: 4, 8, 128>}]} {
    %c0 = arith.constant 0 : index
    %c0_0 = arith.constant 0 : index
    %0 = vector.load %arg2[%c0, %c0_0] : memref<8x128xf32, #tpu.memory_space<vmem>>, vector<8x128xf32>
    %1 = vector.extract_strided_slice %0 {offsets = [0, 0], sizes = [1, 128], strides = [1, 1]} : vector<8x128xf32> to vector<1x128xf32>
    %2 = vector.extract_strided_slice %0 {offsets = [1, 0], sizes = [1, 128], strides = [1, 1]} : vector<8x128xf32> to vector<1x128xf32>
    %3 = vector.extract_strided_slice %0 {offsets = [2, 0], sizes = [1, 128], strides = [1, 1]} : vector<8x128xf32> to vector<1x128xf32>
    %4 = vector.extract_strided_slice %0 {offsets = [3, 0], sizes = [1, 128], strides = [1, 1]} : vector<8x128xf32> to vector<1x128xf32>
    %5 = vector.extract_strided_slice %0 {offsets = [4, 0], sizes = [1, 128], strides = [1, 1]} : vector<8x128xf32> to vector<1x128xf32>
    %6 = vector.extract_strided_slice %0 {offsets = [5, 0], sizes = [1, 128], strides = [1, 1]} : vector<8x128xf32> to vector<1x128xf32>
    %c0_1 = arith.constant 0 : index
    %c0_2 = arith.constant 0 : index
    %7 = vector.load %arg1[%c0_1, %c0_2] : memref<8x128xf32, #tpu.memory_space<vmem>>, vector<8x128xf32>
    %c0_3 = arith.constant 0 : index
    %c0_4 = arith.constant 0 : index
    %8 = vector.load %arg3[%c0_3, %c0_4] : memref<128x128xf32, #tpu.memory_space<vmem>>, vector<128x128xf32>
    %cst = arith.constant dense<0.000000e+00> : vector<8x128xf32>
    %9 = tpu.matmul %7, %8, %cst {dimension_numbers = #tpu.dot_dimension_numbers<[1], [0], [0], [1], [0, 0, 1, 1], [], []>} : vector<8x128xf32>, vector<128x128xf32>, vector<8x128xf32> -> vector<8x128xf32>
    %10 = vector.broadcast %1 : vector<1x128xf32> to vector<8x128xf32>
    %11 = arith.addf %9, %10 : vector<8x128xf32>
    %cst_5 = arith.constant 0.00999999977 : f32
    %12 = vector.broadcast %cst_5 : f32 to vector<8x128xf32>
    %13 = arith.mulf %12, %11 : vector<8x128xf32>
    %14 = arith.maximumf %11, %13 : vector<8x128xf32>
    %c0_6 = arith.constant 0 : index
    %c0_7 = arith.constant 0 : index
    %15 = vector.load %arg4[%c0_6, %c0_7] : memref<128x128xf32, #tpu.memory_space<vmem>>, vector<128x128xf32>
    %cst_8 = arith.constant dense<0.000000e+00> : vector<8x128xf32>
    %16 = tpu.matmul %14, %15, %cst_8 {dimension_numbers = #tpu.dot_dimension_numbers<[1], [0], [0], [1], [0, 0, 1, 1], [], []>} : vector<8x128xf32>, vector<128x128xf32>, vector<8x128xf32> -> vector<8x128xf32>
    %17 = vector.broadcast %2 : vector<1x128xf32> to vector<8x128xf32>
    %18 = arith.addf %16, %17 : vector<8x128xf32>
    %cst_9 = arith.constant 0.00999999977 : f32
    %19 = vector.broadcast %cst_9 : f32 to vector<8x128xf32>
    %20 = arith.mulf %19, %18 : vector<8x128xf32>
    %21 = arith.maximumf %18, %20 : vector<8x128xf32>
    %c0_10 = arith.constant 0 : index
    %c0_11 = arith.constant 0 : index
    %22 = vector.load %arg5[%c0_10, %c0_11] : memref<128x128xf32, #tpu.memory_space<vmem>>, vector<128x128xf32>
    %cst_12 = arith.constant dense<0.000000e+00> : vector<8x128xf32>
    %23 = tpu.matmul %21, %22, %cst_12 {dimension_numbers = #tpu.dot_dimension_numbers<[1], [0], [0], [1], [0, 0, 1, 1], [], []>} : vector<8x128xf32>, vector<128x128xf32>, vector<8x128xf32> -> vector<8x128xf32>
    %24 = vector.broadcast %3 : vector<1x128xf32> to vector<8x128xf32>
    %25 = arith.addf %23, %24 : vector<8x128xf32>
    %c0_13 = arith.constant 0 : index
    %c0_14 = arith.constant 0 : index
    %26 = vector.load %arg3[%c0_13, %c0_14] : memref<128x128xf32, #tpu.memory_space<vmem>>, vector<128x128xf32>
    %cst_15 = arith.constant dense<0.000000e+00> : vector<8x128xf32>
    %27 = tpu.matmul %25, %26, %cst_15 {dimension_numbers = #tpu.dot_dimension_numbers<[1], [0], [0], [1], [0, 0, 1, 1], [], []>} : vector<8x128xf32>, vector<128x128xf32>, vector<8x128xf32> -> vector<8x128xf32>
    %28 = vector.broadcast %1 : vector<1x128xf32> to vector<8x128xf32>
    %29 = arith.addf %27, %28 : vector<8x128xf32>
    %cst_16 = arith.constant 0.00999999977 : f32
    %30 = vector.broadcast %cst_16 : f32 to vector<8x128xf32>
    %31 = arith.mulf %30, %29 : vector<8x128xf32>
    %32 = arith.maximumf %29, %31 : vector<8x128xf32>
    %c0_17 = arith.constant 0 : index
    %c0_18 = arith.constant 0 : index
    %33 = vector.load %arg4[%c0_17, %c0_18] : memref<128x128xf32, #tpu.memory_space<vmem>>, vector<128x128xf32>
    %cst_19 = arith.constant dense<0.000000e+00> : vector<8x128xf32>
    %34 = tpu.matmul %32, %33, %cst_19 {dimension_numbers = #tpu.dot_dimension_numbers<[1], [0], [0], [1], [0, 0, 1, 1], [], []>} : vector<8x128xf32>, vector<128x128xf32>, vector<8x128xf32> -> vector<8x128xf32>
    %35 = vector.broadcast %2 : vector<1x128xf32> to vector<8x128xf32>
    %36 = arith.addf %34, %35 : vector<8x128xf32>
    %cst_20 = arith.constant 0.00999999977 : f32
    %37 = vector.broadcast %cst_20 : f32 to vector<8x128xf32>
    %38 = arith.mulf %37, %36 : vector<8x128xf32>
    %39 = arith.maximumf %36, %38 : vector<8x128xf32>
    %c0_21 = arith.constant 0 : index
    %c0_22 = arith.constant 0 : index
    %40 = vector.load %arg5[%c0_21, %c0_22] : memref<128x128xf32, #tpu.memory_space<vmem>>, vector<128x128xf32>
    %cst_23 = arith.constant dense<0.000000e+00> : vector<8x128xf32>
    %41 = tpu.matmul %39, %40, %cst_23 {dimension_numbers = #tpu.dot_dimension_numbers<[1], [0], [0], [1], [0, 0, 1, 1], [], []>} : vector<8x128xf32>, vector<128x128xf32>, vector<8x128xf32> -> vector<8x128xf32>
    %42 = vector.broadcast %3 : vector<1x128xf32> to vector<8x128xf32>
    %43 = arith.addf %41, %42 : vector<8x128xf32>
    %c0_24 = arith.constant 0 : index
    %c0_25 = arith.constant 0 : index
    %44 = vector.load %arg6[%c0_24, %c0_25] : memref<128x128xf32, #tpu.memory_space<vmem>>, vector<128x128xf32>
    %cst_26 = arith.constant dense<0.000000e+00> : vector<8x128xf32>
    %45 = tpu.matmul %43, %44, %cst_26 {dimension_numbers = #tpu.dot_dimension_numbers<[1], [0], [0], [1], [0, 0, 1, 1], [], []>} : vector<8x128xf32>, vector<128x128xf32>, vector<8x128xf32> -> vector<8x128xf32>
    %46 = vector.broadcast %4 : vector<1x128xf32> to vector<8x128xf32>
    %47 = arith.addf %45, %46 : vector<8x128xf32>
    %cst_27 = arith.constant 0.00999999977 : f32
    %48 = vector.broadcast %cst_27 : f32 to vector<8x128xf32>
    %49 = arith.mulf %48, %47 : vector<8x128xf32>
    %50 = arith.maximumf %47, %49 : vector<8x128xf32>
    %c0_28 = arith.constant 0 : index
    %c0_29 = arith.constant 0 : index
    %51 = vector.load %arg7[%c0_28, %c0_29] : memref<128x128xf32, #tpu.memory_space<vmem>>, vector<128x128xf32>
    %cst_30 = arith.constant dense<0.000000e+00> : vector<8x128xf32>
    %52 = tpu.matmul %50, %51, %cst_30 {dimension_numbers = #tpu.dot_dimension_numbers<[1], [0], [0], [1], [0, 0, 1, 1], [], []>} : vector<8x128xf32>, vector<128x128xf32>, vector<8x128xf32> -> vector<8x128xf32>
    %53 = vector.broadcast %5 : vector<1x128xf32> to vector<8x128xf32>
    %54 = arith.addf %52, %53 : vector<8x128xf32>
    %cst_31 = arith.constant 0.00999999977 : f32
    %55 = vector.broadcast %cst_31 : f32 to vector<8x128xf32>
    %56 = arith.mulf %55, %54 : vector<8x128xf32>
    %57 = arith.maximumf %54, %56 : vector<8x128xf32>
    %c0_32 = arith.constant 0 : index
    %c0_33 = arith.constant 0 : index
    %58 = vector.load %arg8[%c0_32, %c0_33] : memref<128x128xf32, #tpu.memory_space<vmem>>, vector<128x128xf32>
    %cst_34 = arith.constant dense<0.000000e+00> : vector<8x128xf32>
    %59 = tpu.matmul %57, %58, %cst_34 {dimension_numbers = #tpu.dot_dimension_numbers<[1], [0], [0], [1], [0, 0, 1, 1], [], []>} : vector<8x128xf32>, vector<128x128xf32>, vector<8x128xf32> -> vector<8x128xf32>
    %60 = vector.broadcast %6 : vector<1x128xf32> to vector<8x128xf32>
    %61 = arith.addf %59, %60 : vector<8x128xf32>
    %c0_35 = arith.constant 0 : index
    %c0_36 = arith.constant 0 : index
    %c0_37 = arith.constant 0 : index
    %62 = vector.load %arg9[%c0_35, %c0_36, %c0_37] : memref<4x8x128xf32, #tpu.memory_space<vmem>>, vector<1x8x128xf32>
    %63 = vector.shape_cast %62 : vector<1x8x128xf32> to vector<8x128xf32>
    %64 = vector.shape_cast %61 : vector<8x128xf32> to vector<1x8x128xf32>
    tpu.vector_store %arg9[%c0_35, %c0_36, %c0_37], %64 {strides = array<i32>} : memref<4x8x128xf32, #tpu.memory_space<vmem>>, vector<1x8x128xf32>,
    %c0_38 = arith.constant 0 : index
    %c0_39 = arith.constant 0 : index
    %65 = vector.load %arg3[%c0_38, %c0_39] : memref<128x128xf32, #tpu.memory_space<vmem>>, vector<128x128xf32>
    %cst_40 = arith.constant dense<0.000000e+00> : vector<8x128xf32>
    %66 = tpu.matmul %61, %65, %cst_40 {dimension_numbers = #tpu.dot_dimension_numbers<[1], [0], [0], [1], [0, 0, 1, 1], [], []>} : vector<8x128xf32>, vector<128x128xf32>, vector<8x128xf32> -> vector<8x128xf32>
    %67 = vector.broadcast %1 : vector<1x128xf32> to vector<8x128xf32>
    %68 = arith.addf %66, %67 : vector<8x128xf32>
    %cst_41 = arith.constant 0.00999999977 : f32
    %69 = vector.broadcast %cst_41 : f32 to vector<8x128xf32>
    %70 = arith.mulf %69, %68 : vector<8x128xf32>
    %71 = arith.maximumf %68, %70 : vector<8x128xf32>
    %c0_42 = arith.constant 0 : index
    %c0_43 = arith.constant 0 : index
    %72 = vector.load %arg4[%c0_42, %c0_43] : memref<128x128xf32, #tpu.memory_space<vmem>>, vector<128x128xf32>
    %cst_44 = arith.constant dense<0.000000e+00> : vector<8x128xf32>
    %73 = tpu.matmul %71, %72, %cst_44 {dimension_numbers = #tpu.dot_dimension_numbers<[1], [0], [0], [1], [0, 0, 1, 1], [], []>} : vector<8x128xf32>, vector<128x128xf32>, vector<8x128xf32> -> vector<8x128xf32>
    %74 = vector.broadcast %2 : vector<1x128xf32> to vector<8x128xf32>
    %75 = arith.addf %73, %74 : vector<8x128xf32>
    %cst_45 = arith.constant 0.00999999977 : f32
    %76 = vector.broadcast %cst_45 : f32 to vector<8x128xf32>
    %77 = arith.mulf %76, %75 : vector<8x128xf32>
    %78 = arith.maximumf %75, %77 : vector<8x128xf32>
    %c0_46 = arith.constant 0 : index
    %c0_47 = arith.constant 0 : index
    %79 = vector.load %arg5[%c0_46, %c0_47] : memref<128x128xf32, #tpu.memory_space<vmem>>, vector<128x128xf32>
    %cst_48 = arith.constant dense<0.000000e+00> : vector<8x128xf32>
    %80 = tpu.matmul %78, %79, %cst_48 {dimension_numbers = #tpu.dot_dimension_numbers<[1], [0], [0], [1], [0, 0, 1, 1], [], []>} : vector<8x128xf32>, vector<128x128xf32>, vector<8x128xf32> -> vector<8x128xf32>
    %81 = vector.broadcast %3 : vector<1x128xf32> to vector<8x128xf32>
    %82 = arith.addf %80, %81 : vector<8x128xf32>
    %c0_49 = arith.constant 0 : index
    %c0_50 = arith.constant 0 : index
    %83 = vector.load %arg6[%c0_49, %c0_50] : memref<128x128xf32, #tpu.memory_space<vmem>>, vector<128x128xf32>
    %cst_51 = arith.constant dense<0.000000e+00> : vector<8x128xf32>
    %84 = tpu.matmul %82, %83, %cst_51 {dimension_numbers = #tpu.dot_dimension_numbers<[1], [0], [0], [1], [0, 0, 1, 1], [], []>} : vector<8x128xf32>, vector<128x128xf32>, vector<8x128xf32> -> vector<8x128xf32>
    %85 = vector.broadcast %4 : vector<1x128xf32> to vector<8x128xf32>
    %86 = arith.addf %84, %85 : vector<8x128xf32>
    %cst_52 = arith.constant 0.00999999977 : f32
    %87 = vector.broadcast %cst_52 : f32 to vector<8x128xf32>
    %88 = arith.mulf %87, %86 : vector<8x128xf32>
    %89 = arith.maximumf %86, %88 : vector<8x128xf32>
    %c0_53 = arith.constant 0 : index
    %c0_54 = arith.constant 0 : index
    %90 = vector.load %arg7[%c0_53, %c0_54] : memref<128x128xf32, #tpu.memory_space<vmem>>, vector<128x128xf32>
    %cst_55 = arith.constant dense<0.000000e+00> : vector<8x128xf32>
    %91 = tpu.matmul %89, %90, %cst_55 {dimension_numbers = #tpu.dot_dimension_numbers<[1], [0], [0], [1], [0, 0, 1, 1], [], []>} : vector<8x128xf32>, vector<128x128xf32>, vector<8x128xf32> -> vector<8x128xf32>
    %92 = vector.broadcast %5 : vector<1x128xf32> to vector<8x128xf32>
    %93 = arith.addf %91, %92 : vector<8x128xf32>
    %cst_56 = arith.constant 0.00999999977 : f32
    %94 = vector.broadcast %cst_56 : f32 to vector<8x128xf32>
    %95 = arith.mulf %94, %93 : vector<8x128xf32>
    %96 = arith.maximumf %93, %95 : vector<8x128xf32>
    %c0_57 = arith.constant 0 : index
    %c0_58 = arith.constant 0 : index
    %97 = vector.load %arg8[%c0_57, %c0_58] : memref<128x128xf32, #tpu.memory_space<vmem>>, vector<128x128xf32>
    %cst_59 = arith.constant dense<0.000000e+00> : vector<8x128xf32>
    %98 = tpu.matmul %96, %97, %cst_59 {dimension_numbers = #tpu.dot_dimension_numbers<[1], [0], [0], [1], [0, 0, 1, 1], [], []>} : vector<8x128xf32>, vector<128x128xf32>, vector<8x128xf32> -> vector<8x128xf32>
    %99 = vector.broadcast %6 : vector<1x128xf32> to vector<8x128xf32>
    %100 = arith.addf %98, %99 : vector<8x128xf32>
    %c1 = arith.constant 1 : index
    %c0_60 = arith.constant 0 : index
    %c0_61 = arith.constant 0 : index
    %101 = vector.load %arg9[%c1, %c0_60, %c0_61] : memref<4x8x128xf32, #tpu.memory_space<vmem>>, vector<1x8x128xf32>
    %102 = vector.shape_cast %101 : vector<1x8x128xf32> to vector<8x128xf32>
    %103 = vector.shape_cast %100 : vector<8x128xf32> to vector<1x8x128xf32>
    tpu.vector_store %arg9[%c1, %c0_60, %c0_61], %103 {strides = array<i32>} : memref<4x8x128xf32, #tpu.memory_space<vmem>>, vector<1x8x128xf32>,
    %c0_62 = arith.constant 0 : index
    %c0_63 = arith.constant 0 : index
    %104 = vector.load %arg3[%c0_62, %c0_63] : memref<128x128xf32, #tpu.memory_space<vmem>>, vector<128x128xf32>
    %cst_64 = arith.constant dense<0.000000e+00> : vector<8x128xf32>
    %105 = tpu.matmul %100, %104, %cst_64 {dimension_numbers = #tpu.dot_dimension_numbers<[1], [0], [0], [1], [0, 0, 1, 1], [], []>} : vector<8x128xf32>, vector<128x128xf32>, vector<8x128xf32> -> vector<8x128xf32>
    %106 = vector.broadcast %1 : vector<1x128xf32> to vector<8x128xf32>
    %107 = arith.addf %105, %106 : vector<8x128xf32>
    %cst_65 = arith.constant 0.00999999977 : f32
    %108 = vector.broadcast %cst_65 : f32 to vector<8x128xf32>
    %109 = arith.mulf %108, %107 : vector<8x128xf32>
    %110 = arith.maximumf %107, %109 : vector<8x128xf32>
    %c0_66 = arith.constant 0 : index
    %c0_67 = arith.constant 0 : index
    %111 = vector.load %arg4[%c0_66, %c0_67] : memref<128x128xf32, #tpu.memory_space<vmem>>, vector<128x128xf32>
    %cst_68 = arith.constant dense<0.000000e+00> : vector<8x128xf32>
    %112 = tpu.matmul %110, %111, %cst_68 {dimension_numbers = #tpu.dot_dimension_numbers<[1], [0], [0], [1], [0, 0, 1, 1], [], []>} : vector<8x128xf32>, vector<128x128xf32>, vector<8x128xf32> -> vector<8x128xf32>
    %113 = vector.broadcast %2 : vector<1x128xf32> to vector<8x128xf32>
    %114 = arith.addf %112, %113 : vector<8x128xf32>
    %cst_69 = arith.constant 0.00999999977 : f32
    %115 = vector.broadcast %cst_69 : f32 to vector<8x128xf32>
    %116 = arith.mulf %115, %114 : vector<8x128xf32>
    %117 = arith.maximumf %114, %116 : vector<8x128xf32>
    %c0_70 = arith.constant 0 : index
    %c0_71 = arith.constant 0 : index
    %118 = vector.load %arg5[%c0_70, %c0_71] : memref<128x128xf32, #tpu.memory_space<vmem>>, vector<128x128xf32>
    %cst_72 = arith.constant dense<0.000000e+00> : vector<8x128xf32>
    %119 = tpu.matmul %117, %118, %cst_72 {dimension_numbers = #tpu.dot_dimension_numbers<[1], [0], [0], [1], [0, 0, 1, 1], [], []>} : vector<8x128xf32>, vector<128x128xf32>, vector<8x128xf32> -> vector<8x128xf32>
    %120 = vector.broadcast %3 : vector<1x128xf32> to vector<8x128xf32>
    %121 = arith.addf %119, %120 : vector<8x128xf32>
    %c0_73 = arith.constant 0 : index
    %c0_74 = arith.constant 0 : index
    %122 = vector.load %arg6[%c0_73, %c0_74] : memref<128x128xf32, #tpu.memory_space<vmem>>, vector<128x128xf32>
    %cst_75 = arith.constant dense<0.000000e+00> : vector<8x128xf32>
    %123 = tpu.matmul %121, %122, %cst_75 {dimension_numbers = #tpu.dot_dimension_numbers<[1], [0], [0], [1], [0, 0, 1, 1], [], []>} : vector<8x128xf32>, vector<128x128xf32>, vector<8x128xf32> -> vector<8x128xf32>
    %124 = vector.broadcast %4 : vector<1x128xf32> to vector<8x128xf32>
    %125 = arith.addf %123, %124 : vector<8x128xf32>
    %cst_76 = arith.constant 0.00999999977 : f32
    %126 = vector.broadcast %cst_76 : f32 to vector<8x128xf32>
    %127 = arith.mulf %126, %125 : vector<8x128xf32>
    %128 = arith.maximumf %125, %127 : vector<8x128xf32>
    %c0_77 = arith.constant 0 : index
    %c0_78 = arith.constant 0 : index
    %129 = vector.load %arg7[%c0_77, %c0_78] : memref<128x128xf32, #tpu.memory_space<vmem>>, vector<128x128xf32>
    %cst_79 = arith.constant dense<0.000000e+00> : vector<8x128xf32>
    %130 = tpu.matmul %128, %129, %cst_79 {dimension_numbers = #tpu.dot_dimension_numbers<[1], [0], [0], [1], [0, 0, 1, 1], [], []>} : vector<8x128xf32>, vector<128x128xf32>, vector<8x128xf32> -> vector<8x128xf32>
    %131 = vector.broadcast %5 : vector<1x128xf32> to vector<8x128xf32>
    %132 = arith.addf %130, %131 : vector<8x128xf32>
    %cst_80 = arith.constant 0.00999999977 : f32
    %133 = vector.broadcast %cst_80 : f32 to vector<8x128xf32>
    %134 = arith.mulf %133, %132 : vector<8x128xf32>
    %135 = arith.maximumf %132, %134 : vector<8x128xf32>
    %c0_81 = arith.constant 0 : index
    %c0_82 = arith.constant 0 : index
    %136 = vector.load %arg8[%c0_81, %c0_82] : memref<128x128xf32, #tpu.memory_space<vmem>>, vector<128x128xf32>
    %cst_83 = arith.constant dense<0.000000e+00> : vector<8x128xf32>
    %137 = tpu.matmul %135, %136, %cst_83 {dimension_numbers = #tpu.dot_dimension_numbers<[1], [0], [0], [1], [0, 0, 1, 1], [], []>} : vector<8x128xf32>, vector<128x128xf32>, vector<8x128xf32> -> vector<8x128xf32>
    %138 = vector.broadcast %6 : vector<1x128xf32> to vector<8x128xf32>
    %139 = arith.addf %137, %138 : vector<8x128xf32>
    %c2 = arith.constant 2 : index
    %c0_84 = arith.constant 0 : index
    %c0_85 = arith.constant 0 : index
    %140 = vector.load %arg9[%c2, %c0_84, %c0_85] : memref<4x8x128xf32, #tpu.memory_space<vmem>>, vector<1x8x128xf32>
    %141 = vector.shape_cast %140 : vector<1x8x128xf32> to vector<8x128xf32>
    %142 = vector.shape_cast %139 : vector<8x128xf32> to vector<1x8x128xf32>
    tpu.vector_store %arg9[%c2, %c0_84, %c0_85], %142 {strides = array<i32>} : memref<4x8x128xf32, #tpu.memory_space<vmem>>, vector<1x8x128xf32>,
    %c0_86 = arith.constant 0 : index
    %c0_87 = arith.constant 0 : index
    %143 = vector.load %arg3[%c0_86, %c0_87] : memref<128x128xf32, #tpu.memory_space<vmem>>, vector<128x128xf32>
    %cst_88 = arith.constant dense<0.000000e+00> : vector<8x128xf32>
    %144 = tpu.matmul %139, %143, %cst_88 {dimension_numbers = #tpu.dot_dimension_numbers<[1], [0], [0], [1], [0, 0, 1, 1], [], []>} : vector<8x128xf32>, vector<128x128xf32>, vector<8x128xf32> -> vector<8x128xf32>
    %145 = vector.broadcast %1 : vector<1x128xf32> to vector<8x128xf32>
    %146 = arith.addf %144, %145 : vector<8x128xf32>
    %cst_89 = arith.constant 0.00999999977 : f32
    %147 = vector.broadcast %cst_89 : f32 to vector<8x128xf32>
    %148 = arith.mulf %147, %146 : vector<8x128xf32>
    %149 = arith.maximumf %146, %148 : vector<8x128xf32>
    %c0_90 = arith.constant 0 : index
    %c0_91 = arith.constant 0 : index
    %150 = vector.load %arg4[%c0_90, %c0_91] : memref<128x128xf32, #tpu.memory_space<vmem>>, vector<128x128xf32>
    %cst_92 = arith.constant dense<0.000000e+00> : vector<8x128xf32>
    %151 = tpu.matmul %149, %150, %cst_92 {dimension_numbers = #tpu.dot_dimension_numbers<[1], [0], [0], [1], [0, 0, 1, 1], [], []>} : vector<8x128xf32>, vector<128x128xf32>, vector<8x128xf32> -> vector<8x128xf32>
    %152 = vector.broadcast %2 : vector<1x128xf32> to vector<8x128xf32>
    %153 = arith.addf %151, %152 : vector<8x128xf32>
    %cst_93 = arith.constant 0.00999999977 : f32
    %154 = vector.broadcast %cst_93 : f32 to vector<8x128xf32>
    %155 = arith.mulf %154, %153 : vector<8x128xf32>
    %156 = arith.maximumf %153, %155 : vector<8x128xf32>
    %c0_94 = arith.constant 0 : index
    %c0_95 = arith.constant 0 : index
    %157 = vector.load %arg5[%c0_94, %c0_95] : memref<128x128xf32, #tpu.memory_space<vmem>>, vector<128x128xf32>
    %cst_96 = arith.constant dense<0.000000e+00> : vector<8x128xf32>
    %158 = tpu.matmul %156, %157, %cst_96 {dimension_numbers = #tpu.dot_dimension_numbers<[1], [0], [0], [1], [0, 0, 1, 1], [], []>} : vector<8x128xf32>, vector<128x128xf32>, vector<8x128xf32> -> vector<8x128xf32>
    %159 = vector.broadcast %3 : vector<1x128xf32> to vector<8x128xf32>
    %160 = arith.addf %158, %159 : vector<8x128xf32>
    %c0_97 = arith.constant 0 : index
    %c0_98 = arith.constant 0 : index
    %161 = vector.load %arg6[%c0_97, %c0_98] : memref<128x128xf32, #tpu.memory_space<vmem>>, vector<128x128xf32>
    %cst_99 = arith.constant dense<0.000000e+00> : vector<8x128xf32>
    %162 = tpu.matmul %160, %161, %cst_99 {dimension_numbers = #tpu.dot_dimension_numbers<[1], [0], [0], [1], [0, 0, 1, 1], [], []>} : vector<8x128xf32>, vector<128x128xf32>, vector<8x128xf32> -> vector<8x128xf32>
    %163 = vector.broadcast %4 : vector<1x128xf32> to vector<8x128xf32>
    %164 = arith.addf %162, %163 : vector<8x128xf32>
    %cst_100 = arith.constant 0.00999999977 : f32
    %165 = vector.broadcast %cst_100 : f32 to vector<8x128xf32>
    %166 = arith.mulf %165, %164 : vector<8x128xf32>
    %167 = arith.maximumf %164, %166 : vector<8x128xf32>
    %c0_101 = arith.constant 0 : index
    %c0_102 = arith.constant 0 : index
    %168 = vector.load %arg7[%c0_101, %c0_102] : memref<128x128xf32, #tpu.memory_space<vmem>>, vector<128x128xf32>
    %cst_103 = arith.constant dense<0.000000e+00> : vector<8x128xf32>
    %169 = tpu.matmul %167, %168, %cst_103 {dimension_numbers = #tpu.dot_dimension_numbers<[1], [0], [0], [1], [0, 0, 1, 1], [], []>} : vector<8x128xf32>, vector<128x128xf32>, vector<8x128xf32> -> vector<8x128xf32>
    %170 = vector.broadcast %5 : vector<1x128xf32> to vector<8x128xf32>
    %171 = arith.addf %169, %170 : vector<8x128xf32>
    %cst_104 = arith.constant 0.00999999977 : f32
    %172 = vector.broadcast %cst_104 : f32 to vector<8x128xf32>
    %173 = arith.mulf %172, %171 : vector<8x128xf32>
    %174 = arith.maximumf %171, %173 : vector<8x128xf32>
    %c0_105 = arith.constant 0 : index
    %c0_106 = arith.constant 0 : index
    %175 = vector.load %arg8[%c0_105, %c0_106] : memref<128x128xf32, #tpu.memory_space<vmem>>, vector<128x128xf32>
    %cst_107 = arith.constant dense<0.000000e+00> : vector<8x128xf32>
    %176 = tpu.matmul %174, %175, %cst_107 {dimension_numbers = #tpu.dot_dimension_numbers<[1], [0], [0], [1], [0, 0, 1, 1], [], []>} : vector<8x128xf32>, vector<128x128xf32>, vector<8x128xf32> -> vector<8x128xf32>
    %177 = vector.broadcast %6 : vector<1x128xf32> to vector<8x128xf32>
    %178 = arith.addf %176, %177 : vector<8x128xf32>
    %c3 = arith.constant 3 : index
    %c0_108 = arith.constant 0 : index
    %c0_109 = arith.constant 0 : index
    %179 = vector.load %arg9[%c3, %c0_108, %c0_109] : memref<4x8x128xf32, #tpu.memory_space<vmem>>, vector<1x8x128xf32>
    %180 = vector.shape_cast %179 : vector<1x8x128xf32> to vector<8x128xf32>
    %181 = vector.shape_cast %178 : vector<8x128xf32> to vector<1x8x128xf32>
    tpu.vector_store %arg9[%c3, %c0_108, %c0_109], %181 {strides = array<i32>} : memref<4x8x128xf32, #tpu.memory_space<vmem>>, vector<1x8x128xf32>,
    return
  }
  func.func @transform_0(%arg0: i32) -> (i32, i32) {
    %c0_i32 = arith.constant 0 : i32
    %c0_i32_0 = arith.constant 0 : i32
    return %arg0, %c0_i32 : i32, i32
  }
  func.func @transform_1(%arg0: i32) -> (i32, i32) {
    %c0_i32 = arith.constant 0 : i32
    %c0_i32_0 = arith.constant 0 : i32
    %c0_i32_1 = arith.constant 0 : i32
    return %c0_i32, %c0_i32_0 : i32, i32
  }
  func.func @transform_2(%arg0: i32) -> (i32, i32) {
    %c0_i32 = arith.constant 0 : i32
    %c0_i32_0 = arith.constant 0 : i32
    %c0_i32_1 = arith.constant 0 : i32
    return %c0_i32, %c0_i32_0 : i32, i32
  }
  func.func @transform_3(%arg0: i32) -> (i32, i32) {
    %c0_i32 = arith.constant 0 : i32
    %c0_i32_0 = arith.constant 0 : i32
    %c0_i32_1 = arith.constant 0 : i32
    return %c0_i32, %c0_i32_0 : i32, i32
  }
  func.func @transform_4(%arg0: i32) -> (i32, i32) {
    %c0_i32 = arith.constant 0 : i32
    %c0_i32_0 = arith.constant 0 : i32
    %c0_i32_1 = arith.constant 0 : i32
    return %c0_i32, %c0_i32_0 : i32, i32
  }
  func.func @transform_5(%arg0: i32) -> (i32, i32) {
    %c0_i32 = arith.constant 0 : i32
    %c0_i32_0 = arith.constant 0 : i32
    %c0_i32_1 = arith.constant 0 : i32
    return %c0_i32, %c0_i32_0 : i32, i32
  }
  func.func @transform_6(%arg0: i32) -> (i32, i32) {
    %c0_i32 = arith.constant 0 : i32
    %c0_i32_0 = arith.constant 0 : i32
    %c0_i32_1 = arith.constant 0 : i32
    return %c0_i32, %c0_i32_0 : i32, i32
  }
  func.func @transform_7(%arg0: i32) -> (i32, i32) {
    %c0_i32 = arith.constant 0 : i32
    %c0_i32_0 = arith.constant 0 : i32
    %c0_i32_1 = arith.constant 0 : i32
    return %c0_i32, %c0_i32_0 : i32, i32
  }
  func.func @transform_8(%arg0: i32) -> (i32, i32, i32) {
    %c0_i32 = arith.constant 0 : i32
    %c0_i32_0 = arith.constant 0 : i32
    %c0_i32_1 = arith.constant 0 : i32
    return %c0_i32, %arg0, %c0_i32_0 : i32, i32, i32
  }
}

module attributes {stable_mosaic.version = 11 : i64} {
  func.func @_fused_kernel(%arg0: i32, %arg1: memref<8x128xf32, #tpu.memory_space<vmem>>, %arg2: memref<8x128xf32, #tpu.memory_space<vmem>>, %arg3: memref<128x128xf32, #tpu.memory_space<vmem>>, %arg4: memref<128x128xf32, #tpu.memory_space<vmem>>, %arg5: memref<128x128xf32, #tpu.memory_space<vmem>>, %arg6: memref<128x128xf32, #tpu.memory_space<vmem>>, %arg7: memref<128x128xf32, #tpu.memory_space<vmem>>, %arg8: memref<128x128xf32, #tpu.memory_space<vmem>>, %arg9: memref<4x8x128xf32, #tpu.memory_space<vmem>>) attributes {dimension_semantics = [#tpu.dimension_semantics<parallel>], iteration_bounds = array<i64: 1>, scalar_prefetch = 0 : i64, scratch_operands = 0 : i64, tpu.core_type = #tpu.core_type<tc>, window_params = [{transform_indices = @transform_0, window_bounds = array<i64: 8, 128>}, {pipeline_mode = #tpu.pipeline_mode<synchronous>, transform_indices = @transform_1, window_bounds = array<i64: 8, 128>}, {pipeline_mode = #tpu.pipeline_mode<synchronous>, transform_indices = @transform_2, window_bounds = array<i64: 128, 128>}, {pipeline_mode = #tpu.pipeline_mode<synchronous>, transform_indices = @transform_3, window_bounds = array<i64: 128, 128>}, {pipeline_mode = #tpu.pipeline_mode<synchronous>, transform_indices = @transform_4, window_bounds = array<i64: 128, 128>}, {pipeline_mode = #tpu.pipeline_mode<synchronous>, transform_indices = @transform_5, window_bounds = array<i64: 128, 128>}, {pipeline_mode = #tpu.pipeline_mode<synchronous>, transform_indices = @transform_6, window_bounds = array<i64: 128, 128>}, {pipeline_mode = #tpu.pipeline_mode<synchronous>, transform_indices = @transform_7, window_bounds = array<i64: 128, 128>}, {transform_indices = @transform_8, window_bounds = array<i64: 4, 8, 128>}]} {
    %c0 = arith.constant 0 : index
    %c0_0 = arith.constant 0 : index
    %0 = vector.load %arg2[%c0, %c0_0] : memref<8x128xf32, #tpu.memory_space<vmem>>, vector<8x128xf32>
    %1 = vector.extract_strided_slice %0 {offsets = [0, 0], sizes = [1, 128], strides = [1, 1]} : vector<8x128xf32> to vector<1x128xf32>
    %2 = vector.extract_strided_slice %0 {offsets = [1, 0], sizes = [1, 128], strides = [1, 1]} : vector<8x128xf32> to vector<1x128xf32>
    %3 = vector.extract_strided_slice %0 {offsets = [2, 0], sizes = [1, 128], strides = [1, 1]} : vector<8x128xf32> to vector<1x128xf32>
    %4 = vector.extract_strided_slice %0 {offsets = [3, 0], sizes = [1, 128], strides = [1, 1]} : vector<8x128xf32> to vector<1x128xf32>
    %5 = vector.extract_strided_slice %0 {offsets = [4, 0], sizes = [1, 128], strides = [1, 1]} : vector<8x128xf32> to vector<1x128xf32>
    %6 = vector.extract_strided_slice %0 {offsets = [5, 0], sizes = [1, 128], strides = [1, 1]} : vector<8x128xf32> to vector<1x128xf32>
    %c0_1 = arith.constant 0 : index
    %c0_2 = arith.constant 0 : index
    %7 = vector.load %arg1[%c0_1, %c0_2] : memref<8x128xf32, #tpu.memory_space<vmem>>, vector<8x128xf32>
    %c0_3 = arith.constant 0 : index
    %c0_4 = arith.constant 0 : index
    %8 = vector.load %arg3[%c0_3, %c0_4] : memref<128x128xf32, #tpu.memory_space<vmem>>, vector<128x128xf32>
    %cst = arith.constant dense<0.000000e+00> : vector<8x128xf32>
    %9 = tpu.matmul %7, %8, %cst {dimension_numbers = #tpu.dot_dimension_numbers<[1], [0], [0], [1], [0, 0, 1, 1], [], []>} : vector<8x128xf32>, vector<128x128xf32>, vector<8x128xf32> -> vector<8x128xf32>
    %10 = vector.broadcast %1 : vector<1x128xf32> to vector<8x128xf32>
    %11 = arith.addf %9, %10 : vector<8x128xf32>
    %cst_5 = arith.constant 0.00999999977 : f32
    %12 = vector.broadcast %cst_5 : f32 to vector<8x128xf32>
    %13 = arith.mulf %12, %11 : vector<8x128xf32>
    %14 = arith.maximumf %11, %13 : vector<8x128xf32>
    %c0_6 = arith.constant 0 : index
    %c0_7 = arith.constant 0 : index
    %15 = vector.load %arg4[%c0_6, %c0_7] : memref<128x128xf32, #tpu.memory_space<vmem>>, vector<128x128xf32>
    %cst_8 = arith.constant dense<0.000000e+00> : vector<8x128xf32>
    %16 = tpu.matmul %14, %15, %cst_8 {dimension_numbers = #tpu.dot_dimension_numbers<[1], [0], [0], [1], [0, 0, 1, 1], [], []>} : vector<8x128xf32>, vector<128x128xf32>, vector<8x128xf32> -> vector<8x128xf32>
    %17 = vector.broadcast %2 : vector<1x128xf32> to vector<8x128xf32>
    %18 = arith.addf %16, %17 : vector<8x128xf32>
    %cst_9 = arith.constant 0.00999999977 : f32
    %19 = vector.broadcast %cst_9 : f32 to vector<8x128xf32>
    %20 = arith.mulf %19, %18 : vector<8x128xf32>
    %21 = arith.maximumf %18, %20 : vector<8x128xf32>
    %c0_10 = arith.constant 0 : index
    %c0_11 = arith.constant 0 : index
    %22 = vector.load %arg5[%c0_10, %c0_11] : memref<128x128xf32, #tpu.memory_space<vmem>>, vector<128x128xf32>
    %cst_12 = arith.constant dense<0.000000e+00> : vector<8x128xf32>
    %23 = tpu.matmul %21, %22, %cst_12 {dimension_numbers = #tpu.dot_dimension_numbers<[1], [0], [0], [1], [0, 0, 1, 1], [], []>} : vector<8x128xf32>, vector<128x128xf32>, vector<8x128xf32> -> vector<8x128xf32>
    %24 = vector.broadcast %3 : vector<1x128xf32> to vector<8x128xf32>
    %25 = arith.addf %23, %24 : vector<8x128xf32>
    %c0_13 = arith.constant 0 : index
    %c0_14 = arith.constant 0 : index
    %26 = vector.load %arg3[%c0_13, %c0_14] : memref<128x128xf32, #tpu.memory_space<vmem>>, vector<128x128xf32>
    %cst_15 = arith.constant dense<0.000000e+00> : vector<8x128xf32>
    %27 = tpu.matmul %25, %26, %cst_15 {dimension_numbers = #tpu.dot_dimension_numbers<[1], [0], [0], [1], [0, 0, 1, 1], [], []>} : vector<8x128xf32>, vector<128x128xf32>, vector<8x128xf32> -> vector<8x128xf32>
    %28 = vector.broadcast %1 : vector<1x128xf32> to vector<8x128xf32>
    %29 = arith.addf %27, %28 : vector<8x128xf32>
    %cst_16 = arith.constant 0.00999999977 : f32
    %30 = vector.broadcast %cst_16 : f32 to vector<8x128xf32>
    %31 = arith.mulf %30, %29 : vector<8x128xf32>
    %32 = arith.maximumf %29, %31 : vector<8x128xf32>
    %c0_17 = arith.constant 0 : index
    %c0_18 = arith.constant 0 : index
    %33 = vector.load %arg4[%c0_17, %c0_18] : memref<128x128xf32, #tpu.memory_space<vmem>>, vector<128x128xf32>
    %cst_19 = arith.constant dense<0.000000e+00> : vector<8x128xf32>
    %34 = tpu.matmul %32, %33, %cst_19 {dimension_numbers = #tpu.dot_dimension_numbers<[1], [0], [0], [1], [0, 0, 1, 1], [], []>} : vector<8x128xf32>, vector<128x128xf32>, vector<8x128xf32> -> vector<8x128xf32>
    %35 = vector.broadcast %2 : vector<1x128xf32> to vector<8x128xf32>
    %36 = arith.addf %34, %35 : vector<8x128xf32>
    %cst_20 = arith.constant 0.00999999977 : f32
    %37 = vector.broadcast %cst_20 : f32 to vector<8x128xf32>
    %38 = arith.mulf %37, %36 : vector<8x128xf32>
    %39 = arith.maximumf %36, %38 : vector<8x128xf32>
    %c0_21 = arith.constant 0 : index
    %c0_22 = arith.constant 0 : index
    %40 = vector.load %arg5[%c0_21, %c0_22] : memref<128x128xf32, #tpu.memory_space<vmem>>, vector<128x128xf32>
    %cst_23 = arith.constant dense<0.000000e+00> : vector<8x128xf32>
    %41 = tpu.matmul %39, %40, %cst_23 {dimension_numbers = #tpu.dot_dimension_numbers<[1], [0], [0], [1], [0, 0, 1, 1], [], []>} : vector<8x128xf32>, vector<128x128xf32>, vector<8x128xf32> -> vector<8x128xf32>
    %42 = vector.broadcast %3 : vector<1x128xf32> to vector<8x128xf32>
    %43 = arith.addf %41, %42 : vector<8x128xf32>
    %c0_24 = arith.constant 0 : index
    %c0_25 = arith.constant 0 : index
    %44 = vector.load %arg6[%c0_24, %c0_25] : memref<128x128xf32, #tpu.memory_space<vmem>>, vector<128x128xf32>
    %cst_26 = arith.constant dense<0.000000e+00> : vector<8x128xf32>
    %45 = tpu.matmul %43, %44, %cst_26 {dimension_numbers = #tpu.dot_dimension_numbers<[1], [0], [0], [1], [0, 0, 1, 1], [], []>} : vector<8x128xf32>, vector<128x128xf32>, vector<8x128xf32> -> vector<8x128xf32>
    %46 = vector.broadcast %4 : vector<1x128xf32> to vector<8x128xf32>
    %47 = arith.addf %45, %46 : vector<8x128xf32>
    %cst_27 = arith.constant 0.00999999977 : f32
    %48 = vector.broadcast %cst_27 : f32 to vector<8x128xf32>
    %49 = arith.mulf %48, %47 : vector<8x128xf32>
    %50 = arith.maximumf %47, %49 : vector<8x128xf32>
    %c0_28 = arith.constant 0 : index
    %c0_29 = arith.constant 0 : index
    %51 = vector.load %arg7[%c0_28, %c0_29] : memref<128x128xf32, #tpu.memory_space<vmem>>, vector<128x128xf32>
    %cst_30 = arith.constant dense<0.000000e+00> : vector<8x128xf32>
    %52 = tpu.matmul %50, %51, %cst_30 {dimension_numbers = #tpu.dot_dimension_numbers<[1], [0], [0], [1], [0, 0, 1, 1], [], []>} : vector<8x128xf32>, vector<128x128xf32>, vector<8x128xf32> -> vector<8x128xf32>
    %53 = vector.broadcast %5 : vector<1x128xf32> to vector<8x128xf32>
    %54 = arith.addf %52, %53 : vector<8x128xf32>
    %cst_31 = arith.constant 0.00999999977 : f32
    %55 = vector.broadcast %cst_31 : f32 to vector<8x128xf32>
    %56 = arith.mulf %55, %54 : vector<8x128xf32>
    %57 = arith.maximumf %54, %56 : vector<8x128xf32>
    %c0_32 = arith.constant 0 : index
    %c0_33 = arith.constant 0 : index
    %58 = vector.load %arg8[%c0_32, %c0_33] : memref<128x128xf32, #tpu.memory_space<vmem>>, vector<128x128xf32>
    %cst_34 = arith.constant dense<0.000000e+00> : vector<8x128xf32>
    %59 = tpu.matmul %57, %58, %cst_34 {dimension_numbers = #tpu.dot_dimension_numbers<[1], [0], [0], [1], [0, 0, 1, 1], [], []>} : vector<8x128xf32>, vector<128x128xf32>, vector<8x128xf32> -> vector<8x128xf32>
    %60 = vector.broadcast %6 : vector<1x128xf32> to vector<8x128xf32>
    %61 = arith.addf %59, %60 : vector<8x128xf32>
    %c0_35 = arith.constant 0 : index
    %c0_36 = arith.constant 0 : index
    %c0_37 = arith.constant 0 : index
    %62 = vector.load %arg9[%c0_35, %c0_36, %c0_37] : memref<4x8x128xf32, #tpu.memory_space<vmem>>, vector<1x8x128xf32>
    %63 = vector.shape_cast %62 : vector<1x8x128xf32> to vector<8x128xf32>
    %64 = vector.shape_cast %61 : vector<8x128xf32> to vector<1x8x128xf32>
    tpu.vector_store %arg9[%c0_35, %c0_36, %c0_37], %64 {strides = array<i32>} : memref<4x8x128xf32, #tpu.memory_space<vmem>>, vector<1x8x128xf32>,
    %c0_38 = arith.constant 0 : index
    %c0_39 = arith.constant 0 : index
    %65 = vector.load %arg3[%c0_38, %c0_39] : memref<128x128xf32, #tpu.memory_space<vmem>>, vector<128x128xf32>
    %cst_40 = arith.constant dense<0.000000e+00> : vector<8x128xf32>
    %66 = tpu.matmul %61, %65, %cst_40 {dimension_numbers = #tpu.dot_dimension_numbers<[1], [0], [0], [1], [0, 0, 1, 1], [], []>} : vector<8x128xf32>, vector<128x128xf32>, vector<8x128xf32> -> vector<8x128xf32>
    %67 = vector.broadcast %1 : vector<1x128xf32> to vector<8x128xf32>
    %68 = arith.addf %66, %67 : vector<8x128xf32>
    %cst_41 = arith.constant 0.00999999977 : f32
    %69 = vector.broadcast %cst_41 : f32 to vector<8x128xf32>
    %70 = arith.mulf %69, %68 : vector<8x128xf32>
    %71 = arith.maximumf %68, %70 : vector<8x128xf32>
    %c0_42 = arith.constant 0 : index
    %c0_43 = arith.constant 0 : index
    %72 = vector.load %arg4[%c0_42, %c0_43] : memref<128x128xf32, #tpu.memory_space<vmem>>, vector<128x128xf32>
    %cst_44 = arith.constant dense<0.000000e+00> : vector<8x128xf32>
    %73 = tpu.matmul %71, %72, %cst_44 {dimension_numbers = #tpu.dot_dimension_numbers<[1], [0], [0], [1], [0, 0, 1, 1], [], []>} : vector<8x128xf32>, vector<128x128xf32>, vector<8x128xf32> -> vector<8x128xf32>
    %74 = vector.broadcast %2 : vector<1x128xf32> to vector<8x128xf32>
    %75 = arith.addf %73, %74 : vector<8x128xf32>
    %cst_45 = arith.constant 0.00999999977 : f32
    %76 = vector.broadcast %cst_45 : f32 to vector<8x128xf32>
    %77 = arith.mulf %76, %75 : vector<8x128xf32>
    %78 = arith.maximumf %75, %77 : vector<8x128xf32>
    %c0_46 = arith.constant 0 : index
    %c0_47 = arith.constant 0 : index
    %79 = vector.load %arg5[%c0_46, %c0_47] : memref<128x128xf32, #tpu.memory_space<vmem>>, vector<128x128xf32>
    %cst_48 = arith.constant dense<0.000000e+00> : vector<8x128xf32>
    %80 = tpu.matmul %78, %79, %cst_48 {dimension_numbers = #tpu.dot_dimension_numbers<[1], [0], [0], [1], [0, 0, 1, 1], [], []>} : vector<8x128xf32>, vector<128x128xf32>, vector<8x128xf32> -> vector<8x128xf32>
    %81 = vector.broadcast %3 : vector<1x128xf32> to vector<8x128xf32>
    %82 = arith.addf %80, %81 : vector<8x128xf32>
    %c0_49 = arith.constant 0 : index
    %c0_50 = arith.constant 0 : index
    %83 = vector.load %arg6[%c0_49, %c0_50] : memref<128x128xf32, #tpu.memory_space<vmem>>, vector<128x128xf32>
    %cst_51 = arith.constant dense<0.000000e+00> : vector<8x128xf32>
    %84 = tpu.matmul %82, %83, %cst_51 {dimension_numbers = #tpu.dot_dimension_numbers<[1], [0], [0], [1], [0, 0, 1, 1], [], []>} : vector<8x128xf32>, vector<128x128xf32>, vector<8x128xf32> -> vector<8x128xf32>
    %85 = vector.broadcast %4 : vector<1x128xf32> to vector<8x128xf32>
    %86 = arith.addf %84, %85 : vector<8x128xf32>
    %cst_52 = arith.constant 0.00999999977 : f32
    %87 = vector.broadcast %cst_52 : f32 to vector<8x128xf32>
    %88 = arith.mulf %87, %86 : vector<8x128xf32>
    %89 = arith.maximumf %86, %88 : vector<8x128xf32>
    %c0_53 = arith.constant 0 : index
    %c0_54 = arith.constant 0 : index
    %90 = vector.load %arg7[%c0_53, %c0_54] : memref<128x128xf32, #tpu.memory_space<vmem>>, vector<128x128xf32>
    %cst_55 = arith.constant dense<0.000000e+00> : vector<8x128xf32>
    %91 = tpu.matmul %89, %90, %cst_55 {dimension_numbers = #tpu.dot_dimension_numbers<[1], [0], [0], [1], [0, 0, 1, 1], [], []>} : vector<8x128xf32>, vector<128x128xf32>, vector<8x128xf32> -> vector<8x128xf32>
    %92 = vector.broadcast %5 : vector<1x128xf32> to vector<8x128xf32>
    %93 = arith.addf %91, %92 : vector<8x128xf32>
    %cst_56 = arith.constant 0.00999999977 : f32
    %94 = vector.broadcast %cst_56 : f32 to vector<8x128xf32>
    %95 = arith.mulf %94, %93 : vector<8x128xf32>
    %96 = arith.maximumf %93, %95 : vector<8x128xf32>
    %c0_57 = arith.constant 0 : index
    %c0_58 = arith.constant 0 : index
    %97 = vector.load %arg8[%c0_57, %c0_58] : memref<128x128xf32, #tpu.memory_space<vmem>>, vector<128x128xf32>
    %cst_59 = arith.constant dense<0.000000e+00> : vector<8x128xf32>
    %98 = tpu.matmul %96, %97, %cst_59 {dimension_numbers = #tpu.dot_dimension_numbers<[1], [0], [0], [1], [0, 0, 1, 1], [], []>} : vector<8x128xf32>, vector<128x128xf32>, vector<8x128xf32> -> vector<8x128xf32>
    %99 = vector.broadcast %6 : vector<1x128xf32> to vector<8x128xf32>
    %100 = arith.addf %98, %99 : vector<8x128xf32>
    %c1 = arith.constant 1 : index
    %c0_60 = arith.constant 0 : index
    %c0_61 = arith.constant 0 : index
    %101 = vector.load %arg9[%c1, %c0_60, %c0_61] : memref<4x8x128xf32, #tpu.memory_space<vmem>>, vector<1x8x128xf32>
    %102 = vector.shape_cast %101 : vector<1x8x128xf32> to vector<8x128xf32>
    %103 = vector.shape_cast %100 : vector<8x128xf32> to vector<1x8x128xf32>
    tpu.vector_store %arg9[%c1, %c0_60, %c0_61], %103 {strides = array<i32>} : memref<4x8x128xf32, #tpu.memory_space<vmem>>, vector<1x8x128xf32>,
    %c0_62 = arith.constant 0 : index
    %c0_63 = arith.constant 0 : index
    %104 = vector.load %arg3[%c0_62, %c0_63] : memref<128x128xf32, #tpu.memory_space<vmem>>, vector<128x128xf32>
    %cst_64 = arith.constant dense<0.000000e+00> : vector<8x128xf32>
    %105 = tpu.matmul %100, %104, %cst_64 {dimension_numbers = #tpu.dot_dimension_numbers<[1], [0], [0], [1], [0, 0, 1, 1], [], []>} : vector<8x128xf32>, vector<128x128xf32>, vector<8x128xf32> -> vector<8x128xf32>
    %106 = vector.broadcast %1 : vector<1x128xf32> to vector<8x128xf32>
    %107 = arith.addf %105, %106 : vector<8x128xf32>
    %cst_65 = arith.constant 0.00999999977 : f32
    %108 = vector.broadcast %cst_65 : f32 to vector<8x128xf32>
    %109 = arith.mulf %108, %107 : vector<8x128xf32>
    %110 = arith.maximumf %107, %109 : vector<8x128xf32>
    %c0_66 = arith.constant 0 : index
    %c0_67 = arith.constant 0 : index
    %111 = vector.load %arg4[%c0_66, %c0_67] : memref<128x128xf32, #tpu.memory_space<vmem>>, vector<128x128xf32>
    %cst_68 = arith.constant dense<0.000000e+00> : vector<8x128xf32>
    %112 = tpu.matmul %110, %111, %cst_68 {dimension_numbers = #tpu.dot_dimension_numbers<[1], [0], [0], [1], [0, 0, 1, 1], [], []>} : vector<8x128xf32>, vector<128x128xf32>, vector<8x128xf32> -> vector<8x128xf32>
    %113 = vector.broadcast %2 : vector<1x128xf32> to vector<8x128xf32>
    %114 = arith.addf %112, %113 : vector<8x128xf32>
    %cst_69 = arith.constant 0.00999999977 : f32
    %115 = vector.broadcast %cst_69 : f32 to vector<8x128xf32>
    %116 = arith.mulf %115, %114 : vector<8x128xf32>
    %117 = arith.maximumf %114, %116 : vector<8x128xf32>
    %c0_70 = arith.constant 0 : index
    %c0_71 = arith.constant 0 : index
    %118 = vector.load %arg5[%c0_70, %c0_71] : memref<128x128xf32, #tpu.memory_space<vmem>>, vector<128x128xf32>
    %cst_72 = arith.constant dense<0.000000e+00> : vector<8x128xf32>
    %119 = tpu.matmul %117, %118, %cst_72 {dimension_numbers = #tpu.dot_dimension_numbers<[1], [0], [0], [1], [0, 0, 1, 1], [], []>} : vector<8x128xf32>, vector<128x128xf32>, vector<8x128xf32> -> vector<8x128xf32>
    %120 = vector.broadcast %3 : vector<1x128xf32> to vector<8x128xf32>
    %121 = arith.addf %119, %120 : vector<8x128xf32>
    %c0_73 = arith.constant 0 : index
    %c0_74 = arith.constant 0 : index
    %122 = vector.load %arg6[%c0_73, %c0_74] : memref<128x128xf32, #tpu.memory_space<vmem>>, vector<128x128xf32>
    %cst_75 = arith.constant dense<0.000000e+00> : vector<8x128xf32>
    %123 = tpu.matmul %121, %122, %cst_75 {dimension_numbers = #tpu.dot_dimension_numbers<[1], [0], [0], [1], [0, 0, 1, 1], [], []>} : vector<8x128xf32>, vector<128x128xf32>, vector<8x128xf32> -> vector<8x128xf32>
    %124 = vector.broadcast %4 : vector<1x128xf32> to vector<8x128xf32>
    %125 = arith.addf %123, %124 : vector<8x128xf32>
    %cst_76 = arith.constant 0.00999999977 : f32
    %126 = vector.broadcast %cst_76 : f32 to vector<8x128xf32>
    %127 = arith.mulf %126, %125 : vector<8x128xf32>
    %128 = arith.maximumf %125, %127 : vector<8x128xf32>
    %c0_77 = arith.constant 0 : index
    %c0_78 = arith.constant 0 : index
    %129 = vector.load %arg7[%c0_77, %c0_78] : memref<128x128xf32, #tpu.memory_space<vmem>>, vector<128x128xf32>
    %cst_79 = arith.constant dense<0.000000e+00> : vector<8x128xf32>
    %130 = tpu.matmul %128, %129, %cst_79 {dimension_numbers = #tpu.dot_dimension_numbers<[1], [0], [0], [1], [0, 0, 1, 1], [], []>} : vector<8x128xf32>, vector<128x128xf32>, vector<8x128xf32> -> vector<8x128xf32>
    %131 = vector.broadcast %5 : vector<1x128xf32> to vector<8x128xf32>
    %132 = arith.addf %130, %131 : vector<8x128xf32>
    %cst_80 = arith.constant 0.00999999977 : f32
    %133 = vector.broadcast %cst_80 : f32 to vector<8x128xf32>
    %134 = arith.mulf %133, %132 : vector<8x128xf32>
    %135 = arith.maximumf %132, %134 : vector<8x128xf32>
    %c0_81 = arith.constant 0 : index
    %c0_82 = arith.constant 0 : index
    %136 = vector.load %arg8[%c0_81, %c0_82] : memref<128x128xf32, #tpu.memory_space<vmem>>, vector<128x128xf32>
    %cst_83 = arith.constant dense<0.000000e+00> : vector<8x128xf32>
    %137 = tpu.matmul %135, %136, %cst_83 {dimension_numbers = #tpu.dot_dimension_numbers<[1], [0], [0], [1], [0, 0, 1, 1], [], []>} : vector<8x128xf32>, vector<128x128xf32>, vector<8x128xf32> -> vector<8x128xf32>
    %138 = vector.broadcast %6 : vector<1x128xf32> to vector<8x128xf32>
    %139 = arith.addf %137, %138 : vector<8x128xf32>
    %c2 = arith.constant 2 : index
    %c0_84 = arith.constant 0 : index
    %c0_85 = arith.constant 0 : index
    %140 = vector.load %arg9[%c2, %c0_84, %c0_85] : memref<4x8x128xf32, #tpu.memory_space<vmem>>, vector<1x8x128xf32>
    %141 = vector.shape_cast %140 : vector<1x8x128xf32> to vector<8x128xf32>
    %142 = vector.shape_cast %139 : vector<8x128xf32> to vector<1x8x128xf32>
    tpu.vector_store %arg9[%c2, %c0_84, %c0_85], %142 {strides = array<i32>} : memref<4x8x128xf32, #tpu.memory_space<vmem>>, vector<1x8x128xf32>,
    %c0_86 = arith.constant 0 : index
    %c0_87 = arith.constant 0 : index
    %143 = vector.load %arg3[%c0_86, %c0_87] : memref<128x128xf32, #tpu.memory_space<vmem>>, vector<128x128xf32>
    %cst_88 = arith.constant dense<0.000000e+00> : vector<8x128xf32>
    %144 = tpu.matmul %139, %143, %cst_88 {dimension_numbers = #tpu.dot_dimension_numbers<[1], [0], [0], [1], [0, 0, 1, 1], [], []>} : vector<8x128xf32>, vector<128x128xf32>, vector<8x128xf32> -> vector<8x128xf32>
    %145 = vector.broadcast %1 : vector<1x128xf32> to vector<8x128xf32>
    %146 = arith.addf %144, %145 : vector<8x128xf32>
    %cst_89 = arith.constant 0.00999999977 : f32
    %147 = vector.broadcast %cst_89 : f32 to vector<8x128xf32>
    %148 = arith.mulf %147, %146 : vector<8x128xf32>
    %149 = arith.maximumf %146, %148 : vector<8x128xf32>
    %c0_90 = arith.constant 0 : index
    %c0_91 = arith.constant 0 : index
    %150 = vector.load %arg4[%c0_90, %c0_91] : memref<128x128xf32, #tpu.memory_space<vmem>>, vector<128x128xf32>
    %cst_92 = arith.constant dense<0.000000e+00> : vector<8x128xf32>
    %151 = tpu.matmul %149, %150, %cst_92 {dimension_numbers = #tpu.dot_dimension_numbers<[1], [0], [0], [1], [0, 0, 1, 1], [], []>} : vector<8x128xf32>, vector<128x128xf32>, vector<8x128xf32> -> vector<8x128xf32>
    %152 = vector.broadcast %2 : vector<1x128xf32> to vector<8x128xf32>
    %153 = arith.addf %151, %152 : vector<8x128xf32>
    %cst_93 = arith.constant 0.00999999977 : f32
    %154 = vector.broadcast %cst_93 : f32 to vector<8x128xf32>
    %155 = arith.mulf %154, %153 : vector<8x128xf32>
    %156 = arith.maximumf %153, %155 : vector<8x128xf32>
    %c0_94 = arith.constant 0 : index
    %c0_95 = arith.constant 0 : index
    %157 = vector.load %arg5[%c0_94, %c0_95] : memref<128x128xf32, #tpu.memory_space<vmem>>, vector<128x128xf32>
    %cst_96 = arith.constant dense<0.000000e+00> : vector<8x128xf32>
    %158 = tpu.matmul %156, %157, %cst_96 {dimension_numbers = #tpu.dot_dimension_numbers<[1], [0], [0], [1], [0, 0, 1, 1], [], []>} : vector<8x128xf32>, vector<128x128xf32>, vector<8x128xf32> -> vector<8x128xf32>
    %159 = vector.broadcast %3 : vector<1x128xf32> to vector<8x128xf32>
    %160 = arith.addf %158, %159 : vector<8x128xf32>
    %c0_97 = arith.constant 0 : index
    %c0_98 = arith.constant 0 : index
    %161 = vector.load %arg6[%c0_97, %c0_98] : memref<128x128xf32, #tpu.memory_space<vmem>>, vector<128x128xf32>
    %cst_99 = arith.constant dense<0.000000e+00> : vector<8x128xf32>
    %162 = tpu.matmul %160, %161, %cst_99 {dimension_numbers = #tpu.dot_dimension_numbers<[1], [0], [0], [1], [0, 0, 1, 1], [], []>} : vector<8x128xf32>, vector<128x128xf32>, vector<8x128xf32> -> vector<8x128xf32>
    %163 = vector.broadcast %4 : vector<1x128xf32> to vector<8x128xf32>
    %164 = arith.addf %162, %163 : vector<8x128xf32>
    %cst_100 = arith.constant 0.00999999977 : f32
    %165 = vector.broadcast %cst_100 : f32 to vector<8x128xf32>
    %166 = arith.mulf %165, %164 : vector<8x128xf32>
    %167 = arith.maximumf %164, %166 : vector<8x128xf32>
    %c0_101 = arith.constant 0 : index
    %c0_102 = arith.constant 0 : index
    %168 = vector.load %arg7[%c0_101, %c0_102] : memref<128x128xf32, #tpu.memory_space<vmem>>, vector<128x128xf32>
    %cst_103 = arith.constant dense<0.000000e+00> : vector<8x128xf32>
    %169 = tpu.matmul %167, %168, %cst_103 {dimension_numbers = #tpu.dot_dimension_numbers<[1], [0], [0], [1], [0, 0, 1, 1], [], []>} : vector<8x128xf32>, vector<128x128xf32>, vector<8x128xf32> -> vector<8x128xf32>
    %170 = vector.broadcast %5 : vector<1x128xf32> to vector<8x128xf32>
    %171 = arith.addf %169, %170 : vector<8x128xf32>
    %cst_104 = arith.constant 0.00999999977 : f32
    %172 = vector.broadcast %cst_104 : f32 to vector<8x128xf32>
    %173 = arith.mulf %172, %171 : vector<8x128xf32>
    %174 = arith.maximumf %171, %173 : vector<8x128xf32>
    %c0_105 = arith.constant 0 : index
    %c0_106 = arith.constant 0 : index
    %175 = vector.load %arg8[%c0_105, %c0_106] : memref<128x128xf32, #tpu.memory_space<vmem>>, vector<128x128xf32>
    %cst_107 = arith.constant dense<0.000000e+00> : vector<8x128xf32>
    %176 = tpu.matmul %174, %175, %cst_107 {dimension_numbers = #tpu.dot_dimension_numbers<[1], [0], [0], [1], [0, 0, 1, 1], [], []>} : vector<8x128xf32>, vector<128x128xf32>, vector<8x128xf32> -> vector<8x128xf32>
    %177 = vector.broadcast %6 : vector<1x128xf32> to vector<8x128xf32>
    %178 = arith.addf %176, %177 : vector<8x128xf32>
    %c3 = arith.constant 3 : index
    %c0_108 = arith.constant 0 : index
    %c0_109 = arith.constant 0 : index
    %179 = vector.load %arg9[%c3, %c0_108, %c0_109] : memref<4x8x128xf32, #tpu.memory_space<vmem>>, vector<1x8x128xf32>
    %180 = vector.shape_cast %179 : vector<1x8x128xf32> to vector<8x128xf32>
    %181 = vector.shape_cast %178 : vector<8x128xf32> to vector<1x8x128xf32>
    tpu.vector_store %arg9[%c3, %c0_108, %c0_109], %181 {strides = array<i32>} : memref<4x8x128xf32, #tpu.memory_space<vmem>>, vector<1x8x128xf32>,
    return
  }
  func.func @transform_0(%arg0: i32) -> (i32, i32) {
    %c0_i32 = arith.constant 0 : i32
    %c0_i32_0 = arith.constant 0 : i32
    return %arg0, %c0_i32 : i32, i32
  }
  func.func @transform_1(%arg0: i32) -> (i32, i32) {
    %c0_i32 = arith.constant 0 : i32
    %c0_i32_0 = arith.constant 0 : i32
    %c0_i32_1 = arith.constant 0 : i32
    return %c0_i32, %c0_i32_0 : i32, i32
  }
  func.func @transform_2(%arg0: i32) -> (i32, i32) {
    %c0_i32 = arith.constant 0 : i32
    %c0_i32_0 = arith.constant 0 : i32
    %c0_i32_1 = arith.constant 0 : i32
    return %c0_i32, %c0_i32_0 : i32, i32
  }
  func.func @transform_3(%arg0: i32) -> (i32, i32) {
    %c0_i32 = arith.constant 0 : i32
    %c0_i32_0 = arith.constant 0 : i32
    %c0_i32_1 = arith.constant 0 : i32
    return %c0_i32, %c0_i32_0 : i32, i32
  }
  func.func @transform_4(%arg0: i32) -> (i32, i32) {
    %c0_i32 = arith.constant 0 : i32
    %c0_i32_0 = arith.constant 0 : i32
    %c0_i32_1 = arith.constant 0 : i32
    return %c0_i32, %c0_i32_0 : i32, i32
  }
  func.func @transform_5(%arg0: i32) -> (i32, i32) {
    %c0_i32 = arith.constant 0 : i32
    %c0_i32_0 = arith.constant 0 : i32
    %c0_i32_1 = arith.constant 0 : i32
    return %c0_i32, %c0_i32_0 : i32, i32
  }
  func.func @transform_6(%arg0: i32) -> (i32, i32) {
    %c0_i32 = arith.constant 0 : i32
    %c0_i32_0 = arith.constant 0 : i32
    %c0_i32_1 = arith.constant 0 : i32
    return %c0_i32, %c0_i32_0 : i32, i32
  }
  func.func @transform_7(%arg0: i32) -> (i32, i32) {
    %c0_i32 = arith.constant 0 : i32
    %c0_i32_0 = arith.constant 0 : i32
    %c0_i32_1 = arith.constant 0 : i32
    return %c0_i32, %c0_i32_0 : i32, i32
  }
  func.func @transform_8(%arg0: i32) -> (i32, i32, i32) {
    %c0_i32 = arith.constant 0 : i32
    %c0_i32_0 = arith.constant 0 : i32
    %c0_i32_1 = arith.constant 0 : i32
    return %c0_i32, %arg0, %c0_i32_0 : i32, i32, i32
  }
}

</mosaic_0001>

<bundles_post_ra>
// kernel: _feed_forward_fused.1
= control target key start
LH: loop header
LB: loop body
LE: loop exit
PB: predicated region body
PF: predicated region fallthrough
CT: control target
= control target key end

     0   :  { %v3785_v0 = vmov 0.0   ;;  %vm3786_vm0 = vmmov 0   ;;  %v47_v46 = vlaneseq  ;;  %s5783_s2 = inlined_call_operand.vmem [shape: f32[128,128], index: 2, kind: input, shape index: {}]   ;;  %s5784_s3 = inlined_call_operand.vmem [shape: f32[128,128], index: 3, kind: input, shape index: {}]   ;;  %s5785_s0 = inlined_call_operand.vmem [shape: f32[8,128], index: 0, kind: input, shape index: {}]   ;;  %s5786_s4 = inlined_call_operand.vmem [shape: f32[128,128], index: 4, kind: input, shape index: {}]   ;;  %s5787_s1 = inlined_call_operand.vmem [shape: f32[8,128], index: 1, kind: input, shape index: {}]   ;;  %s5788_s5 = inlined_call_operand.vmem [shape: f32[128,128], index: 5, kind: input, shape index: {}]   ;;  %s5789_s6 = inlined_call_operand.vmem [shape: f32[128,128], index: 6, kind: input, shape index: {}]   ;;  %s5790_s7 = inlined_call_operand.vmem [shape: f32[128,128], index: 7, kind: input, shape index: {}]   ;;  %s5791_s8 = inlined_call_operand.vmem [shape: f32[4,8,128], index: 8, kind: output, shape index: {}]  }
   0x1   :  { %2838 = vmatprep.subr.mxu0 %v3785_v0  ;;  %v3836_v1 = vld [vmem:[%s5783_s2 + $0x78] sm:$0xff]  ;;  %v3841_v2 = vld [vmem:[%s5783_s2 + $0x70] sm:$0xff]  ;;  %2870 = vmatprep.mubr.msk.f32.mxu0 %vm3786_vm0, %v3785_v0  ;;  %v3851_v3 = vld [vmem:[%s5783_s2 + $0x68] sm:$0xff] }
   0x2   :  { %2839 = vmatpush3.msra.mxu0 %v3836_v1  ;;  %2873 = vmatprep.subr.mxu1 %v3785_v0  ;;  %v3860_v4 = vld [vmem:[%s5783_s2 + $0x60] sm:$0xff]  ;;  %v3866_v5 = vld [vmem:[%s5784_s3 + $0x78] sm:$0xff]  ;;  %v3878_v7 = vld [vmem:[%s5784_s3 + $0x70] sm:$0xff]  ;;  %v4151_v47 = vshrl.u32 %v47_v46, 7 }
   0x3   :  { %2840 = vmatprep.subr.mxu0 %v3785_v0  ;;  %2905 = vmatprep.mubr.msk.f32.mxu1 %vm3786_vm0, %v3785_v0  ;;  %v3872_v6 = vld [vmem:[%s5783_s2 + $0x58] sm:$0xff]  ;;  %v3885_v8 = vld [vmem:[%s5784_s3 + $0x68] sm:$0xff]  ;;  %v3891_v9 = vld [vmem:[%s5783_s2 + $0x50] sm:$0xff] }
   0x4   :  { %2841 = vmatpush3.msra.mxu0 %v3841_v2  ;;  %2874 = vmatpush3.msra.mxu1 %v3866_v5  ;;  %v3899_v10 = vld [vmem:[%s5784_s3 + $0x60] sm:$0xff]  ;;  %v3905_v11 = vld [vmem:[%s5783_s2 + $0x48] sm:$0xff]  ;;  %v3913_v12 = vld [vmem:[%s5784_s3 + $0x58] sm:$0xff]  ;;  %v49_v48 = vsub.s32 0, %v4151_v47  ;;  %v141_v60 = vsub.s32 1, %v4151_v47 }
   0x5   :  { %2842 = vmatprep.subr.mxu0 %v3785_v0  ;;  %2875 = vmatprep.subr.mxu1 %v3785_v0  ;;  %v3919_v13 = vld [vmem:[%s5783_s2 + $0x40] sm:$0xff]  ;;  %v3927_v14 = vld [vmem:[%s5784_s3 + $0x50] sm:$0xff]  ;;  %v3933_v15 = vld [vmem:[%s5783_s2 + $0x38] sm:$0xff] }
   0x6   :  { %2843 = vmatpush3.msra.mxu0 %v3851_v3  ;;  %2876 = vmatpush3.msra.mxu1 %v3878_v7  ;;  %v3941_v16 = vld [vmem:[%s5784_s3 + $0x48] sm:$0xff]  ;;  %v3947_v17 = vld [vmem:[%s5783_s2 + $0x30] sm:$0xff]  ;;  %v3955_v18 = vld [vmem:[%s5784_s3 + $0x40] sm:$0xff] }
   0x7   :  { %2844 = vmatprep.subr.mxu0 %v3785_v0  ;;  %2877 = vmatprep.subr.mxu1 %v3785_v0  ;;  %v3961_v19 = vld [vmem:[%s5783_s2 + $0x28] sm:$0xff]  ;;  %v3969_v20 = vld [vmem:[%s5784_s3 + $0x38] sm:$0xff]  ;;  %v3975_v21 = vld [vmem:[%s5783_s2 + $0x20] sm:$0xff] }
   0x8   :  { %2845 = vmatpush3.msra.mxu0 %v3860_v4  ;;  %2878 = vmatpush3.msra.mxu1 %v3885_v8  ;;  %v3983_v22 = vld [vmem:[%s5784_s3 + $0x30] sm:$0xff]  ;;  %v3989_v23 = vld [vmem:[%s5783_s2 + $0x18] sm:$0xff]  ;;  %v3997_v24 = vld [vmem:[%s5784_s3 + $0x28] sm:$0xff] }
   0x9   :  { %2846 = vmatprep.subr.mxu0 %v3785_v0  ;;  %2879 = vmatprep.subr.mxu1 %v3785_v0  ;;  %v4003_v25 = vld [vmem:[%s5783_s2 + $0x10] sm:$0xff]  ;;  %v4011_v26 = vld [vmem:[%s5784_s3 + $0x20] sm:$0xff]  ;;  %v4017_v27 = vld [vmem:[%s5783_s2 + $0x8] sm:$0xff] }
   0xa   :  { %2847 = vmatpush3.msra.mxu0 %v3872_v6  ;;  %2880 = vmatpush3.msra.mxu1 %v3899_v10  ;;  %v4026_v28 = vld [vmem:[%s5783_s2] sm:$0xff]  ;;  %v4042_v30 = vld [vmem:[%s5784_s3 + $0x18] sm:$0xff]  ;;  %v4049_v31 = vld [vmem:[%s5784_s3 + $0x10] sm:$0xff] }
   0xb   :  { %2848 = vmatprep.subr.mxu0 %v3785_v0  ;;  %2881 = vmatprep.subr.mxu1 %v3785_v0  ;;  %v30_v29 = vld [vmem:[%s5785_s0] sm:$0xff]  ;;  %v4056_v32 = vld [vmem:[%s5784_s3 + $0x8] sm:$0xff]  ;;  %v4070_v34 = vld [vmem:[%s5786_s4 + $0x78] sm:$0xff] }
   0xc   :  { %2849 = vmatpush3.msra.mxu0 %v3891_v9  ;;  %2882 = vmatpush3.msra.mxu1 %v3913_v12  ;;  %v4063_v33 = vld [vmem:[%s5784_s3] sm:$0xff]  ;;  %v4075_v35 = vld [vmem:[%s5786_s4 + $0x70] sm:$0xff]  ;;  %v4082_v36 = vld [vmem:[%s5786_s4 + $0x68] sm:$0xff] }
   0xd   :  { %2850 = vmatprep.subr.mxu0 %v3785_v0  ;;  %2883 = vmatprep.subr.mxu1 %v3785_v0  ;;  %v4089_v37 = vld [vmem:[%s5786_s4 + $0x60] sm:$0xff]  ;;  %v4096_v38 = vld [vmem:[%s5786_s4 + $0x58] sm:$0xff]  ;;  %v4103_v39 = vld [vmem:[%s5786_s4 + $0x50] sm:$0xff] }
   0xe   :  { %2851 = vmatpush3.msra.mxu0 %v3905_v11  ;;  %2884 = vmatpush3.msra.mxu1 %v3927_v14  ;;  %v4110_v40 = vld [vmem:[%s5786_s4 + $0x48] sm:$0xff]  ;;  %v4117_v41 = vld [vmem:[%s5786_s4 + $0x40] sm:$0xff]  ;;  %v4124_v42 = vld [vmem:[%s5786_s4 + $0x38] sm:$0xff] }
   0xf   :  { %2852 = vmatprep.subr.mxu0 %v3785_v0  ;;  %2885 = vmatprep.subr.mxu1 %v3785_v0  ;;  %v4131_v43 = vld [vmem:[%s5786_s4 + $0x30] sm:$0xff]  ;;  %v4138_v44 = vld [vmem:[%s5786_s4 + $0x28] sm:$0xff]  ;;  %v4145_v45 = vld [vmem:[%s5786_s4 + $0x20] sm:$0xff] }
  0x10   :  { %2853 = vmatpush3.msra.mxu0 %v3919_v13  ;;  %2886 = vmatpush3.msra.mxu1 %v3941_v16  ;;  %v4157_v49 = vld [vmem:[%s5787_s1] sm:$0xff]  ;;  %v4200_v56 = vld [vmem:[%s5786_s4 + $0x18] sm:$0xff]  ;;  %v4207_v57 = vld [vmem:[%s5786_s4 + $0x10] sm:$0xff] }
  0x11   :  { %2854 = vmatprep.subr.mxu0 %v3785_v0  ;;  %2887 = vmatprep.subr.mxu1 %v3785_v0  ;;  %v4160_v50 = vrot.slane %v4157_v49, %v49_v48  ;;  %v4214_v58 = vld [vmem:[%s5786_s4 + $0x8] sm:$0xff]  ;;  %v4221_v59 = vld [vmem:[%s5786_s4] sm:$0xff]  ;;  %v4227_v61 = vrot.slane %v4157_v49, %v141_v60 }
  0x12   :  { %2855 = vmatpush3.msra.mxu0 %v3933_v15  ;;  %2888 = vmatpush3.msra.mxu1 %v3955_v18 }
  0x13   :  { %2856 = vmatprep.subr.mxu0 %v3785_v0  ;;  %2889 = vmatprep.subr.mxu1 %v3785_v0  ;;  %5875 = vst [vmem:[#allocation2_spill] sm:$0xff] %v4227_v61 }
  0x14   :  { %2857 = vmatpush3.msra.mxu0 %v3947_v17  ;;  %2890 = vmatpush3.msra.mxu1 %v3969_v20 }
  0x15   :  { %2858 = vmatprep.subr.mxu0 %v3785_v0  ;;  %2891 = vmatprep.subr.mxu1 %v3785_v0 }
  0x16   :  { %2859 = vmatpush3.msra.mxu0 %v3961_v19  ;;  %2892 = vmatpush3.msra.mxu1 %v3983_v22 }
  0x17   :  { %2860 = vmatprep.subr.mxu0 %v3785_v0  ;;  %2893 = vmatprep.subr.mxu1 %v3785_v0 }
  0x18   :  { %2861 = vmatpush3.msra.mxu0 %v3975_v21  ;;  %2894 = vmatpush3.msra.mxu1 %v3997_v24 }
  0x19   :  { %2862 = vmatprep.subr.mxu0 %v3785_v0  ;;  %2895 = vmatprep.subr.mxu1 %v3785_v0 }
  0x1a   :  { %2863 = vmatpush3.msra.mxu0 %v3989_v23  ;;  %2896 = vmatpush3.msra.mxu1 %v4011_v26 }
  0x1b   :  { %2864 = vmatprep.subr.mxu0 %v3785_v0  ;;  %2897 = vmatprep.subr.mxu1 %v3785_v0 }
  0x1c   :  { %2865 = vmatpush3.msra.mxu0 %v4003_v25  ;;  %2898 = vmatpush3.msra.mxu1 %v4042_v30 }
  0x1d   :  { %2866 = vmatprep.subr.mxu0 %v3785_v0  ;;  %2899 = vmatprep.subr.mxu1 %v3785_v0 }
  0x1e   :  { %2867 = vmatpush3.msra.mxu0 %v4017_v27  ;;  %2900 = vmatpush3.msra.mxu1 %v4049_v31 }
  0x1f   :  { %2868 = vmatprep.subr.mxu0 %v3785_v0  ;;  %2901 = vmatprep.subr.mxu1 %v3785_v0 }
  0x20   :  { %2869 = vmatpush3.msra.mxu0 %v4026_v28  ;;  %2902 = vmatpush3.msra.mxu1 %v4056_v32 }
  0x21   :  { %2871 = vmatmul.mubr.f32.vlgmr.msra.gmra.mxu0 %v30_v29  ;;  %2908 = vmatprep.subr.mxu0 %v3785_v0 }
  0x22   :  { %2940 = vmatprep.mubr.msk.f32.mxu0 %vm3786_vm0, %v3785_v0  ;;  %2903 = vmatprep.subr.mxu1 %v3785_v0 }
  0x23   :  { %2904 = vmatpush3.msra.mxu1 %v4063_v33  ;;  %2909 = vmatpush3.msra.mxu0 %v4070_v34 }
  0x24   :  { %2943 = vmatprep.subr.mxu1 %v3785_v0  ;;  %2910 = vmatprep.subr.mxu0 %v3785_v0 }
  0x25   :  { %2911 = vmatpush3.msra.mxu0 %v4075_v35 }
  0x26   :  { %2912 = vmatprep.subr.mxu0 %v3785_v0 }
  0x27   :  { %2913 = vmatpush3.msra.mxu0 %v4082_v36 }
  0x28   :  { %2914 = vmatprep.subr.mxu0 %v3785_v0 }
  0x29   :  { %2915 = vmatpush3.msra.mxu0 %v4089_v37 }
  0x2a   :  { %2916 = vmatprep.subr.mxu0 %v3785_v0 }
  0x2b   :  { %2917 = vmatpush3.msra.mxu0 %v4096_v38 }
  0x2c   :  { %2918 = vmatprep.subr.mxu0 %v3785_v0 }
  0x2d   :  { %2919 = vmatpush3.msra.mxu0 %v4103_v39 }
  0x2e   :  { %2920 = vmatprep.subr.mxu0 %v3785_v0 }
  0x2f   :  { %2921 = vmatpush3.msra.mxu0 %v4110_v40 }
  0x30   :  { %2922 = vmatprep.subr.mxu0 %v3785_v0 }
  0x31   :  { %2923 = vmatpush3.msra.mxu0 %v4117_v41 }
  0x32   :  { %2924 = vmatprep.subr.mxu0 %v3785_v0 }
  0x33   :  { %2925 = vmatpush3.msra.mxu0 %v4124_v42 }
  0x34   :  { %2926 = vmatprep.subr.mxu0 %v3785_v0 }
  0x35   :  { %2927 = vmatpush3.msra.mxu0 %v4131_v43 }
  0x36   :  { %2928 = vmatprep.subr.mxu0 %v3785_v0 }
  0x37   :  { %2929 = vmatpush3.msra.mxu0 %v4138_v44 }
  0x38   :  { %2930 = vmatprep.subr.mxu0 %v3785_v0 }
  0x39   :  { %2931 = vmatpush3.msra.mxu0 %v4145_v45 }
  0x3a   :  { %2932 = vmatprep.subr.mxu0 %v3785_v0 }
  0x3b   :  { %2933 = vmatpush3.msra.mxu0 %v4200_v56 }
  0x3c   :  { %2934 = vmatprep.subr.mxu0 %v3785_v0 }
  0x3d   :  { %2935 = vmatpush3.msra.mxu0 %v4207_v57 }
  0x3e   :  { %2936 = vmatprep.subr.mxu0 %v3785_v0 }
  0x3f   :  { %2937 = vmatpush3.msra.mxu0 %v4214_v58 }
  0x40   :  { %2938 = vmatprep.subr.mxu0 %v3785_v0 }
  0x41   :  { %2939 = vmatpush3.msra.mxu0 %v4221_v59 }
  0x42   :  { %2978 = vmatprep.subr.mxu0 %v3785_v0 }
  0xe1   :  { %v117_v51 = vpop.f32.mrf.mxu0 }
  0xe2   :  { %v118_v52 = vadd.f32 %v117_v51, %v4160_v50  ;;  %v233_v51 = vsub.s32 2, %v4151_v47 }
  0xe3   :  { %v2872_v53 = vpop.f32.mrf.mxu0 }
  0xe4   :  { %v121_v54 = vmul.f32 0.01, %v118_v52 }
  0xe6   :  { %v122_v55 = vmax.f32 %v118_v52, %v121_v54  ;;  %v4266_v52 = vrot.slane %v4157_v49, %v233_v51  ;;  %v4314_v51 = vld [vmem:[%s5788_s5 + $0x70] sm:$0xff] }
  0xe8   :  { %2906 = vmatmul.mubr.f32.vlgmr.msra.gmra.mxu1 %v122_v55  ;;  %5876 = vst [vmem:[#allocation3_spill] sm:$0xff] %v4266_v52 }
  0xe9   :  { %2944 = vmatpush3.msra.mxu1 %v3836_v1  ;;  %2975 = vmatprep.mubr.msk.f32.mxu1 %vm3786_vm0, %v3785_v0 }
  0xea   :  { %2945 = vmatprep.subr.mxu1 %v3785_v0 }
  0xeb   :  { %2946 = vmatpush3.msra.mxu1 %v3841_v2 }
  0xec   :  { %2947 = vmatprep.subr.mxu1 %v3785_v0 }
  0xed   :  { %2948 = vmatpush3.msra.mxu1 %v3851_v3 }
  0xee   :  { %2949 = vmatprep.subr.mxu1 %v3785_v0 }
  0xef   :  { %2950 = vmatpush3.msra.mxu1 %v3860_v4 }
  0xf0   :  { %2951 = vmatprep.subr.mxu1 %v3785_v0 }
  0xf1   :  { %2952 = vmatpush3.msra.mxu1 %v3872_v6 }
  0xf2   :  { %2953 = vmatprep.subr.mxu1 %v3785_v0 }
  0xf3   :  { %2954 = vmatpush3.msra.mxu1 %v3891_v9 }
  0xf4   :  { %2955 = vmatprep.subr.mxu1 %v3785_v0 }
  0xf5   :  { %2956 = vmatpush3.msra.mxu1 %v3905_v11 }
  0xf6   :  { %2957 = vmatprep.subr.mxu1 %v3785_v0 }
  0xf7   :  { %2958 = vmatpush3.msra.mxu1 %v3919_v13 }
  0xf8   :  { %2959 = vmatprep.subr.mxu1 %v3785_v0 }
  0xf9   :  { %2960 = vmatpush3.msra.mxu1 %v3933_v15 }
  0xfa   :  { %2961 = vmatprep.subr.mxu1 %v3785_v0 }
  0xfb   :  { %2962 = vmatpush3.msra.mxu1 %v3947_v17 }
  0xfc   :  { %2963 = vmatprep.subr.mxu1 %v3785_v0 }
  0xfd   :  { %2964 = vmatpush3.msra.mxu1 %v3961_v19 }
  0xfe   :  { %2965 = vmatprep.subr.mxu1 %v3785_v0 }
  0xff   :  { %2966 = vmatpush3.msra.mxu1 %v3975_v21 }
 0x100   :  { %2967 = vmatprep.subr.mxu1 %v3785_v0 }
 0x101   :  { %2968 = vmatpush3.msra.mxu1 %v3989_v23 }
 0x102   :  { %2969 = vmatprep.subr.mxu1 %v3785_v0 }
 0x103   :  { %2970 = vmatpush3.msra.mxu1 %v4003_v25 }
 0x104   :  { %2971 = vmatprep.subr.mxu1 %v3785_v0 }
 0x105   :  { %2972 = vmatpush3.msra.mxu1 %v4017_v27 }
 0x106   :  { %2973 = vmatprep.subr.mxu1 %v3785_v0 }
 0x107   :  { %2974 = vmatpush3.msra.mxu1 %v4026_v28 }
 0x108   :  { %3013 = vmatprep.subr.mxu1 %v3785_v0 }
 0x1a8   :  { %v209_v62 = vpop.f32.mrf.mxu1 }
 0x1a9   :  { %v210_v63 = vadd.f32 %v209_v62, %v4227_v61 }
 0x1aa   :  { %v2907_v29 = vpop.f32.mrf.mxu1 }
 0x1ab   :  { %v213_v46 = vmul.f32 0.01, %v210_v63 }
 0x1ad   :  { %v214_v48 = vmax.f32 %v210_v63, %v213_v46 }
 0x1af   :  { %2941 = vmatmul.mubr.f32.vlgmr.msra.gmra.mxu0 %v214_v48  ;;  %v4309_v48 = vld [vmem:[%s5788_s5 + $0x78] sm:$0xff] }
 0x1b0   :  { %2979 = vmatpush3.msra.mxu0 %v3866_v5  ;;  %3010 = vmatprep.mubr.msk.f32.mxu0 %vm3786_vm0, %v3785_v0 }
 0x1b1   :  { %2980 = vmatprep.subr.mxu0 %v3785_v0 }
 0x1b2   :  { %2981 = vmatpush3.msra.mxu0 %v3878_v7 }
 0x1b3   :  { %2982 = vmatprep.subr.mxu0 %v3785_v0 }
 0x1b4   :  { %2983 = vmatpush3.msra.mxu0 %v3885_v8 }
 0x1b5   :  { %2984 = vmatprep.subr.mxu0 %v3785_v0 }
 0x1b6   :  { %2985 = vmatpush3.msra.mxu0 %v3899_v10 }
 0x1b7   :  { %2986 = vmatprep.subr.mxu0 %v3785_v0 }
 0x1b8   :  { %2987 = vmatpush3.msra.mxu0 %v3913_v12 }
 0x1b9   :  { %2988 = vmatprep.subr.mxu0 %v3785_v0 }
 0x1ba   :  { %2989 = vmatpush3.msra.mxu0 %v3927_v14 }
 0x1bb   :  { %2990 = vmatprep.subr.mxu0 %v3785_v0 }
 0x1bc   :  { %2991 = vmatpush3.msra.mxu0 %v3941_v16 }
 0x1bd   :  { %2992 = vmatprep.subr.mxu0 %v3785_v0 }
 0x1be   :  { %2993 = vmatpush3.msra.mxu0 %v3955_v18 }
 0x1bf   :  { %2994 = vmatprep.subr.mxu0 %v3785_v0 }
 0x1c0   :  { %2995 = vmatpush3.msra.mxu0 %v3969_v20 }
 0x1c1   :  { %2996 = vmatprep.subr.mxu0 %v3785_v0 }
 0x1c2   :  { %2997 = vmatpush3.msra.mxu0 %v3983_v22 }
 0x1c3   :  { %2998 = vmatprep.subr.mxu0 %v3785_v0 }
 0x1c4   :  { %2999 = vmatpush3.msra.mxu0 %v3997_v24 }
 0x1c5   :  { %3000 = vmatprep.subr.mxu0 %v3785_v0 }
 0x1c6   :  { %3001 = vmatpush3.msra.mxu0 %v4011_v26 }
 0x1c7   :  { %3002 = vmatprep.subr.mxu0 %v3785_v0 }
 0x1c8   :  { %3003 = vmatpush3.msra.mxu0 %v4042_v30 }
 0x1c9   :  { %3004 = vmatprep.subr.mxu0 %v3785_v0 }
 0x1ca   :  { %3005 = vmatpush3.msra.mxu0 %v4049_v31 }
 0x1cb   :  { %3006 = vmatprep.subr.mxu0 %v3785_v0 }
 0x1cc   :  { %3007 = vmatpush3.msra.mxu0 %v4056_v32 }
 0x1cd   :  { %3008 = vmatprep.subr.mxu0 %v3785_v0 }
 0x1ce   :  { %3009 = vmatpush3.msra.mxu0 %v4063_v33 }
 0x1cf   :  { %3048 = vmatprep.subr.mxu0 %v3785_v0 }
 0x26f   :  { %v301_v53 = vpop.f32.mrf.mxu0 }
 0x270   :  { %v302_v54 = vadd.f32 %v301_v53, %v4266_v52  ;;  %v4321_v53 = vld [vmem:[%s5788_s5 + $0x68] sm:$0xff] }
 0x271   :  { %v2942_v55 = vpop.f32.mrf.mxu0 }
 0x272   :  { %2976 = vmatmul.mubr.f32.vlgmr.msra.gmra.mxu1 %v302_v54  ;;  %v4328_v54 = vld [vmem:[%s5788_s5 + $0x60] sm:$0xff]  ;;  %v4335_v55 = vld [vmem:[%s5788_s5 + $0x58] sm:$0xff] }
 0x273   :  { %3014 = vmatpush3.msra.mxu1 %v4070_v34  ;;  %3045 = vmatprep.mubr.msk.f32.mxu1 %vm3786_vm0, %v3785_v0  ;;  %5877 = vst [vmem:[#allocation4_spill] sm:$0xff] %v4328_v54  ;;  %5878 = vst [vmem:[#allocation5_spill] sm:$0xff] %v4335_v55 }
 0x274   :  { %3015 = vmatprep.subr.mxu1 %v3785_v0 }
 0x275   :  { %3016 = vmatpush3.msra.mxu1 %v4075_v35 }
 0x276   :  { %3017 = vmatprep.subr.mxu1 %v3785_v0 }
 0x277   :  { %3018 = vmatpush3.msra.mxu1 %v4082_v36 }
 0x278   :  { %3019 = vmatprep.subr.mxu1 %v3785_v0 }
 0x279   :  { %3020 = vmatpush3.msra.mxu1 %v4089_v37 }
 0x27a   :  { %3021 = vmatprep.subr.mxu1 %v3785_v0 }
 0x27b   :  { %3022 = vmatpush3.msra.mxu1 %v4096_v38 }
 0x27c   :  { %3023 = vmatprep.subr.mxu1 %v3785_v0 }
 0x27d   :  { %3024 = vmatpush3.msra.mxu1 %v4103_v39 }
 0x27e   :  { %3025 = vmatprep.subr.mxu1 %v3785_v0 }
 0x27f   :  { %3026 = vmatpush3.msra.mxu1 %v4110_v40 }
 0x280   :  { %3027 = vmatprep.subr.mxu1 %v3785_v0 }
 0x281   :  { %3028 = vmatpush3.msra.mxu1 %v4117_v41 }
 0x282   :  { %3029 = vmatprep.subr.mxu1 %v3785_v0 }
 0x283   :  { %3030 = vmatpush3.msra.mxu1 %v4124_v42 }
 0x284   :  { %3031 = vmatprep.subr.mxu1 %v3785_v0 }
 0x285   :  { %3032 = vmatpush3.msra.mxu1 %v4131_v43 }
 0x286   :  { %3033 = vmatprep.subr.mxu1 %v3785_v0 }
 0x287   :  { %3034 = vmatpush3.msra.mxu1 %v4138_v44 }
 0x288   :  { %3035 = vmatprep.subr.mxu1 %v3785_v0 }
 0x289   :  { %3036 = vmatpush3.msra.mxu1 %v4145_v45 }
 0x28a   :  { %3037 = vmatprep.subr.mxu1 %v3785_v0 }
 0x28b   :  { %3038 = vmatpush3.msra.mxu1 %v4200_v56 }
 0x28c   :  { %3039 = vmatprep.subr.mxu1 %v3785_v0 }
 0x28d   :  { %3040 = vmatpush3.msra.mxu1 %v4207_v57 }
 0x28e   :  { %3041 = vmatprep.subr.mxu1 %v3785_v0 }
 0x28f   :  { %3042 = vmatpush3.msra.mxu1 %v4214_v58 }
 0x290   :  { %3043 = vmatprep.subr.mxu1 %v3785_v0 }
 0x291   :  { %3044 = vmatpush3.msra.mxu1 %v4221_v59 }
 0x292   :  { %3083 = vmatprep.subr.mxu1 %v3785_v0 }
 0x332   :  { %v371_v60 = vpop.f32.mrf.mxu1 }
 0x333   :  { %v372_v62 = vadd.f32 %v371_v60, %v4160_v50  ;;  %v4342_v60 = vld [vmem:[%s5788_s5 + $0x50] sm:$0xff] }
 0x334   :  { %v2977_v63 = vpop.f32.mrf.mxu1  ;;  %5879 = vst [vmem:[#allocation6_spill] sm:$0xff] %v4342_v60 }
 0x335   :  { %v375_v29 = vmul.f32 0.01, %v372_v62  ;;  %v4356_v63 = vld [vmem:[%s5788_s5 + $0x40] sm:$0xff] }
 0x336   :  { %5881 = vst [vmem:[#allocation8_spill] sm:$0xff] %v4356_v63 }
 0x337   :  { %v376_v46 = vmax.f32 %v372_v62, %v375_v29  ;;  %v4349_v62 = vld [vmem:[%s5788_s5 + $0x48] sm:$0xff]  ;;  %v4363_v29 = vld [vmem:[%s5788_s5 + $0x38] sm:$0xff] }
 0x338   :  { %5880 = vst [vmem:[#allocation7_spill] sm:$0xff] %v4349_v62  ;;  %5882 = vst [vmem:[#allocation9_spill] sm:$0xff] %v4363_v29 }
 0x339   :  { %3011 = vmatmul.mubr.f32.vlgmr.msra.gmra.mxu0 %v376_v46  ;;  %v4370_v46 = vld [vmem:[%s5788_s5 + $0x30] sm:$0xff] }
 0x33a   :  { %3080 = vmatprep.mubr.msk.f32.mxu0 %vm3786_vm0, %v3785_v0  ;;  %3049 = vmatpush3.msra.mxu0 %v4309_v48  ;;  %5883 = vst [vmem:[#allocation10_spill] sm:$0xff] %v4370_v46 }
 0x33b   :  { %3050 = vmatprep.subr.mxu0 %v3785_v0 }
 0x33c   :  { %3051 = vmatpush3.msra.mxu0 %v4314_v51 }
 0x33d   :  { %3052 = vmatprep.subr.mxu0 %v3785_v0 }
 0x33e   :  { %3053 = vmatpush3.msra.mxu0 %v4321_v53 }
 0x33f   :  { %3054 = vmatprep.subr.mxu0 %v3785_v0 }
 0x340   :  { %3055 = vmatpush3.msra.mxu0 %v4328_v54 }
 0x341   :  { %3056 = vmatprep.subr.mxu0 %v3785_v0 }
 0x342   :  { %3057 = vmatpush3.msra.mxu0 %v4335_v55 }
 0x343   :  { %3058 = vmatprep.subr.mxu0 %v3785_v0 }
 0x344   :  { %3059 = vmatpush3.msra.mxu0 %v4342_v60 }
 0x345   :  { %3060 = vmatprep.subr.mxu0 %v3785_v0 }
 0x346   :  { %3061 = vmatpush3.msra.mxu0 %v4349_v62  ;;  %v4377_v62 = vld [vmem:[%s5788_s5 + $0x28] sm:$0xff] }
 0x347   :  { %3062 = vmatprep.subr.mxu0 %v3785_v0  ;;  %5884 = vst [vmem:[#allocation11_spill] sm:$0xff] %v4377_v62 }
 0x348   :  { %3063 = vmatpush3.msra.mxu0 %v4356_v63  ;;  %v4384_v63 = vld [vmem:[%s5788_s5 + $0x20] sm:$0xff] }
 0x349   :  { %3064 = vmatprep.subr.mxu0 %v3785_v0  ;;  %5885 = vst [vmem:[#allocation12_spill] sm:$0xff] %v4384_v63 }
 0x34a   :  { %3065 = vmatpush3.msra.mxu0 %v4363_v29  ;;  %v4391_v29 = vld [vmem:[%s5788_s5 + $0x18] sm:$0xff] }
 0x34b   :  { %3066 = vmatprep.subr.mxu0 %v3785_v0  ;;  %5886 = vst [vmem:[#allocation13_spill] sm:$0xff] %v4391_v29 }
 0x34c   :  { %3067 = vmatpush3.msra.mxu0 %v4370_v46  ;;  %v4398_v46 = vld [vmem:[%s5788_s5 + $0x10] sm:$0xff] }
 0x34d   :  { %3068 = vmatprep.subr.mxu0 %v3785_v0  ;;  %5887 = vst [vmem:[#allocation14_spill] sm:$0xff] %v4398_v46 }
 0x34e   :  { %3069 = vmatpush3.msra.mxu0 %v4377_v62 }
 0x34f   :  { %3070 = vmatprep.subr.mxu0 %v3785_v0 }
 0x350   :  { %3071 = vmatpush3.msra.mxu0 %v4384_v63 }
 0x351   :  { %3072 = vmatprep.subr.mxu0 %v3785_v0 }
 0x352   :  { %3073 = vmatpush3.msra.mxu0 %v4391_v29  ;;  %v4410_v29 = vld [vmem:[%s5788_s5 + $0x8] sm:$0xff] }
 0x353   :  { %3074 = vmatprep.subr.mxu0 %v3785_v0  ;;  %5888 = vst [vmem:[#allocation15_spill] sm:$0xff] %v4410_v29 }
 0x354   :  { %3075 = vmatpush3.msra.mxu0 %v4398_v46 }
 0x355   :  { %3076 = vmatprep.subr.mxu0 %v3785_v0 }
 0x356   :  { %3077 = vmatpush3.msra.mxu0 %v4410_v29 }
 0x357   :  { %3078 = vmatprep.subr.mxu0 %v3785_v0 }
 0x3f9   :  { %v443_v62 = vpop.f32.mrf.mxu0 }
 0x3fa   :  { %v444_v60 = vadd.f32 %v443_v62, %v4227_v61  ;;  %v4417_v62 = vld [vmem:[%s5788_s5] sm:$0xff] }
 0x3fb   :  { %v3012_v55 = vpop.f32.mrf.mxu0  ;;  %5889 = vst [vmem:[#allocation16_spill] sm:$0xff] %v4417_v62  ;;  %3079 = vmatpush3.msra.mxu0 %v4417_v62 }
 0x3fc   :  { %v447_v63 = vmul.f32 0.01, %v444_v60  ;;  %3118 = vmatprep.subr.mxu0 %v3785_v0  ;;  %v4429_v55 = vld [vmem:[%s5789_s6 + $0x70] sm:$0xff] }
 0x3fd   :  { %5891 = vst [vmem:[#allocation18_spill] sm:$0xff] %v4429_v55 }
 0x3fe   :  { %v448_v54 = vmax.f32 %v444_v60, %v447_v63  ;;  %v4436_v60 = vld [vmem:[%s5789_s6 + $0x68] sm:$0xff]  ;;  %v4443_v63 = vld [vmem:[%s5789_s6 + $0x60] sm:$0xff] }
 0x3ff   :  { %5892 = vst [vmem:[#allocation19_spill] sm:$0xff] %v4436_v60  ;;  %5893 = vst [vmem:[#allocation20_spill] sm:$0xff] %v4443_v63 }
 0x400   :  { %3046 = vmatmul.mubr.f32.vlgmr.msra.gmra.mxu1 %v448_v54  ;;  %v4424_v54 = vld [vmem:[%s5789_s6 + $0x78] sm:$0xff] }
 0x401   :  { %3115 = vmatprep.mubr.msk.f32.mxu1 %vm3786_vm0, %v3785_v0  ;;  %5890 = vst [vmem:[#allocation17_spill] sm:$0xff] %v4424_v54  ;;  %3084 = vmatpush3.msra.mxu1 %v4424_v54  ;;  %v4450_v54 = vld [vmem:[%s5789_s6 + $0x58] sm:$0xff] }
 0x402   :  { %3085 = vmatprep.subr.mxu1 %v3785_v0  ;;  %5894 = vst [vmem:[#allocation21_spill] sm:$0xff] %v4450_v54 }
 0x403   :  { %3086 = vmatpush3.msra.mxu1 %v4429_v55  ;;  %v4457_v55 = vld [vmem:[%s5789_s6 + $0x50] sm:$0xff] }
 0x404   :  { %3087 = vmatprep.subr.mxu1 %v3785_v0  ;;  %5895 = vst [vmem:[#allocation22_spill] sm:$0xff] %v4457_v55 }
 0x405   :  { %3088 = vmatpush3.msra.mxu1 %v4436_v60  ;;  %v4464_v60 = vld [vmem:[%s5789_s6 + $0x48] sm:$0xff] }
 0x406   :  { %3089 = vmatprep.subr.mxu1 %v3785_v0  ;;  %5896 = vst [vmem:[#allocation23_spill] sm:$0xff] %v4464_v60 }
 0x407   :  { %3090 = vmatpush3.msra.mxu1 %v4443_v63  ;;  %v4471_v63 = vld [vmem:[%s5789_s6 + $0x40] sm:$0xff] }
 0x408   :  { %3091 = vmatprep.subr.mxu1 %v3785_v0  ;;  %5897 = vst [vmem:[#allocation24_spill] sm:$0xff] %v4471_v63 }
 0x409   :  { %3092 = vmatpush3.msra.mxu1 %v4450_v54  ;;  %v4478_v54 = vld [vmem:[%s5789_s6 + $0x38] sm:$0xff] }
 0x40a   :  { %3093 = vmatprep.subr.mxu1 %v3785_v0  ;;  %5898 = vst [vmem:[#allocation25_spill] sm:$0xff] %v4478_v54 }
 0x40b   :  { %3094 = vmatpush3.msra.mxu1 %v4457_v55  ;;  %v4485_v55 = vld [vmem:[%s5789_s6 + $0x30] sm:$0xff] }
 0x40c   :  { %3095 = vmatprep.subr.mxu1 %v3785_v0  ;;  %5899 = vst [vmem:[#allocation26_spill] sm:$0xff] %v4485_v55 }
 0x40d   :  { %3096 = vmatpush3.msra.mxu1 %v4464_v60  ;;  %v4492_v60 = vld [vmem:[%s5789_s6 + $0x28] sm:$0xff] }
 0x40e   :  { %3097 = vmatprep.subr.mxu1 %v3785_v0  ;;  %5900 = vst [vmem:[#allocation27_spill] sm:$0xff] %v4492_v60 }
 0x40f   :  { %3098 = vmatpush3.msra.mxu1 %v4471_v63  ;;  %v4499_v63 = vld [vmem:[%s5789_s6 + $0x20] sm:$0xff] }
 0x410   :  { %3099 = vmatprep.subr.mxu1 %v3785_v0  ;;  %5901 = vst [vmem:[#allocation28_spill] sm:$0xff] %v4499_v63 }
 0x411   :  { %3100 = vmatpush3.msra.mxu1 %v4478_v54 }
 0x412   :  { %3101 = vmatprep.subr.mxu1 %v3785_v0 }
 0x413   :  { %3102 = vmatpush3.msra.mxu1 %v4485_v55  ;;  %v4511_v55 = vld [vmem:[%s5789_s6 + $0x18] sm:$0xff] }
 0x414   :  { %3103 = vmatprep.subr.mxu1 %v3785_v0  ;;  %5902 = vst [vmem:[#allocation29_spill] sm:$0xff] %v4511_v55 }
 0x415   :  { %3104 = vmatpush3.msra.mxu1 %v4492_v60 }
 0x416   :  { %3105 = vmatprep.subr.mxu1 %v3785_v0 }
 0x417   :  { %3106 = vmatpush3.msra.mxu1 %v4499_v63  ;;  %v4518_v63 = vld [vmem:[%s5789_s6 + $0x10] sm:$0xff] }
 0x418   :  { %3107 = vmatprep.subr.mxu1 %v3785_v0  ;;  %5903 = vst [vmem:[#allocation30_spill] sm:$0xff] %v4518_v63 }
 0x419   :  { %3108 = vmatpush3.msra.mxu1 %v4511_v55 }
 0x41a   :  { %3109 = vmatprep.subr.mxu1 %v3785_v0 }
 0x41b   :  { %3110 = vmatpush3.msra.mxu1 %v4518_v63 }
 0x41c   :  { %3111 = vmatprep.subr.mxu1 %v3785_v0 }
 0x4c0   :  { %v515_v54 = vpop.f32.mrf.mxu1 }
 0x4c1   :  { %v516_v61 = vadd.f32 %v515_v54, %v4266_v52  ;;  %v4539_v54 = vld [vmem:[%s5790_s7 + $0x78] sm:$0xff]  ;;  %v4544_v52 = vld [vmem:[%s5790_s7 + $0x70] sm:$0xff] }
 0x4c2   :  { %v3047_v62 = vpop.f32.mrf.mxu1  ;;  %5906 = vst [vmem:[#allocation33_spill] sm:$0xff] %v4539_v54  ;;  %5907 = vst [vmem:[#allocation34_spill] sm:$0xff] %v4544_v52 }
 0x4c3   :  { %3081 = vmatmul.mubr.f32.vlgmr.msra.gmra.mxu0 %v516_v61  ;;  %v4525_v61 = vld [vmem:[%s5789_s6 + $0x8] sm:$0xff]  ;;  %v4532_v62 = vld [vmem:[%s5789_s6] sm:$0xff] }
 0x4c4   :  { %3150 = vmatprep.mubr.msk.f32.mxu0 %vm3786_vm0, %v3785_v0  ;;  %5904 = vst [vmem:[#allocation31_spill] sm:$0xff] %v4525_v61  ;;  %3112 = vmatpush3.msra.mxu1 %v4525_v61  ;;  %5905 = vst [vmem:[#allocation32_spill] sm:$0xff] %v4532_v62  ;;  %v4558_v61 = vld [vmem:[%s5790_s7 + $0x60] sm:$0xff] }
 0x4c5   :  { %3113 = vmatprep.subr.mxu1 %v3785_v0  ;;  %3119 = vmatpush3.msra.mxu0 %v4539_v54  ;;  %5909 = vst [vmem:[#allocation36_spill] sm:$0xff] %v4558_v61  ;;  %v4565_v54 = vld [vmem:[%s5790_s7 + $0x58] sm:$0xff] }
 0x4c6   :  { %3114 = vmatpush3.msra.mxu1 %v4532_v62  ;;  %3120 = vmatprep.subr.mxu0 %v3785_v0  ;;  %v4551_v62 = vld [vmem:[%s5790_s7 + $0x68] sm:$0xff]  ;;  %5910 = vst [vmem:[#allocation37_spill] sm:$0xff] %v4565_v54 }
 0x4c7   :  { %3153 = vmatprep.subr.mxu1 %v3785_v0  ;;  %5908 = vst [vmem:[#allocation35_spill] sm:$0xff] %v4551_v62  ;;  %3121 = vmatpush3.msra.mxu0 %v4544_v52  ;;  %v4572_v52 = vld [vmem:[%s5790_s7 + $0x50] sm:$0xff] }
 0x4c8   :  { %3122 = vmatprep.subr.mxu0 %v3785_v0  ;;  %5911 = vst [vmem:[#allocation38_spill] sm:$0xff] %v4572_v52 }
 0x4c9   :  { %3123 = vmatpush3.msra.mxu0 %v4551_v62  ;;  %v4579_v62 = vld [vmem:[%s5790_s7 + $0x48] sm:$0xff] }
 0x4ca   :  { %3124 = vmatprep.subr.mxu0 %v3785_v0  ;;  %5912 = vst [vmem:[#allocation39_spill] sm:$0xff] %v4579_v62 }
 0x4cb   :  { %3125 = vmatpush3.msra.mxu0 %v4558_v61  ;;  %v4586_v61 = vld [vmem:[%s5790_s7 + $0x40] sm:$0xff] }
 0x4cc   :  { %3126 = vmatprep.subr.mxu0 %v3785_v0  ;;  %5913 = vst [vmem:[#allocation40_spill] sm:$0xff] %v4586_v61 }
 0x4cd   :  { %3127 = vmatpush3.msra.mxu0 %v4565_v54  ;;  %v4593_v54 = vld [vmem:[%s5790_s7 + $0x38] sm:$0xff] }
 0x4ce   :  { %3128 = vmatprep.subr.mxu0 %v3785_v0  ;;  %5914 = vst [vmem:[#allocation41_spill] sm:$0xff] %v4593_v54 }
 0x4cf   :  { %3129 = vmatpush3.msra.mxu0 %v4572_v52  ;;  %v4600_v52 = vld [vmem:[%s5790_s7 + $0x30] sm:$0xff] }
 0x4d0   :  { %3130 = vmatprep.subr.mxu0 %v3785_v0  ;;  %5915 = vst [vmem:[#allocation42_spill] sm:$0xff] %v4600_v52 }
 0x4d1   :  { %3131 = vmatpush3.msra.mxu0 %v4579_v62  ;;  %v4607_v62 = vld [vmem:[%s5790_s7 + $0x28] sm:$0xff] }
 0x4d2   :  { %3132 = vmatprep.subr.mxu0 %v3785_v0 }
 0x4d3   :  { %3133 = vmatpush3.msra.mxu0 %v4586_v61  ;;  %v4614_v61 = vld [vmem:[%s5790_s7 + $0x20] sm:$0xff] }
 0x4d4   :  { %3134 = vmatprep.subr.mxu0 %v3785_v0 }
 0x4d5   :  { %3135 = vmatpush3.msra.mxu0 %v4593_v54  ;;  %v537_v54 = vsub.s32 3, %v4151_v47 }
 0x4d6   :  { %3136 = vmatprep.subr.mxu0 %v3785_v0 }
 0x4d7   :  { %3137 = vmatpush3.msra.mxu0 %v4600_v52  ;;  %v4622_v63 = vrot.slane %v4157_v49, %v537_v54 }
 0x4d8   :  { %3138 = vmatprep.subr.mxu0 %v3785_v0 }
 0x4d9   :  { %3139 = vmatpush3.msra.mxu0 %v4607_v62 }
 0x4da   :  { %3140 = vmatprep.subr.mxu0 %v3785_v0 }
 0x4db   :  { %3141 = vmatpush3.msra.mxu0 %v4614_v61 }
 0x4dc   :  { %3142 = vmatprep.subr.mxu0 %v3785_v0 }
 0x583   :  { %v605_v52 = vpop.f32.mrf.mxu0 }
 0x584   :  { %v606_v55 = vadd.f32 %v605_v52, %v4622_v63  ;;  %v5940_v52 = vld [vmem:[#allocation27_spill] sm:$0xff] }
 0x585   :  { %v3082_v60 = vpop.f32.mrf.mxu0 }
 0x586   :  { %v609_v29 = vmul.f32 0.01, %v606_v55  ;;  %v5946_v60 = vld [vmem:[#allocation3_spill] sm:$0xff] }
 0x588   :  { %v610_v46 = vmax.f32 %v606_v55, %v609_v29  ;;  %v5944_v29 = vld [vmem:[#allocation31_spill] sm:$0xff] }
 0x58a   :  { %3116 = vmatmul.mubr.f32.vlgmr.msra.gmra.mxu1 %v610_v46  ;;  %v5945_v46 = vld [vmem:[#allocation32_spill] sm:$0xff] }
 0x58b   :  { %3154 = vmatpush3.msra.mxu1 %v3836_v1  ;;  %3185 = vmatprep.mubr.msk.f32.mxu1 %vm3786_vm0, %v3785_v0  ;;  %v4662_v1 = vld [vmem:[%s5790_s7 + $0x18] sm:$0xff] }
 0x58c   :  { %3155 = vmatprep.subr.mxu1 %v3785_v0  ;;  %3143 = vmatpush3.msra.mxu0 %v4662_v1 }
 0x58d   :  { %3156 = vmatpush3.msra.mxu1 %v3841_v2  ;;  %3144 = vmatprep.subr.mxu0 %v3785_v0  ;;  %v4669_v2 = vld [vmem:[%s5790_s7 + $0x10] sm:$0xff] }
 0x58e   :  { %3157 = vmatprep.subr.mxu1 %v3785_v0  ;;  %3145 = vmatpush3.msra.mxu0 %v4669_v2 }
 0x58f   :  { %3158 = vmatpush3.msra.mxu1 %v3851_v3  ;;  %3146 = vmatprep.subr.mxu0 %v3785_v0  ;;  %v4676_v3 = vld [vmem:[%s5790_s7 + $0x8] sm:$0xff] }
 0x590   :  { %3159 = vmatprep.subr.mxu1 %v3785_v0  ;;  %3147 = vmatpush3.msra.mxu0 %v4676_v3 }
 0x591   :  { %3160 = vmatpush3.msra.mxu1 %v3860_v4  ;;  %3148 = vmatprep.subr.mxu0 %v3785_v0  ;;  %v4683_v4 = vld [vmem:[%s5790_s7] sm:$0xff] }
 0x592   :  { %3161 = vmatprep.subr.mxu1 %v3785_v0  ;;  %3149 = vmatpush3.msra.mxu0 %v4683_v4 }
 0x593   :  { %3162 = vmatpush3.msra.mxu1 %v3872_v6  ;;  %3188 = vmatprep.subr.mxu0 %v3785_v0  ;;  %v629_v6 = vsub.s32 4, %v4151_v47 }
 0x594   :  { %3163 = vmatprep.subr.mxu1 %v3785_v0 }
 0x595   :  { %3164 = vmatpush3.msra.mxu1 %v3891_v9  ;;  %v4689_v9 = vrot.slane %v4157_v49, %v629_v6 }
 0x596   :  { %3165 = vmatprep.subr.mxu1 %v3785_v0 }
 0x597   :  { %3166 = vmatpush3.msra.mxu1 %v3905_v11 }
 0x598   :  { %3167 = vmatprep.subr.mxu1 %v3785_v0 }
 0x599   :  { %3168 = vmatpush3.msra.mxu1 %v3919_v13 }
 0x59a   :  { %3169 = vmatprep.subr.mxu1 %v3785_v0 }
 0x59b   :  { %3170 = vmatpush3.msra.mxu1 %v3933_v15 }
 0x59c   :  { %3171 = vmatprep.subr.mxu1 %v3785_v0 }
 0x59d   :  { %3172 = vmatpush3.msra.mxu1 %v3947_v17 }
 0x59e   :  { %3173 = vmatprep.subr.mxu1 %v3785_v0 }
 0x59f   :  { %3174 = vmatpush3.msra.mxu1 %v3961_v19 }
 0x5a0   :  { %3175 = vmatprep.subr.mxu1 %v3785_v0 }
 0x5a1   :  { %3176 = vmatpush3.msra.mxu1 %v3975_v21 }
 0x5a2   :  { %3177 = vmatprep.subr.mxu1 %v3785_v0 }
 0x5a3   :  { %3178 = vmatpush3.msra.mxu1 %v3989_v23  ;;  %v5917_v23 = vld [vmem:[#allocation5_spill] sm:$0xff] }
 0x5a4   :  { %3179 = vmatprep.subr.mxu1 %v3785_v0 }
 0x5a5   :  { %3180 = vmatpush3.msra.mxu1 %v4003_v25  ;;  %v5919_v25 = vld [vmem:[#allocation7_spill] sm:$0xff] }
 0x5a6   :  { %3181 = vmatprep.subr.mxu1 %v3785_v0 }
 0x5a7   :  { %3182 = vmatpush3.msra.mxu1 %v4017_v27  ;;  %v5921_v27 = vld [vmem:[#allocation9_spill] sm:$0xff] }
 0x5a8   :  { %3183 = vmatprep.subr.mxu1 %v3785_v0 }
 0x5a9   :  { %3184 = vmatpush3.msra.mxu1 %v4026_v28  ;;  %v5922_v28 = vld [vmem:[#allocation10_spill] sm:$0xff] }
 0x5aa   :  { %3223 = vmatprep.subr.mxu1 %v3785_v0 }
 0x64a   :  { %v697_v11 = vpop.f32.mrf.mxu1 }
 0x64b   :  { %v698_v13 = vadd.f32 %v697_v11, %v4689_v9  ;;  %v5947_v11 = vld [vmem:[#allocation33_spill] sm:$0xff] }
 0x64c   :  { %v3117_v15 = vpop.f32.mrf.mxu1 }
 0x64d   :  { %v701_v17 = vmul.f32 0.01, %v698_v13  ;;  %v5949_v15 = vld [vmem:[#allocation35_spill] sm:$0xff] }
 0x64f   :  { %v702_v19 = vmax.f32 %v698_v13, %v701_v17  ;;  %v5948_v13 = vld [vmem:[#allocation34_spill] sm:$0xff]  ;;  %v5950_v17 = vld [vmem:[#allocation36_spill] sm:$0xff] }
 0x651   :  { %3151 = vmatmul.mubr.f32.vlgmr.msra.gmra.mxu0 %v702_v19  ;;  %v5951_v19 = vld [vmem:[#allocation37_spill] sm:$0xff] }
 0x652   :  { %3189 = vmatpush3.msra.mxu0 %v3866_v5  ;;  %3220 = vmatprep.mubr.msk.f32.mxu0 %vm3786_vm0, %v3785_v0  ;;  %v721_v5 = vsub.s32 5, %v4151_v47  ;;  %v5934_v47 = vld [vmem:[#allocation21_spill] sm:$0xff] }
 0x653   :  { %3190 = vmatprep.subr.mxu0 %v3785_v0 }
 0x654   :  { %3191 = vmatpush3.msra.mxu0 %v3878_v7  ;;  %v4728_v7 = vrot.slane %v4157_v49, %v721_v5  ;;  %v5935_v49 = vld [vmem:[#allocation22_spill] sm:$0xff] }
 0x655   :  { %3192 = vmatprep.subr.mxu0 %v3785_v0  ;;  %v5952_v5 = vld [vmem:[#allocation38_spill] sm:$0xff] }
 0x656   :  { %3193 = vmatpush3.msra.mxu0 %v3885_v8 }
 0x657   :  { %3194 = vmatprep.subr.mxu0 %v3785_v0 }
 0x658   :  { %3195 = vmatpush3.msra.mxu0 %v3899_v10 }
 0x659   :  { %3196 = vmatprep.subr.mxu0 %v3785_v0 }
 0x65a   :  { %3197 = vmatpush3.msra.mxu0 %v3913_v12 }
 0x65b   :  { %3198 = vmatprep.subr.mxu0 %v3785_v0 }
 0x65c   :  { %3199 = vmatpush3.msra.mxu0 %v3927_v14 }
 0x65d   :  { %3200 = vmatprep.subr.mxu0 %v3785_v0 }
 0x65e   :  { %3201 = vmatpush3.msra.mxu0 %v3941_v16 }
 0x65f   :  { %3202 = vmatprep.subr.mxu0 %v3785_v0 }
 0x660   :  { %3203 = vmatpush3.msra.mxu0 %v3955_v18 }
 0x661   :  { %3204 = vmatprep.subr.mxu0 %v3785_v0 }
 0x662   :  { %3205 = vmatpush3.msra.mxu0 %v3969_v20 }
 0x663   :  { %3206 = vmatprep.subr.mxu0 %v3785_v0 }
 0x664   :  { %3207 = vmatpush3.msra.mxu0 %v3983_v22  ;;  %v5916_v22 = vld [vmem:[#allocation4_spill] sm:$0xff] }
 0x665   :  { %3208 = vmatprep.subr.mxu0 %v3785_v0 }
 0x666   :  { %3209 = vmatpush3.msra.mxu0 %v3997_v24  ;;  %v5918_v24 = vld [vmem:[#allocation6_spill] sm:$0xff] }
 0x667   :  { %3210 = vmatprep.subr.mxu0 %v3785_v0 }
 0x668   :  { %3211 = vmatpush3.msra.mxu0 %v4011_v26  ;;  %v5920_v26 = vld [vmem:[#allocation8_spill] sm:$0xff] }
 0x669   :  { %3212 = vmatprep.subr.mxu0 %v3785_v0 }
 0x66a   :  { %3213 = vmatpush3.msra.mxu0 %v4042_v30  ;;  %v5923_v30 = vld [vmem:[#allocation11_spill] sm:$0xff] }
 0x66b   :  { %3214 = vmatprep.subr.mxu0 %v3785_v0 }
 0x66c   :  { %3215 = vmatpush3.msra.mxu0 %v4049_v31  ;;  %v5924_v31 = vld [vmem:[#allocation12_spill] sm:$0xff] }
 0x66d   :  { %3216 = vmatprep.subr.mxu0 %v3785_v0 }
 0x66e   :  { %3217 = vmatpush3.msra.mxu0 %v4056_v32  ;;  %v5925_v32 = vld [vmem:[#allocation13_spill] sm:$0xff] }
 0x66f   :  { %3218 = vmatprep.subr.mxu0 %v3785_v0 }
 0x670   :  { %3219 = vmatpush3.msra.mxu0 %v4063_v33  ;;  %v5926_v33 = vld [vmem:[#allocation14_spill] sm:$0xff] }
 0x671   :  { %3258 = vmatprep.subr.mxu0 %v3785_v0 }
 0x711   :  { %v789_v8 = vpop.f32.mrf.mxu0 }
 0x712   :  { %v790_v10 = vadd.f32 %v789_v8, %v4728_v7  ;;  %v5953_v8 = vld [vmem:[#allocation39_spill] sm:$0xff] }
 0x713   :  { %v3152_v12 = vpop.f32.mrf.mxu0 }
 0x714   :  { %793 = vst [vmem:[%s5791_s8] sm:$0xff] %v790_v10  ;;  %3186 = vmatmul.mubr.f32.vlgmr.msra.gmra.mxu1 %v790_v10  ;;  %v5954_v10 = vld [vmem:[#allocation40_spill] sm:$0xff]  ;;  %v5955_v12 = vld [vmem:[#allocation41_spill] sm:$0xff] }
 0x715   :  { %3224 = vmatpush3.msra.mxu1 %v4070_v34  ;;  %3255 = vmatprep.mubr.msk.f32.mxu1 %vm3786_vm0, %v3785_v0  ;;  %v5927_v34 = vld [vmem:[#allocation15_spill] sm:$0xff] }
 0x716   :  { %3225 = vmatprep.subr.mxu1 %v3785_v0 }
 0x717   :  { %3226 = vmatpush3.msra.mxu1 %v4075_v35  ;;  %v5928_v35 = vld [vmem:[#allocation16_spill] sm:$0xff] }
 0x718   :  { %3227 = vmatprep.subr.mxu1 %v3785_v0 }
 0x719   :  { %3228 = vmatpush3.msra.mxu1 %v4082_v36 }
 0x71a   :  { %3229 = vmatprep.subr.mxu1 %v3785_v0 }
 0x71b   :  { %3230 = vmatpush3.msra.mxu1 %v4089_v37  ;;  %v5929_v37 = vld [vmem:[#allocation2_spill] sm:$0xff] }
 0x71c   :  { %3231 = vmatprep.subr.mxu1 %v3785_v0 }
 0x71d   :  { %3232 = vmatpush3.msra.mxu1 %v4096_v38 }
 0x71e   :  { %3233 = vmatprep.subr.mxu1 %v3785_v0 }
 0x71f   :  { %3234 = vmatpush3.msra.mxu1 %v4103_v39 }
 0x720   :  { %3235 = vmatprep.subr.mxu1 %v3785_v0 }
 0x721   :  { %3236 = vmatpush3.msra.mxu1 %v4110_v40 }
 0x722   :  { %3237 = vmatprep.subr.mxu1 %v3785_v0 }
 0x723   :  { %3238 = vmatpush3.msra.mxu1 %v4117_v41 }
 0x724   :  { %3239 = vmatprep.subr.mxu1 %v3785_v0 }
 0x725   :  { %3240 = vmatpush3.msra.mxu1 %v4124_v42  ;;  %v5930_v42 = vld [vmem:[#allocation17_spill] sm:$0xff] }
 0x726   :  { %3241 = vmatprep.subr.mxu1 %v3785_v0 }
 0x727   :  { %3242 = vmatpush3.msra.mxu1 %v4131_v43  ;;  %v5931_v43 = vld [vmem:[#allocation18_spill] sm:$0xff] }
 0x728   :  { %3243 = vmatprep.subr.mxu1 %v3785_v0 }
 0x729   :  { %3244 = vmatpush3.msra.mxu1 %v4138_v44  ;;  %v5932_v44 = vld [vmem:[#allocation19_spill] sm:$0xff] }
 0x72a   :  { %3245 = vmatprep.subr.mxu1 %v3785_v0 }
 0x72b   :  { %3246 = vmatpush3.msra.mxu1 %v4145_v45  ;;  %v5933_v45 = vld [vmem:[#allocation20_spill] sm:$0xff] }
 0x72c   :  { %3247 = vmatprep.subr.mxu1 %v3785_v0 }
 0x72d   :  { %3248 = vmatpush3.msra.mxu1 %v4200_v56  ;;  %v5936_v56 = vld [vmem:[#allocation23_spill] sm:$0xff] }
 0x72e   :  { %3249 = vmatprep.subr.mxu1 %v3785_v0 }
 0x72f   :  { %3250 = vmatpush3.msra.mxu1 %v4207_v57  ;;  %v5937_v57 = vld [vmem:[#allocation24_spill] sm:$0xff] }
 0x730   :  { %3251 = vmatprep.subr.mxu1 %v3785_v0 }
 0x731   :  { %3252 = vmatpush3.msra.mxu1 %v4214_v58  ;;  %v5938_v58 = vld [vmem:[#allocation25_spill] sm:$0xff] }
 0x732   :  { %3253 = vmatprep.subr.mxu1 %v3785_v0 }
 0x733   :  { %3254 = vmatpush3.msra.mxu1 %v4221_v59  ;;  %v5939_v59 = vld [vmem:[#allocation26_spill] sm:$0xff] }
 0x734   :  { %3293 = vmatprep.subr.mxu1 %v3785_v0 }
 0x7d4   :  { %v876_v14 = vpop.f32.mrf.mxu1 }
 0x7d5   :  { %v877_v16 = vadd.f32 %v876_v14, %v4160_v50  ;;  %v5956_v14 = vld [vmem:[#allocation42_spill] sm:$0xff] }
 0x7d6   :  { %v3187_v18 = vpop.f32.mrf.mxu1 }
 0x7d7   :  { %v880_v20 = vmul.f32 0.01, %v877_v16 }
 0x7d9   :  { %v881_v21 = vmax.f32 %v877_v16, %v880_v20  ;;  %v4898_v20 = vld [vmem:[%s5783_s2 + $0x60] sm:$0xff] }
 0x7db   :  { %3221 = vmatmul.mubr.f32.vlgmr.msra.gmra.mxu0 %v881_v21  ;;  %v4905_v21 = vld [vmem:[%s5783_s2 + $0x58] sm:$0xff] }
 0x7dc   :  { %3259 = vmatpush3.msra.mxu0 %v4309_v48  ;;  %3290 = vmatprep.mubr.msk.f32.mxu0 %vm3786_vm0, %v3785_v0  ;;  %v5941_v48 = vld [vmem:[#allocation28_spill] sm:$0xff] }
 0x7dd   :  { %3260 = vmatprep.subr.mxu0 %v3785_v0 }
 0x7de   :  { %3261 = vmatpush3.msra.mxu0 %v4314_v51  ;;  %v5942_v51 = vld [vmem:[#allocation29_spill] sm:$0xff] }
 0x7df   :  { %3262 = vmatprep.subr.mxu0 %v3785_v0 }
 0x7e0   :  { %3263 = vmatpush3.msra.mxu0 %v4321_v53  ;;  %v5943_v53 = vld [vmem:[#allocation30_spill] sm:$0xff] }
 0x7e1   :  { %3264 = vmatprep.subr.mxu0 %v3785_v0 }
 0x7e2   :  { %3265 = vmatpush3.msra.mxu0 %v5916_v22  ;;  %v4912_v22 = vld [vmem:[%s5783_s2 + $0x50] sm:$0xff] }
 0x7e3   :  { %3266 = vmatprep.subr.mxu0 %v3785_v0 }
 0x7e4   :  { %3267 = vmatpush3.msra.mxu0 %v5917_v23  ;;  %v4919_v23 = vld [vmem:[%s5783_s2 + $0x48] sm:$0xff] }
 0x7e5   :  { %3268 = vmatprep.subr.mxu0 %v3785_v0 }
 0x7e6   :  { %3269 = vmatpush3.msra.mxu0 %v5918_v24  ;;  %v4926_v24 = vld [vmem:[%s5783_s2 + $0x40] sm:$0xff] }
 0x7e7   :  { %3270 = vmatprep.subr.mxu0 %v3785_v0 }
 0x7e8   :  { %3271 = vmatpush3.msra.mxu0 %v5919_v25  ;;  %v4933_v25 = vld [vmem:[%s5783_s2 + $0x38] sm:$0xff] }
 0x7e9   :  { %3272 = vmatprep.subr.mxu0 %v3785_v0 }
 0x7ea   :  { %3273 = vmatpush3.msra.mxu0 %v5920_v26  ;;  %v4940_v26 = vld [vmem:[%s5783_s2 + $0x30] sm:$0xff] }
 0x7eb   :  { %3274 = vmatprep.subr.mxu0 %v3785_v0 }
 0x7ec   :  { %3275 = vmatpush3.msra.mxu0 %v5921_v27  ;;  %v4947_v27 = vld [vmem:[%s5783_s2 + $0x28] sm:$0xff] }
 0x7ed   :  { %3276 = vmatprep.subr.mxu0 %v3785_v0 }
 0x7ee   :  { %3277 = vmatpush3.msra.mxu0 %v5922_v28  ;;  %v4954_v28 = vld [vmem:[%s5783_s2 + $0x20] sm:$0xff] }
 0x7ef   :  { %3278 = vmatprep.subr.mxu0 %v3785_v0 }
 0x7f0   :  { %3279 = vmatpush3.msra.mxu0 %v5923_v30  ;;  %v4961_v30 = vld [vmem:[%s5783_s2 + $0x18] sm:$0xff] }
 0x7f1   :  { %3280 = vmatprep.subr.mxu0 %v3785_v0 }
 0x7f2   :  { %3281 = vmatpush3.msra.mxu0 %v5924_v31  ;;  %v4968_v31 = vld [vmem:[%s5783_s2 + $0x10] sm:$0xff] }
 0x7f3   :  { %3282 = vmatprep.subr.mxu0 %v3785_v0 }
 0x7f4   :  { %3283 = vmatpush3.msra.mxu0 %v5925_v32 }
 0x7f5   :  { %3284 = vmatprep.subr.mxu0 %v3785_v0 }
 0x7f6   :  { %3285 = vmatpush3.msra.mxu0 %v5926_v33 }
 0x7f7   :  { %3286 = vmatprep.subr.mxu0 %v3785_v0 }
 0x7f8   :  { %3287 = vmatpush3.msra.mxu0 %v5927_v34 }
 0x7f9   :  { %3288 = vmatprep.subr.mxu0 %v3785_v0 }
 0x7fa   :  { %3289 = vmatpush3.msra.mxu0 %v5928_v35 }
 0x7fb   :  { %3328 = vmatprep.subr.mxu0 %v3785_v0 }
 0x89b   :  { %v964_v36 = vpop.f32.mrf.mxu0 }
 0x89c   :  { %v965_v38 = vadd.f32 %v964_v36, %v5929_v37 }
 0x89d   :  { %v3222_v39 = vpop.f32.mrf.mxu0 }
 0x89e   :  { %v968_v40 = vmul.f32 0.01, %v965_v38  ;;  %v4987_v39 = vld [vmem:[%s5783_s2] sm:$0xff] }
 0x8a0   :  { %v969_v41 = vmax.f32 %v965_v38, %v968_v40  ;;  %v4980_v38 = vld [vmem:[%s5783_s2 + $0x8] sm:$0xff]  ;;  %v4993_v40 = vld [vmem:[%s5784_s3 + $0x78] sm:$0xff] }
 0x8a2   :  { %3256 = vmatmul.mubr.f32.vlgmr.msra.gmra.mxu1 %v969_v41  ;;  %v4998_v41 = vld [vmem:[%s5784_s3 + $0x70] sm:$0xff] }
 0x8a3   :  { %3294 = vmatpush3.msra.mxu1 %v5930_v42  ;;  %3325 = vmatprep.mubr.msk.f32.mxu1 %vm3786_vm0, %v3785_v0  ;;  %v5006_v42 = vld [vmem:[%s5784_s3 + $0x68] sm:$0xff] }
 0x8a4   :  { %3295 = vmatprep.subr.mxu1 %v3785_v0 }
 0x8a5   :  { %3296 = vmatpush3.msra.mxu1 %v5931_v43  ;;  %v5013_v43 = vld [vmem:[%s5784_s3 + $0x60] sm:$0xff] }
 0x8a6   :  { %3297 = vmatprep.subr.mxu1 %v3785_v0 }
 0x8a7   :  { %3298 = vmatpush3.msra.mxu1 %v5932_v44  ;;  %v5020_v44 = vld [vmem:[%s5784_s3 + $0x58] sm:$0xff] }
 0x8a8   :  { %3299 = vmatprep.subr.mxu1 %v3785_v0 }
 0x8a9   :  { %3300 = vmatpush3.msra.mxu1 %v5933_v45  ;;  %v5027_v45 = vld [vmem:[%s5784_s3 + $0x50] sm:$0xff] }
 0x8aa   :  { %3301 = vmatprep.subr.mxu1 %v3785_v0 }
 0x8ab   :  { %3302 = vmatpush3.msra.mxu1 %v5934_v47  ;;  %v5034_v47 = vld [vmem:[%s5784_s3 + $0x48] sm:$0xff] }
 0x8ac   :  { %3303 = vmatprep.subr.mxu1 %v3785_v0 }
 0x8ad   :  { %3304 = vmatpush3.msra.mxu1 %v5935_v49  ;;  %v5041_v49 = vld [vmem:[%s5784_s3 + $0x40] sm:$0xff] }
 0x8ae   :  { %3305 = vmatprep.subr.mxu1 %v3785_v0 }
 0x8af   :  { %3306 = vmatpush3.msra.mxu1 %v5936_v56  ;;  %v5048_v56 = vld [vmem:[%s5784_s3 + $0x38] sm:$0xff] }
 0x8b0   :  { %3307 = vmatprep.subr.mxu1 %v3785_v0 }
 0x8b1   :  { %3308 = vmatpush3.msra.mxu1 %v5937_v57  ;;  %v5055_v57 = vld [vmem:[%s5784_s3 + $0x30] sm:$0xff] }
 0x8b2   :  { %3309 = vmatprep.subr.mxu1 %v3785_v0 }
 0x8b3   :  { %3310 = vmatpush3.msra.mxu1 %v5938_v58  ;;  %v5062_v58 = vld [vmem:[%s5784_s3 + $0x28] sm:$0xff] }
 0x8b4   :  { %3311 = vmatprep.subr.mxu1 %v3785_v0 }
 0x8b5   :  { %3312 = vmatpush3.msra.mxu1 %v5939_v59  ;;  %v5069_v59 = vld [vmem:[%s5784_s3 + $0x20] sm:$0xff] }
 0x8b6   :  { %3313 = vmatprep.subr.mxu1 %v3785_v0 }
 0x8b7   :  { %3314 = vmatpush3.msra.mxu1 %v5940_v52 }
 0x8b8   :  { %3315 = vmatprep.subr.mxu1 %v3785_v0 }
 0x8b9   :  { %3316 = vmatpush3.msra.mxu1 %v5941_v48 }
 0x8ba   :  { %3317 = vmatprep.subr.mxu1 %v3785_v0 }
 0x8bb   :  { %3318 = vmatpush3.msra.mxu1 %v5942_v51 }
 0x8bc   :  { %3319 = vmatprep.subr.mxu1 %v3785_v0 }
 0x8bd   :  { %3320 = vmatpush3.msra.mxu1 %v5943_v53  ;;  %v5084_v53 = vld [vmem:[%s5784_s3 + $0x18] sm:$0xff] }
 0x8be   :  { %3321 = vmatprep.subr.mxu1 %v3785_v0 }
 0x8bf   :  { %3322 = vmatpush3.msra.mxu1 %v5944_v29  ;;  %v5091_v29 = vld [vmem:[%s5784_s3 + $0x10] sm:$0xff] }
 0x8c0   :  { %3323 = vmatprep.subr.mxu1 %v3785_v0 }
 0x8c1   :  { %3324 = vmatpush3.msra.mxu1 %v5945_v46  ;;  %v5098_v46 = vld [vmem:[%s5784_s3 + $0x8] sm:$0xff] }
 0x8c2   :  { %3363 = vmatprep.subr.mxu1 %v3785_v0 }
 0x962   :  { %v1052_v55 = vpop.f32.mrf.mxu1 }
 0x963   :  { %v1053_v54 = vadd.f32 %v1052_v55, %v5946_v60  ;;  %v5105_v55 = vld [vmem:[%s5784_s3] sm:$0xff] }
 0x964   :  { %v3257_v6 = vpop.f32.mrf.mxu1 }
 0x965   :  { %3291 = vmatmul.mubr.f32.vlgmr.msra.gmra.mxu0 %v1053_v54  ;;  %v5111_v54 = vld [vmem:[%s5786_s4 + $0x78] sm:$0xff]  ;;  %v5116_v6 = vld [vmem:[%s5786_s4 + $0x70] sm:$0xff] }
 0x966   :  { %3329 = vmatpush3.msra.mxu0 %v5947_v11  ;;  %3360 = vmatprep.mubr.msk.f32.mxu0 %vm3786_vm0, %v3785_v0  ;;  %v5124_v11 = vld [vmem:[%s5786_s4 + $0x68] sm:$0xff] }
 0x967   :  { %3330 = vmatprep.subr.mxu0 %v3785_v0 }
 0x968   :  { %3331 = vmatpush3.msra.mxu0 %v5948_v13  ;;  %v5131_v13 = vld [vmem:[%s5786_s4 + $0x60] sm:$0xff] }
 0x969   :  { %3332 = vmatprep.subr.mxu0 %v3785_v0 }
 0x96a   :  { %3333 = vmatpush3.msra.mxu0 %v5949_v15  ;;  %v5138_v15 = vld [vmem:[%s5786_s4 + $0x58] sm:$0xff] }
 0x96b   :  { %3334 = vmatprep.subr.mxu0 %v3785_v0 }
 0x96c   :  { %3335 = vmatpush3.msra.mxu0 %v5950_v17  ;;  %v5145_v17 = vld [vmem:[%s5786_s4 + $0x50] sm:$0xff] }
 0x96d   :  { %3336 = vmatprep.subr.mxu0 %v3785_v0 }
 0x96e   :  { %3337 = vmatpush3.msra.mxu0 %v5951_v19  ;;  %v5152_v19 = vld [vmem:[%s5786_s4 + $0x48] sm:$0xff] }
 0x96f   :  { %3338 = vmatprep.subr.mxu0 %v3785_v0 }
 0x970   :  { %3339 = vmatpush3.msra.mxu0 %v5952_v5  ;;  %v5159_v5 = vld [vmem:[%s5786_s4 + $0x40] sm:$0xff] }
 0x971   :  { %3340 = vmatprep.subr.mxu0 %v3785_v0 }
 0x972   :  { %3341 = vmatpush3.msra.mxu0 %v5953_v8  ;;  %v5166_v8 = vld [vmem:[%s5786_s4 + $0x38] sm:$0xff] }
 0x973   :  { %3342 = vmatprep.subr.mxu0 %v3785_v0 }
 0x974   :  { %3343 = vmatpush3.msra.mxu0 %v5954_v10  ;;  %v5173_v10 = vld [vmem:[%s5786_s4 + $0x30] sm:$0xff] }
 0x975   :  { %3344 = vmatprep.subr.mxu0 %v3785_v0 }
 0x976   :  { %3345 = vmatpush3.msra.mxu0 %v5955_v12  ;;  %v5180_v12 = vld [vmem:[%s5786_s4 + $0x28] sm:$0xff] }
 0x977   :  { %3346 = vmatprep.subr.mxu0 %v3785_v0 }
 0x978   :  { %3347 = vmatpush3.msra.mxu0 %v5956_v14  ;;  %v5187_v14 = vld [vmem:[%s5786_s4 + $0x20] sm:$0xff] }
 0x979   :  { %3348 = vmatprep.subr.mxu0 %v3785_v0 }
 0x97a   :  { %3349 = vmatpush3.msra.mxu0 %v4607_v62 }
 0x97b   :  { %3350 = vmatprep.subr.mxu0 %v3785_v0 }
 0x97c   :  { %3351 = vmatpush3.msra.mxu0 %v4614_v61 }
 0x97d   :  { %3352 = vmatprep.subr.mxu0 %v3785_v0 }
 0x97e   :  { %3353 = vmatpush3.msra.mxu0 %v4662_v1 }
 0x97f   :  { %3354 = vmatprep.subr.mxu0 %v3785_v0 }
 0x980   :  { %3355 = vmatpush3.msra.mxu0 %v4669_v2  ;;  %v4879_v2 = vld [vmem:[%s5783_s2 + $0x78] sm:$0xff] }
 0x981   :  { %3356 = vmatprep.subr.mxu0 %v3785_v0 }
 0x982   :  { %3357 = vmatpush3.msra.mxu0 %v4676_v3  ;;  %v4884_v3 = vld [vmem:[%s5783_s2 + $0x70] sm:$0xff] }
 0x983   :  { %3358 = vmatprep.subr.mxu0 %v3785_v0 }
 0x984   :  { %3359 = vmatpush3.msra.mxu0 %v4683_v4  ;;  %v4891_v4 = vld [vmem:[%s5783_s2 + $0x68] sm:$0xff] }
 0x985   :  { %3398 = vmatprep.subr.mxu0 %v3785_v0 }
 0xa25   :  { %v1138_v62 = vpop.f32.mrf.mxu0 }
 0xa26   :  { %v1139_v61 = vadd.f32 %v1138_v62, %v4622_v63 }
 0xa27   :  { %v3292_v16 = vpop.f32.mrf.mxu0 }
 0xa28   :  { %v1142_v18 = vmul.f32 0.01, %v1139_v61 }
 0xa2a   :  { %v1143_v1 = vmax.f32 %v1139_v61, %v1142_v18 }
 0xa2c   :  { %3326 = vmatmul.mubr.f32.vlgmr.msra.gmra.mxu1 %v1143_v1 }
 0xa2d   :  { %3395 = vmatprep.mubr.msk.f32.mxu1 %vm3786_vm0, %v3785_v0  ;;  %3364 = vmatpush3.msra.mxu1 %v4879_v2 }
 0xa2e   :  { %3365 = vmatprep.subr.mxu1 %v3785_v0 }
 0xa2f   :  { %3366 = vmatpush3.msra.mxu1 %v4884_v3 }
 0xa30   :  { %3367 = vmatprep.subr.mxu1 %v3785_v0 }
 0xa31   :  { %3368 = vmatpush3.msra.mxu1 %v4891_v4 }
 0xa32   :  { %3369 = vmatprep.subr.mxu1 %v3785_v0 }
 0xa33   :  { %3370 = vmatpush3.msra.mxu1 %v4898_v20 }
 0xa34   :  { %3371 = vmatprep.subr.mxu1 %v3785_v0 }
 0xa35   :  { %3372 = vmatpush3.msra.mxu1 %v4905_v21 }
 0xa36   :  { %3373 = vmatprep.subr.mxu1 %v3785_v0 }
 0xa37   :  { %3374 = vmatpush3.msra.mxu1 %v4912_v22 }
 0xa38   :  { %3375 = vmatprep.subr.mxu1 %v3785_v0 }
 0xa39   :  { %3376 = vmatpush3.msra.mxu1 %v4919_v23 }
 0xa3a   :  { %3377 = vmatprep.subr.mxu1 %v3785_v0 }
 0xa3b   :  { %3378 = vmatpush3.msra.mxu1 %v4926_v24 }
 0xa3c   :  { %3379 = vmatprep.subr.mxu1 %v3785_v0 }
 0xa3d   :  { %3380 = vmatpush3.msra.mxu1 %v4933_v25 }
 0xa3e   :  { %3381 = vmatprep.subr.mxu1 %v3785_v0 }
 0xa3f   :  { %3382 = vmatpush3.msra.mxu1 %v4940_v26 }
 0xa40   :  { %3383 = vmatprep.subr.mxu1 %v3785_v0 }
 0xa41   :  { %3384 = vmatpush3.msra.mxu1 %v4947_v27 }
 0xa42   :  { %3385 = vmatprep.subr.mxu1 %v3785_v0 }
 0xa43   :  { %3386 = vmatpush3.msra.mxu1 %v4954_v28 }
 0xa44   :  { %3387 = vmatprep.subr.mxu1 %v3785_v0 }
 0xa45   :  { %3388 = vmatpush3.msra.mxu1 %v4961_v30 }
 0xa46   :  { %3389 = vmatprep.subr.mxu1 %v3785_v0 }
 0xa47   :  { %3390 = vmatpush3.msra.mxu1 %v4968_v31 }
 0xa48   :  { %3391 = vmatprep.subr.mxu1 %v3785_v0 }
 0xa49   :  { %3392 = vmatpush3.msra.mxu1 %v4980_v38 }
 0xa4a   :  { %3393 = vmatprep.subr.mxu1 %v3785_v0 }
 0xa4b   :  { %3394 = vmatpush3.msra.mxu1 %v4987_v39 }
 0xa4c   :  { %3433 = vmatprep.subr.mxu1 %v3785_v0 }
 0xaec   :  { %v1226_v32 = vpop.f32.mrf.mxu1 }
 0xaed   :  { %v1227_v33 = vadd.f32 %v1226_v32, %v4689_v9  ;;  %v5199_v32 = vld [vmem:[%s5786_s4 + $0x18] sm:$0xff] }
 0xaee   :  { %v3327_v34 = vpop.f32.mrf.mxu1 }
 0xaef   :  { %v1230_v35 = vmul.f32 0.01, %v1227_v33  ;;  %v5213_v34 = vld [vmem:[%s5786_s4 + $0x8] sm:$0xff] }
 0xaf1   :  { %v1231_v36 = vmax.f32 %v1227_v33, %v1230_v35  ;;  %v5206_v33 = vld [vmem:[%s5786_s4 + $0x10] sm:$0xff]  ;;  %v5220_v35 = vld [vmem:[%s5786_s4] sm:$0xff] }
 0xaf3   :  { %3361 = vmatmul.mubr.f32.vlgmr.msra.gmra.mxu0 %v1231_v36  ;;  %v5226_v36 = vld [vmem:[%s5788_s5 + $0x78] sm:$0xff] }
 0xaf4   :  { %3430 = vmatprep.mubr.msk.f32.mxu0 %vm3786_vm0, %v3785_v0  ;;  %3399 = vmatpush3.msra.mxu0 %v4993_v40 }
 0xaf5   :  { %3400 = vmatprep.subr.mxu0 %v3785_v0 }
 0xaf6   :  { %3401 = vmatpush3.msra.mxu0 %v4998_v41 }
 0xaf7   :  { %3402 = vmatprep.subr.mxu0 %v3785_v0 }
 0xaf8   :  { %3403 = vmatpush3.msra.mxu0 %v5006_v42 }
 0xaf9   :  { %3404 = vmatprep.subr.mxu0 %v3785_v0 }
 0xafa   :  { %3405 = vmatpush3.msra.mxu0 %v5013_v43 }
 0xafb   :  { %3406 = vmatprep.subr.mxu0 %v3785_v0 }
 0xafc   :  { %3407 = vmatpush3.msra.mxu0 %v5020_v44 }
 0xafd   :  { %3408 = vmatprep.subr.mxu0 %v3785_v0 }
 0xafe   :  { %3409 = vmatpush3.msra.mxu0 %v5027_v45 }
 0xaff   :  { %3410 = vmatprep.subr.mxu0 %v3785_v0 }
 0xb00   :  { %3411 = vmatpush3.msra.mxu0 %v5034_v47 }
 0xb01   :  { %3412 = vmatprep.subr.mxu0 %v3785_v0 }
 0xb02   :  { %3413 = vmatpush3.msra.mxu0 %v5041_v49 }
 0xb03   :  { %3414 = vmatprep.subr.mxu0 %v3785_v0 }
 0xb04   :  { %3415 = vmatpush3.msra.mxu0 %v5048_v56 }
 0xb05   :  { %3416 = vmatprep.subr.mxu0 %v3785_v0 }
 0xb06   :  { %3417 = vmatpush3.msra.mxu0 %v5055_v57 }
 0xb07   :  { %3418 = vmatprep.subr.mxu0 %v3785_v0 }
 0xb08   :  { %3419 = vmatpush3.msra.mxu0 %v5062_v58 }
 0xb09   :  { %3420 = vmatprep.subr.mxu0 %v3785_v0 }
 0xb0a   :  { %3421 = vmatpush3.msra.mxu0 %v5069_v59 }
 0xb0b   :  { %3422 = vmatprep.subr.mxu0 %v3785_v0 }
 0xb0c   :  { %3423 = vmatpush3.msra.mxu0 %v5084_v53 }
 0xb0d   :  { %3424 = vmatprep.subr.mxu0 %v3785_v0 }
 0xb0e   :  { %3425 = vmatpush3.msra.mxu0 %v5091_v29 }
 0xb0f   :  { %3426 = vmatprep.subr.mxu0 %v3785_v0 }
 0xb10   :  { %3427 = vmatpush3.msra.mxu0 %v5098_v46 }
 0xb11   :  { %3428 = vmatprep.subr.mxu0 %v3785_v0 }
 0xb12   :  { %3429 = vmatpush3.msra.mxu0 %v5105_v55 }
 0xb13   :  { %3468 = vmatprep.subr.mxu0 %v3785_v0 }
 0xbb3   :  { %v1314_v52 = vpop.f32.mrf.mxu0 }
 0xbb4   :  { %v1315_v48 = vadd.f32 %v1314_v52, %v4728_v7  ;;  %v5231_v52 = vld [vmem:[%s5788_s5 + $0x70] sm:$0xff] }
 0xbb5   :  { %v3362_v51 = vpop.f32.mrf.mxu0 }
 0xbb6   :  { %2376 = vst [vmem:[%s5791_s8 + $0x8] sm:$0xff] %v1315_v48  ;;  %3396 = vmatmul.mubr.f32.vlgmr.msra.gmra.mxu1 %v1315_v48  ;;  %v5239_v48 = vld [vmem:[%s5788_s5 + $0x68] sm:$0xff]  ;;  %v5246_v51 = vld [vmem:[%s5788_s5 + $0x60] sm:$0xff] }
 0xbb7   :  { %3465 = vmatprep.mubr.msk.f32.mxu1 %vm3786_vm0, %v3785_v0  ;;  %3434 = vmatpush3.msra.mxu1 %v5111_v54  ;;  %5957 = vst [vmem:[#allocation4_spill] sm:$0xff] %v5239_v48  ;;  %5958 = vst [vmem:[#allocation5_spill] sm:$0xff] %v5246_v51 }
 0xbb8   :  { %3435 = vmatprep.subr.mxu1 %v3785_v0 }
 0xbb9   :  { %3436 = vmatpush3.msra.mxu1 %v5116_v6 }
 0xbba   :  { %3437 = vmatprep.subr.mxu1 %v3785_v0 }
 0xbbb   :  { %3438 = vmatpush3.msra.mxu1 %v5124_v11 }
 0xbbc   :  { %3439 = vmatprep.subr.mxu1 %v3785_v0 }
 0xbbd   :  { %3440 = vmatpush3.msra.mxu1 %v5131_v13 }
 0xbbe   :  { %3441 = vmatprep.subr.mxu1 %v3785_v0 }
 0xbbf   :  { %3442 = vmatpush3.msra.mxu1 %v5138_v15 }
 0xbc0   :  { %3443 = vmatprep.subr.mxu1 %v3785_v0 }
 0xbc1   :  { %3444 = vmatpush3.msra.mxu1 %v5145_v17 }
 0xbc2   :  { %3445 = vmatprep.subr.mxu1 %v3785_v0 }
 0xbc3   :  { %3446 = vmatpush3.msra.mxu1 %v5152_v19 }
 0xbc4   :  { %3447 = vmatprep.subr.mxu1 %v3785_v0 }
 0xbc5   :  { %3448 = vmatpush3.msra.mxu1 %v5159_v5 }
 0xbc6   :  { %3449 = vmatprep.subr.mxu1 %v3785_v0 }
 0xbc7   :  { %3450 = vmatpush3.msra.mxu1 %v5166_v8 }
 0xbc8   :  { %3451 = vmatprep.subr.mxu1 %v3785_v0 }
 0xbc9   :  { %3452 = vmatpush3.msra.mxu1 %v5173_v10 }
 0xbca   :  { %3453 = vmatprep.subr.mxu1 %v3785_v0 }
 0xbcb   :  { %3454 = vmatpush3.msra.mxu1 %v5180_v12 }
 0xbcc   :  { %3455 = vmatprep.subr.mxu1 %v3785_v0 }
 0xbcd   :  { %3456 = vmatpush3.msra.mxu1 %v5187_v14 }
 0xbce   :  { %3457 = vmatprep.subr.mxu1 %v3785_v0 }
 0xbcf   :  { %3458 = vmatpush3.msra.mxu1 %v5199_v32 }
 0xbd0   :  { %3459 = vmatprep.subr.mxu1 %v3785_v0 }
 0xbd1   :  { %3460 = vmatpush3.msra.mxu1 %v5206_v33 }
 0xbd2   :  { %3461 = vmatprep.subr.mxu1 %v3785_v0 }
 0xbd3   :  { %3462 = vmatpush3.msra.mxu1 %v5213_v34 }
 0xbd4   :  { %3463 = vmatprep.subr.mxu1 %v3785_v0 }
 0xbd5   :  { %3464 = vmatpush3.msra.mxu1 %v5220_v35 }
 0xbd6   :  { %3503 = vmatprep.subr.mxu1 %v3785_v0 }
 0xc76   :  { %v1402_v62 = vpop.f32.mrf.mxu1 }
 0xc77   :  { %v1403_v61 = vadd.f32 %v1402_v62, %v4160_v50  ;;  %v5253_v62 = vld [vmem:[%s5788_s5 + $0x58] sm:$0xff] }
 0xc78   :  { %v3397_v16 = vpop.f32.mrf.mxu1  ;;  %5959 = vst [vmem:[#allocation6_spill] sm:$0xff] %v5253_v62 }
 0xc79   :  { %v1406_v18 = vmul.f32 0.01, %v1403_v61  ;;  %v5267_v16 = vld [vmem:[%s5788_s5 + $0x48] sm:$0xff] }
 0xc7a   :  { %5961 = vst [vmem:[#allocation8_spill] sm:$0xff] %v5267_v16 }
 0xc7b   :  { %v1407_v1 = vmax.f32 %v1403_v61, %v1406_v18  ;;  %v5260_v61 = vld [vmem:[%s5788_s5 + $0x50] sm:$0xff]  ;;  %v5274_v18 = vld [vmem:[%s5788_s5 + $0x40] sm:$0xff] }
 0xc7c   :  { %5960 = vst [vmem:[#allocation7_spill] sm:$0xff] %v5260_v61  ;;  %5962 = vst [vmem:[#allocation9_spill] sm:$0xff] %v5274_v18 }
 0xc7d   :  { %3431 = vmatmul.mubr.f32.vlgmr.msra.gmra.mxu0 %v1407_v1  ;;  %v5281_v1 = vld [vmem:[%s5788_s5 + $0x38] sm:$0xff] }
 0xc7e   :  { %3500 = vmatprep.mubr.msk.f32.mxu0 %vm3786_vm0, %v3785_v0  ;;  %3469 = vmatpush3.msra.mxu0 %v5226_v36  ;;  %5963 = vst [vmem:[#allocation10_spill] sm:$0xff] %v5281_v1 }
 0xc7f   :  { %3470 = vmatprep.subr.mxu0 %v3785_v0 }
 0xc80   :  { %3471 = vmatpush3.msra.mxu0 %v5231_v52 }
 0xc81   :  { %3472 = vmatprep.subr.mxu0 %v3785_v0 }
 0xc82   :  { %3473 = vmatpush3.msra.mxu0 %v5239_v48 }
 0xc83   :  { %3474 = vmatprep.subr.mxu0 %v3785_v0 }
 0xc84   :  { %3475 = vmatpush3.msra.mxu0 %v5246_v51 }
 0xc85   :  { %3476 = vmatprep.subr.mxu0 %v3785_v0 }
 0xc86   :  { %3477 = vmatpush3.msra.mxu0 %v5253_v62 }
 0xc87   :  { %3478 = vmatprep.subr.mxu0 %v3785_v0 }
 0xc88   :  { %3479 = vmatpush3.msra.mxu0 %v5260_v61  ;;  %v5288_v61 = vld [vmem:[%s5788_s5 + $0x30] sm:$0xff] }
 0xc89   :  { %3480 = vmatprep.subr.mxu0 %v3785_v0  ;;  %5964 = vst [vmem:[#allocation11_spill] sm:$0xff] %v5288_v61 }
 0xc8a   :  { %3481 = vmatpush3.msra.mxu0 %v5267_v16  ;;  %v5295_v16 = vld [vmem:[%s5788_s5 + $0x28] sm:$0xff] }
 0xc8b   :  { %3482 = vmatprep.subr.mxu0 %v3785_v0  ;;  %5965 = vst [vmem:[#allocation12_spill] sm:$0xff] %v5295_v16 }
 0xc8c   :  { %3483 = vmatpush3.msra.mxu0 %v5274_v18  ;;  %v5302_v18 = vld [vmem:[%s5788_s5 + $0x20] sm:$0xff] }
 0xc8d   :  { %3484 = vmatprep.subr.mxu0 %v3785_v0  ;;  %5966 = vst [vmem:[#allocation13_spill] sm:$0xff] %v5302_v18 }
 0xc8e   :  { %3485 = vmatpush3.msra.mxu0 %v5281_v1  ;;  %v5309_v1 = vld [vmem:[%s5788_s5 + $0x18] sm:$0xff] }
 0xc8f   :  { %3486 = vmatprep.subr.mxu0 %v3785_v0  ;;  %5967 = vst [vmem:[#allocation14_spill] sm:$0xff] %v5309_v1 }
 0xc90   :  { %3487 = vmatpush3.msra.mxu0 %v5288_v61  ;;  %v5316_v61 = vld [vmem:[%s5788_s5 + $0x10] sm:$0xff] }
 0xc91   :  { %3488 = vmatprep.subr.mxu0 %v3785_v0 }
 0xc92   :  { %3489 = vmatpush3.msra.mxu0 %v5295_v16 }
 0xc93   :  { %3490 = vmatprep.subr.mxu0 %v3785_v0 }
 0xc94   :  { %3491 = vmatpush3.msra.mxu0 %v5302_v18 }
 0xc95   :  { %3492 = vmatprep.subr.mxu0 %v3785_v0 }
 0xc96   :  { %3493 = vmatpush3.msra.mxu0 %v5309_v1  ;;  %v5328_v1 = vld [vmem:[%s5788_s5 + $0x8] sm:$0xff] }
 0xc97   :  { %3494 = vmatprep.subr.mxu0 %v3785_v0 }
 0xc98   :  { %3495 = vmatpush3.msra.mxu0 %v5316_v61 }
 0xc99   :  { %3496 = vmatprep.subr.mxu0 %v3785_v0 }
 0xc9a   :  { %3497 = vmatpush3.msra.mxu0 %v5328_v1 }
 0xc9b   :  { %3498 = vmatprep.subr.mxu0 %v3785_v0 }
 0xd3d   :  { %v1490_v16 = vpop.f32.mrf.mxu0 }
 0xd3e   :  { %v1491_v62 = vadd.f32 %v1490_v16, %v5929_v37  ;;  %v5335_v16 = vld [vmem:[%s5788_s5] sm:$0xff] }
 0xd3f   :  { %v3432_v51 = vpop.f32.mrf.mxu0  ;;  %5968 = vst [vmem:[#allocation15_spill] sm:$0xff] %v5335_v16  ;;  %3499 = vmatpush3.msra.mxu0 %v5335_v16 }
 0xd40   :  { %v1494_v18 = vmul.f32 0.01, %v1491_v62  ;;  %v5346_v51 = vld [vmem:[%s5789_s6 + $0x70] sm:$0xff]  ;;  %3538 = vmatprep.subr.mxu0 %v3785_v0 }
 0xd41   :  { %5970 = vst [vmem:[#allocation17_spill] sm:$0xff] %v5346_v51 }
 0xd42   :  { %v1495_v48 = vmax.f32 %v1491_v62, %v1494_v18  ;;  %v5354_v62 = vld [vmem:[%s5789_s6 + $0x68] sm:$0xff]  ;;  %v5361_v18 = vld [vmem:[%s5789_s6 + $0x60] sm:$0xff] }
 0xd43   :  { %5971 = vst [vmem:[#allocation18_spill] sm:$0xff] %v5354_v62  ;;  %5972 = vst [vmem:[#allocation19_spill] sm:$0xff] %v5361_v18 }
 0xd44   :  { %3466 = vmatmul.mubr.f32.vlgmr.msra.gmra.mxu1 %v1495_v48  ;;  %v5341_v48 = vld [vmem:[%s5789_s6 + $0x78] sm:$0xff] }
 0xd45   :  { %3535 = vmatprep.mubr.msk.f32.mxu1 %vm3786_vm0, %v3785_v0  ;;  %5969 = vst [vmem:[#allocation16_spill] sm:$0xff] %v5341_v48  ;;  %3504 = vmatpush3.msra.mxu1 %v5341_v48  ;;  %v5368_v48 = vld [vmem:[%s5789_s6 + $0x58] sm:$0xff] }
 0xd46   :  { %3505 = vmatprep.subr.mxu1 %v3785_v0  ;;  %5973 = vst [vmem:[#allocation20_spill] sm:$0xff] %v5368_v48 }
 0xd47   :  { %3506 = vmatpush3.msra.mxu1 %v5346_v51  ;;  %v5375_v51 = vld [vmem:[%s5789_s6 + $0x50] sm:$0xff] }
 0xd48   :  { %3507 = vmatprep.subr.mxu1 %v3785_v0  ;;  %5974 = vst [vmem:[#allocation21_spill] sm:$0xff] %v5375_v51 }
 0xd49   :  { %3508 = vmatpush3.msra.mxu1 %v5354_v62  ;;  %v5382_v62 = vld [vmem:[%s5789_s6 + $0x48] sm:$0xff] }
 0xd4a   :  { %3509 = vmatprep.subr.mxu1 %v3785_v0  ;;  %5975 = vst [vmem:[#allocation22_spill] sm:$0xff] %v5382_v62 }
 0xd4b   :  { %3510 = vmatpush3.msra.mxu1 %v5361_v18  ;;  %v5389_v18 = vld [vmem:[%s5789_s6 + $0x40] sm:$0xff] }
 0xd4c   :  { %3511 = vmatprep.subr.mxu1 %v3785_v0  ;;  %5976 = vst [vmem:[#allocation23_spill] sm:$0xff] %v5389_v18 }
 0xd4d   :  { %3512 = vmatpush3.msra.mxu1 %v5368_v48  ;;  %v5396_v48 = vld [vmem:[%s5789_s6 + $0x38] sm:$0xff] }
 0xd4e   :  { %3513 = vmatprep.subr.mxu1 %v3785_v0  ;;  %5977 = vst [vmem:[#allocation24_spill] sm:$0xff] %v5396_v48 }
 0xd4f   :  { %3514 = vmatpush3.msra.mxu1 %v5375_v51  ;;  %v5403_v51 = vld [vmem:[%s5789_s6 + $0x30] sm:$0xff] }
 0xd50   :  { %3515 = vmatprep.subr.mxu1 %v3785_v0  ;;  %5978 = vst [vmem:[#allocation25_spill] sm:$0xff] %v5403_v51 }
 0xd51   :  { %3516 = vmatpush3.msra.mxu1 %v5382_v62  ;;  %v5410_v62 = vld [vmem:[%s5789_s6 + $0x28] sm:$0xff] }
 0xd52   :  { %3517 = vmatprep.subr.mxu1 %v3785_v0  ;;  %5979 = vst [vmem:[#allocation26_spill] sm:$0xff] %v5410_v62 }
 0xd53   :  { %3518 = vmatpush3.msra.mxu1 %v5389_v18  ;;  %v5417_v18 = vld [vmem:[%s5789_s6 + $0x20] sm:$0xff] }
 0xd54   :  { %3519 = vmatprep.subr.mxu1 %v3785_v0  ;;  %5980 = vst [vmem:[#allocation27_spill] sm:$0xff] %v5417_v18 }
 0xd55   :  { %3520 = vmatpush3.msra.mxu1 %v5396_v48 }
 0xd56   :  { %3521 = vmatprep.subr.mxu1 %v3785_v0 }
 0xd57   :  { %3522 = vmatpush3.msra.mxu1 %v5403_v51  ;;  %v5429_v51 = vld [vmem:[%s5789_s6 + $0x18] sm:$0xff] }
 0xd58   :  { %3523 = vmatprep.subr.mxu1 %v3785_v0  ;;  %5981 = vst [vmem:[#allocation28_spill] sm:$0xff] %v5429_v51 }
 0xd59   :  { %3524 = vmatpush3.msra.mxu1 %v5410_v62 }
 0xd5a   :  { %3525 = vmatprep.subr.mxu1 %v3785_v0 }
 0xd5b   :  { %3526 = vmatpush3.msra.mxu1 %v5417_v18  ;;  %v5436_v18 = vld [vmem:[%s5789_s6 + $0x10] sm:$0xff] }
 0xd5c   :  { %3527 = vmatprep.subr.mxu1 %v3785_v0  ;;  %5982 = vst [vmem:[#allocation29_spill] sm:$0xff] %v5436_v18 }
 0xd5d   :  { %3528 = vmatpush3.msra.mxu1 %v5429_v51 }
 0xd5e   :  { %3529 = vmatprep.subr.mxu1 %v3785_v0 }
 0xd5f   :  { %3530 = vmatpush3.msra.mxu1 %v5436_v18 }
 0xd60   :  { %3531 = vmatprep.subr.mxu1 %v3785_v0 }
 0xe04   :  { %v1578_v48 = vpop.f32.mrf.mxu1 }
 0xe05   :  { %v1579_v37 = vadd.f32 %v1578_v48, %v5946_v60  ;;  %v5456_v48 = vld [vmem:[%s5790_s7 + $0x78] sm:$0xff]  ;;  %v5461_v60 = vld [vmem:[%s5790_s7 + $0x70] sm:$0xff] }
 0xe06   :  { %v3467_v16 = vpop.f32.mrf.mxu1  ;;  %5985 = vst [vmem:[#allocation32_spill] sm:$0xff] %v5456_v48  ;;  %5986 = vst [vmem:[#allocation33_spill] sm:$0xff] %v5461_v60 }
 0xe07   :  { %3501 = vmatmul.mubr.f32.vlgmr.msra.gmra.mxu0 %v1579_v37  ;;  %v5443_v37 = vld [vmem:[%s5789_s6 + $0x8] sm:$0xff]  ;;  %v5450_v16 = vld [vmem:[%s5789_s6] sm:$0xff] }
 0xe08   :  { %3570 = vmatprep.mubr.msk.f32.mxu0 %vm3786_vm0, %v3785_v0  ;;  %5983 = vst [vmem:[#allocation30_spill] sm:$0xff] %v5443_v37  ;;  %3532 = vmatpush3.msra.mxu1 %v5443_v37  ;;  %5984 = vst [vmem:[#allocation31_spill] sm:$0xff] %v5450_v16  ;;  %v5476_v37 = vld [vmem:[%s5790_s7 + $0x60] sm:$0xff] }
 0xe09   :  { %3533 = vmatprep.subr.mxu1 %v3785_v0  ;;  %3539 = vmatpush3.msra.mxu0 %v5456_v48  ;;  %5988 = vst [vmem:[#allocation35_spill] sm:$0xff] %v5476_v37  ;;  %v5483_v48 = vld [vmem:[%s5790_s7 + $0x58] sm:$0xff] }
 0xe0a   :  { %3534 = vmatpush3.msra.mxu1 %v5450_v16  ;;  %3540 = vmatprep.subr.mxu0 %v3785_v0  ;;  %v5469_v16 = vld [vmem:[%s5790_s7 + $0x68] sm:$0xff]  ;;  %5989 = vst [vmem:[#allocation36_spill] sm:$0xff] %v5483_v48 }
 0xe0b   :  { %3573 = vmatprep.subr.mxu1 %v3785_v0  ;;  %5987 = vst [vmem:[#allocation34_spill] sm:$0xff] %v5469_v16  ;;  %3541 = vmatpush3.msra.mxu0 %v5461_v60  ;;  %v5490_v60 = vld [vmem:[%s5790_s7 + $0x50] sm:$0xff] }
 0xe0c   :  { %3542 = vmatprep.subr.mxu0 %v3785_v0  ;;  %5990 = vst [vmem:[#allocation37_spill] sm:$0xff] %v5490_v60 }
 0xe0d   :  { %3543 = vmatpush3.msra.mxu0 %v5469_v16  ;;  %v5497_v16 = vld [vmem:[%s5790_s7 + $0x48] sm:$0xff] }
 0xe0e   :  { %3544 = vmatprep.subr.mxu0 %v3785_v0  ;;  %5991 = vst [vmem:[#allocation38_spill] sm:$0xff] %v5497_v16 }
 0xe0f   :  { %3545 = vmatpush3.msra.mxu0 %v5476_v37  ;;  %v5504_v37 = vld [vmem:[%s5790_s7 + $0x40] sm:$0xff] }
 0xe10   :  { %3546 = vmatprep.subr.mxu0 %v3785_v0  ;;  %5992 = vst [vmem:[#allocation39_spill] sm:$0xff] %v5504_v37 }
 0xe11   :  { %3547 = vmatpush3.msra.mxu0 %v5483_v48  ;;  %v5511_v48 = vld [vmem:[%s5790_s7 + $0x38] sm:$0xff] }
 0xe12   :  { %3548 = vmatprep.subr.mxu0 %v3785_v0  ;;  %5993 = vst [vmem:[#allocation40_spill] sm:$0xff] %v5511_v48 }
 0xe13   :  { %3549 = vmatpush3.msra.mxu0 %v5490_v60  ;;  %v5518_v60 = vld [vmem:[%s5790_s7 + $0x30] sm:$0xff] }
 0xe14   :  { %3550 = vmatprep.subr.mxu0 %v3785_v0  ;;  %5994 = vst [vmem:[#allocation41_spill] sm:$0xff] %v5518_v60 }
 0xe15   :  { %3551 = vmatpush3.msra.mxu0 %v5497_v16  ;;  %v5525_v16 = vld [vmem:[%s5790_s7 + $0x28] sm:$0xff] }
 0xe16   :  { %3552 = vmatprep.subr.mxu0 %v3785_v0 }
 0xe17   :  { %3553 = vmatpush3.msra.mxu0 %v5504_v37  ;;  %v5532_v37 = vld [vmem:[%s5790_s7 + $0x20] sm:$0xff] }
 0xe18   :  { %3554 = vmatprep.subr.mxu0 %v3785_v0 }
 0xe19   :  { %3555 = vmatpush3.msra.mxu0 %v5511_v48 }
 0xe1a   :  { %3556 = vmatprep.subr.mxu0 %v3785_v0 }
 0xe1b   :  { %3557 = vmatpush3.msra.mxu0 %v5518_v60 }
 0xe1c   :  { %3558 = vmatprep.subr.mxu0 %v3785_v0 }
 0xe1d   :  { %3559 = vmatpush3.msra.mxu0 %v5525_v16 }
 0xe1e   :  { %3560 = vmatprep.subr.mxu0 %v3785_v0 }
 0xe1f   :  { %3561 = vmatpush3.msra.mxu0 %v5532_v37 }
 0xe20   :  { %3562 = vmatprep.subr.mxu0 %v3785_v0 }
 0xec7   :  { %v1664_v48 = vpop.f32.mrf.mxu0 }
 0xec8   :  { %v1665_v18 = vadd.f32 %v1664_v48, %v4622_v63  ;;  %v6027_v48 = vld [vmem:[#allocation34_spill] sm:$0xff] }
 0xec9   :  { %v3502_v51 = vpop.f32.mrf.mxu0 }
 0xeca   :  { %v1668_v60 = vmul.f32 0.01, %v1665_v18 }
 0xecc   :  { %v1669_v62 = vmax.f32 %v1665_v18, %v1668_v60  ;;  %v5576_v60 = vld [vmem:[%s5790_s7 + $0x18] sm:$0xff] }
 0xecd   :  { %3563 = vmatpush3.msra.mxu0 %v5576_v60  ;;  %v6026_v18 = vld [vmem:[#allocation33_spill] sm:$0xff] }
 0xece   :  { %3536 = vmatmul.mubr.f32.vlgmr.msra.gmra.mxu1 %v1669_v62  ;;  %3564 = vmatprep.subr.mxu0 %v3785_v0  ;;  %v6025_v62 = vld [vmem:[#allocation32_spill] sm:$0xff] }
 0xecf   :  { %3574 = vmatpush3.msra.mxu1 %v4879_v2  ;;  %3605 = vmatprep.mubr.msk.f32.mxu1 %vm3786_vm0, %v3785_v0  ;;  %v5583_v2 = vld [vmem:[%s5790_s7 + $0x10] sm:$0xff] }
 0xed0   :  { %3575 = vmatprep.subr.mxu1 %v3785_v0  ;;  %3565 = vmatpush3.msra.mxu0 %v5583_v2 }
 0xed1   :  { %3576 = vmatpush3.msra.mxu1 %v4884_v3  ;;  %3566 = vmatprep.subr.mxu0 %v3785_v0  ;;  %v5590_v3 = vld [vmem:[%s5790_s7 + $0x8] sm:$0xff] }
 0xed2   :  { %3577 = vmatprep.subr.mxu1 %v3785_v0  ;;  %3567 = vmatpush3.msra.mxu0 %v5590_v3 }
 0xed3   :  { %3578 = vmatpush3.msra.mxu1 %v4891_v4  ;;  %3568 = vmatprep.subr.mxu0 %v3785_v0  ;;  %v5597_v4 = vld [vmem:[%s5790_s7] sm:$0xff] }
 0xed4   :  { %3579 = vmatprep.subr.mxu1 %v3785_v0  ;;  %3569 = vmatpush3.msra.mxu0 %v5597_v4 }
 0xed5   :  { %3580 = vmatpush3.msra.mxu1 %v4898_v20  ;;  %3608 = vmatprep.subr.mxu0 %v3785_v0 }
 0xed6   :  { %3581 = vmatprep.subr.mxu1 %v3785_v0 }
 0xed7   :  { %3582 = vmatpush3.msra.mxu1 %v4905_v21 }
 0xed8   :  { %3583 = vmatprep.subr.mxu1 %v3785_v0 }
 0xed9   :  { %3584 = vmatpush3.msra.mxu1 %v4912_v22 }
 0xeda   :  { %3585 = vmatprep.subr.mxu1 %v3785_v0 }
 0xedb   :  { %3586 = vmatpush3.msra.mxu1 %v4919_v23 }
 0xedc   :  { %3587 = vmatprep.subr.mxu1 %v3785_v0 }
 0xedd   :  { %3588 = vmatpush3.msra.mxu1 %v4926_v24 }
 0xede   :  { %3589 = vmatprep.subr.mxu1 %v3785_v0 }
 0xedf   :  { %3590 = vmatpush3.msra.mxu1 %v4933_v25 }
 0xee0   :  { %3591 = vmatprep.subr.mxu1 %v3785_v0 }
 0xee1   :  { %3592 = vmatpush3.msra.mxu1 %v4940_v26 }
 0xee2   :  { %3593 = vmatprep.subr.mxu1 %v3785_v0 }
 0xee3   :  { %3594 = vmatpush3.msra.mxu1 %v4947_v27 }
 0xee4   :  { %3595 = vmatprep.subr.mxu1 %v3785_v0 }
 0xee5   :  { %3596 = vmatpush3.msra.mxu1 %v4954_v28 }
 0xee6   :  { %3597 = vmatprep.subr.mxu1 %v3785_v0 }
 0xee7   :  { %3598 = vmatpush3.msra.mxu1 %v4961_v30 }
 0xee8   :  { %3599 = vmatprep.subr.mxu1 %v3785_v0 }
 0xee9   :  { %3600 = vmatpush3.msra.mxu1 %v4968_v31 }
 0xeea   :  { %3601 = vmatprep.subr.mxu1 %v3785_v0 }
 0xeeb   :  { %3602 = vmatpush3.msra.mxu1 %v4980_v38 }
 0xeec   :  { %3603 = vmatprep.subr.mxu1 %v3785_v0 }
 0xeed   :  { %3604 = vmatpush3.msra.mxu1 %v4987_v39 }
 0xeee   :  { %3643 = vmatprep.subr.mxu1 %v3785_v0 }
 0xf8e   :  { %v1752_v20 = vpop.f32.mrf.mxu1 }
 0xf8f   :  { %v1753_v21 = vadd.f32 %v1752_v20, %v4689_v9  ;;  %v6028_v20 = vld [vmem:[#allocation35_spill] sm:$0xff] }
 0xf90   :  { %v3537_v22 = vpop.f32.mrf.mxu1 }
 0xf91   :  { %v1756_v23 = vmul.f32 0.01, %v1753_v21  ;;  %v6030_v22 = vld [vmem:[#allocation37_spill] sm:$0xff] }
 0xf93   :  { %v1757_v24 = vmax.f32 %v1753_v21, %v1756_v23  ;;  %v6029_v21 = vld [vmem:[#allocation36_spill] sm:$0xff]  ;;  %v6031_v23 = vld [vmem:[#allocation38_spill] sm:$0xff] }
 0xf95   :  { %3571 = vmatmul.mubr.f32.vlgmr.msra.gmra.mxu0 %v1757_v24  ;;  %v6032_v24 = vld [vmem:[#allocation39_spill] sm:$0xff] }
 0xf96   :  { %3609 = vmatpush3.msra.mxu0 %v4993_v40  ;;  %3640 = vmatprep.mubr.msk.f32.mxu0 %vm3786_vm0, %v3785_v0  ;;  %v5995_v40 = vld [vmem:[#allocation4_spill] sm:$0xff] }
 0xf97   :  { %3610 = vmatprep.subr.mxu0 %v3785_v0 }
 0xf98   :  { %3611 = vmatpush3.msra.mxu0 %v4998_v41  ;;  %v5997_v41 = vld [vmem:[#allocation6_spill] sm:$0xff] }
 0xf99   :  { %3612 = vmatprep.subr.mxu0 %v3785_v0 }
 0xf9a   :  { %3613 = vmatpush3.msra.mxu0 %v5006_v42  ;;  %v5998_v42 = vld [vmem:[#allocation7_spill] sm:$0xff] }
 0xf9b   :  { %3614 = vmatprep.subr.mxu0 %v3785_v0 }
 0xf9c   :  { %3615 = vmatpush3.msra.mxu0 %v5013_v43  ;;  %v5999_v43 = vld [vmem:[#allocation8_spill] sm:$0xff] }
 0xf9d   :  { %3616 = vmatprep.subr.mxu0 %v3785_v0 }
 0xf9e   :  { %3617 = vmatpush3.msra.mxu0 %v5020_v44  ;;  %v6000_v44 = vld [vmem:[#allocation9_spill] sm:$0xff] }
 0xf9f   :  { %3618 = vmatprep.subr.mxu0 %v3785_v0 }
 0xfa0   :  { %3619 = vmatpush3.msra.mxu0 %v5027_v45  ;;  %v6001_v45 = vld [vmem:[#allocation10_spill] sm:$0xff] }
 0xfa1   :  { %3620 = vmatprep.subr.mxu0 %v3785_v0 }
 0xfa2   :  { %3621 = vmatpush3.msra.mxu0 %v5034_v47  ;;  %v6002_v47 = vld [vmem:[#allocation11_spill] sm:$0xff] }
 0xfa3   :  { %3622 = vmatprep.subr.mxu0 %v3785_v0 }
 0xfa4   :  { %3623 = vmatpush3.msra.mxu0 %v5041_v49  ;;  %v6003_v49 = vld [vmem:[#allocation12_spill] sm:$0xff] }
 0xfa5   :  { %3624 = vmatprep.subr.mxu0 %v3785_v0 }
 0xfa6   :  { %3625 = vmatpush3.msra.mxu0 %v5048_v56  ;;  %v6004_v56 = vld [vmem:[#allocation13_spill] sm:$0xff] }
 0xfa7   :  { %3626 = vmatprep.subr.mxu0 %v3785_v0 }
 0xfa8   :  { %3627 = vmatpush3.msra.mxu0 %v5055_v57  ;;  %v6005_v57 = vld [vmem:[#allocation14_spill] sm:$0xff] }
 0xfa9   :  { %3628 = vmatprep.subr.mxu0 %v3785_v0 }
 0xfaa   :  { %3629 = vmatpush3.msra.mxu0 %v5062_v58  ;;  %v6006_v58 = vld [vmem:[#allocation15_spill] sm:$0xff] }
 0xfab   :  { %3630 = vmatprep.subr.mxu0 %v3785_v0 }
 0xfac   :  { %3631 = vmatpush3.msra.mxu0 %v5069_v59 }
 0xfad   :  { %3632 = vmatprep.subr.mxu0 %v3785_v0 }
 0xfae   :  { %3633 = vmatpush3.msra.mxu0 %v5084_v53  ;;  %v6007_v53 = vld [vmem:[#allocation2_spill] sm:$0xff] }
 0xfaf   :  { %3634 = vmatprep.subr.mxu0 %v3785_v0 }
 0xfb0   :  { %3635 = vmatpush3.msra.mxu0 %v5091_v29 }
 0xfb1   :  { %3636 = vmatprep.subr.mxu0 %v3785_v0 }
 0xfb2   :  { %3637 = vmatpush3.msra.mxu0 %v5098_v46 }
 0xfb3   :  { %3638 = vmatprep.subr.mxu0 %v3785_v0 }
 0xfb4   :  { %3639 = vmatpush3.msra.mxu0 %v5105_v55 }
 0xfb5   :  { %3678 = vmatprep.subr.mxu0 %v3785_v0 }
0x1055   :  { %v1840_v25 = vpop.f32.mrf.mxu0 }
0x1056   :  { %v1841_v26 = vadd.f32 %v1840_v25, %v4728_v7  ;;  %v6033_v25 = vld [vmem:[#allocation40_spill] sm:$0xff] }
0x1057   :  { %v3572_v27 = vpop.f32.mrf.mxu0 }
0x1058   :  { %2377 = vst [vmem:[%s5791_s8 + $0x10] sm:$0xff] %v1841_v26  ;;  %3606 = vmatmul.mubr.f32.vlgmr.msra.gmra.mxu1 %v1841_v26  ;;  %v6034_v26 = vld [vmem:[#allocation41_spill] sm:$0xff] }
0x1059   :  { %3644 = vmatpush3.msra.mxu1 %v5111_v54  ;;  %3675 = vmatprep.mubr.msk.f32.mxu1 %vm3786_vm0, %v3785_v0 }
0x105a   :  { %3645 = vmatprep.subr.mxu1 %v3785_v0 }
0x105b   :  { %3646 = vmatpush3.msra.mxu1 %v5116_v6  ;;  %v6008_v6 = vld [vmem:[#allocation16_spill] sm:$0xff] }
0x105c   :  { %3647 = vmatprep.subr.mxu1 %v3785_v0 }
0x105d   :  { %3648 = vmatpush3.msra.mxu1 %v5124_v11  ;;  %v6009_v11 = vld [vmem:[#allocation17_spill] sm:$0xff] }
0x105e   :  { %3649 = vmatprep.subr.mxu1 %v3785_v0 }
0x105f   :  { %3650 = vmatpush3.msra.mxu1 %v5131_v13  ;;  %v6010_v13 = vld [vmem:[#allocation18_spill] sm:$0xff] }
0x1060   :  { %3651 = vmatprep.subr.mxu1 %v3785_v0 }
0x1061   :  { %3652 = vmatpush3.msra.mxu1 %v5138_v15  ;;  %v6011_v15 = vld [vmem:[#allocation19_spill] sm:$0xff] }
0x1062   :  { %3653 = vmatprep.subr.mxu1 %v3785_v0 }
0x1063   :  { %3654 = vmatpush3.msra.mxu1 %v5145_v17  ;;  %v6012_v17 = vld [vmem:[#allocation20_spill] sm:$0xff] }
0x1064   :  { %3655 = vmatprep.subr.mxu1 %v3785_v0 }
0x1065   :  { %3656 = vmatpush3.msra.mxu1 %v5152_v19  ;;  %v6013_v19 = vld [vmem:[#allocation21_spill] sm:$0xff] }
0x1066   :  { %3657 = vmatprep.subr.mxu1 %v3785_v0 }
0x1067   :  { %3658 = vmatpush3.msra.mxu1 %v5159_v5  ;;  %v6014_v5 = vld [vmem:[#allocation22_spill] sm:$0xff] }
0x1068   :  { %3659 = vmatprep.subr.mxu1 %v3785_v0 }
0x1069   :  { %3660 = vmatpush3.msra.mxu1 %v5166_v8  ;;  %v6015_v8 = vld [vmem:[#allocation23_spill] sm:$0xff] }
0x106a   :  { %3661 = vmatprep.subr.mxu1 %v3785_v0 }
0x106b   :  { %3662 = vmatpush3.msra.mxu1 %v5173_v10  ;;  %v6016_v10 = vld [vmem:[#allocation24_spill] sm:$0xff] }
0x106c   :  { %3663 = vmatprep.subr.mxu1 %v3785_v0 }
0x106d   :  { %3664 = vmatpush3.msra.mxu1 %v5180_v12  ;;  %v6017_v12 = vld [vmem:[#allocation25_spill] sm:$0xff] }
0x106e   :  { %3665 = vmatprep.subr.mxu1 %v3785_v0 }
0x106f   :  { %3666 = vmatpush3.msra.mxu1 %v5187_v14  ;;  %v6018_v14 = vld [vmem:[#allocation26_spill] sm:$0xff] }
0x1070   :  { %3667 = vmatprep.subr.mxu1 %v3785_v0 }
0x1071   :  { %3668 = vmatpush3.msra.mxu1 %v5199_v32  ;;  %v6019_v32 = vld [vmem:[#allocation27_spill] sm:$0xff] }
0x1072   :  { %3669 = vmatprep.subr.mxu1 %v3785_v0 }
0x1073   :  { %3670 = vmatpush3.msra.mxu1 %v5206_v33  ;;  %v6020_v33 = vld [vmem:[#allocation28_spill] sm:$0xff] }
0x1074   :  { %3671 = vmatprep.subr.mxu1 %v3785_v0 }
0x1075   :  { %3672 = vmatpush3.msra.mxu1 %v5213_v34  ;;  %v6021_v34 = vld [vmem:[#allocation29_spill] sm:$0xff] }
0x1076   :  { %3673 = vmatprep.subr.mxu1 %v3785_v0 }
0x1077   :  { %3674 = vmatpush3.msra.mxu1 %v5220_v35  ;;  %v6022_v35 = vld [vmem:[#allocation30_spill] sm:$0xff] }
0x1078   :  { %3713 = vmatprep.subr.mxu1 %v3785_v0 }
0x1118   :  { %v1928_v28 = vpop.f32.mrf.mxu1 }
0x1119   :  { %v1929_v30 = vadd.f32 %v1928_v28, %v4160_v50  ;;  %v5996_v50 = vld [vmem:[#allocation5_spill] sm:$0xff] }
0x111a   :  { %v3607_v31 = vpop.f32.mrf.mxu1 }
0x111b   :  { %v1932_v38 = vmul.f32 0.01, %v1929_v30 }
0x111d   :  { %v1933_v39 = vmax.f32 %v1929_v30, %v1932_v38 }
0x111f   :  { %3641 = vmatmul.mubr.f32.vlgmr.msra.gmra.mxu0 %v1933_v39 }
0x1120   :  { %3679 = vmatpush3.msra.mxu0 %v5226_v36  ;;  %3710 = vmatprep.mubr.msk.f32.mxu0 %vm3786_vm0, %v3785_v0  ;;  %v6023_v36 = vld [vmem:[#allocation31_spill] sm:$0xff] }
0x1121   :  { %3680 = vmatprep.subr.mxu0 %v3785_v0 }
0x1122   :  { %3681 = vmatpush3.msra.mxu0 %v5231_v52 }
0x1123   :  { %3682 = vmatprep.subr.mxu0 %v3785_v0 }
0x1124   :  { %3683 = vmatpush3.msra.mxu0 %v5995_v40 }
0x1125   :  { %3684 = vmatprep.subr.mxu0 %v3785_v0 }
0x1126   :  { %3685 = vmatpush3.msra.mxu0 %v5996_v50 }
0x1127   :  { %3686 = vmatprep.subr.mxu0 %v3785_v0 }
0x1128   :  { %3687 = vmatpush3.msra.mxu0 %v5997_v41 }
0x1129   :  { %3688 = vmatprep.subr.mxu0 %v3785_v0 }
0x112a   :  { %3689 = vmatpush3.msra.mxu0 %v5998_v42 }
0x112b   :  { %3690 = vmatprep.subr.mxu0 %v3785_v0 }
0x112c   :  { %3691 = vmatpush3.msra.mxu0 %v5999_v43 }
0x112d   :  { %3692 = vmatprep.subr.mxu0 %v3785_v0 }
0x112e   :  { %3693 = vmatpush3.msra.mxu0 %v6000_v44 }
0x112f   :  { %3694 = vmatprep.subr.mxu0 %v3785_v0 }
0x1130   :  { %3695 = vmatpush3.msra.mxu0 %v6001_v45 }
0x1131   :  { %3696 = vmatprep.subr.mxu0 %v3785_v0 }
0x1132   :  { %3697 = vmatpush3.msra.mxu0 %v6002_v47 }
0x1133   :  { %3698 = vmatprep.subr.mxu0 %v3785_v0 }
0x1134   :  { %3699 = vmatpush3.msra.mxu0 %v6003_v49 }
0x1135   :  { %3700 = vmatprep.subr.mxu0 %v3785_v0 }
0x1136   :  { %3701 = vmatpush3.msra.mxu0 %v6004_v56 }
0x1137   :  { %3702 = vmatprep.subr.mxu0 %v3785_v0 }
0x1138   :  { %3703 = vmatpush3.msra.mxu0 %v6005_v57 }
0x1139   :  { %3704 = vmatprep.subr.mxu0 %v3785_v0 }
0x113a   :  { %3705 = vmatpush3.msra.mxu0 %v5316_v61  ;;  %v6024_v61 = vld [vmem:[#allocation3_spill] sm:$0xff] }
0x113b   :  { %3706 = vmatprep.subr.mxu0 %v3785_v0 }
0x113c   :  { %3707 = vmatpush3.msra.mxu0 %v5328_v1 }
0x113d   :  { %3708 = vmatprep.subr.mxu0 %v3785_v0 }
0x113e   :  { %3709 = vmatpush3.msra.mxu0 %v6006_v58 }
0x113f   :  { %3748 = vmatprep.subr.mxu0 %v3785_v0 }
0x11df   :  { %v2016_v59 = vpop.f32.mrf.mxu0 }
0x11e0   :  { %v2017_v29 = vadd.f32 %v2016_v59, %v6007_v53 }
0x11e1   :  { %v3642_v46 = vpop.f32.mrf.mxu0 }
0x11e2   :  { %v2020_v55 = vmul.f32 0.01, %v2017_v29 }
0x11e4   :  { %v2021_v54 = vmax.f32 %v2017_v29, %v2020_v55 }
0x11e6   :  { %3676 = vmatmul.mubr.f32.vlgmr.msra.gmra.mxu1 %v2021_v54 }
0x11e7   :  { %3714 = vmatpush3.msra.mxu1 %v6008_v6  ;;  %3745 = vmatprep.mubr.msk.f32.mxu1 %vm3786_vm0, %v3785_v0 }
0x11e8   :  { %3715 = vmatprep.subr.mxu1 %v3785_v0 }
0x11e9   :  { %3716 = vmatpush3.msra.mxu1 %v6009_v11 }
0x11ea   :  { %3717 = vmatprep.subr.mxu1 %v3785_v0 }
0x11eb   :  { %3718 = vmatpush3.msra.mxu1 %v6010_v13 }
0x11ec   :  { %3719 = vmatprep.subr.mxu1 %v3785_v0 }
0x11ed   :  { %3720 = vmatpush3.msra.mxu1 %v6011_v15 }
0x11ee   :  { %3721 = vmatprep.subr.mxu1 %v3785_v0 }
0x11ef   :  { %3722 = vmatpush3.msra.mxu1 %v6012_v17 }
0x11f0   :  { %3723 = vmatprep.subr.mxu1 %v3785_v0 }
0x11f1   :  { %3724 = vmatpush3.msra.mxu1 %v6013_v19 }
0x11f2   :  { %3725 = vmatprep.subr.mxu1 %v3785_v0 }
0x11f3   :  { %3726 = vmatpush3.msra.mxu1 %v6014_v5 }
0x11f4   :  { %3727 = vmatprep.subr.mxu1 %v3785_v0 }
0x11f5   :  { %3728 = vmatpush3.msra.mxu1 %v6015_v8 }
0x11f6   :  { %3729 = vmatprep.subr.mxu1 %v3785_v0 }
0x11f7   :  { %3730 = vmatpush3.msra.mxu1 %v6016_v10 }
0x11f8   :  { %3731 = vmatprep.subr.mxu1 %v3785_v0 }
0x11f9   :  { %3732 = vmatpush3.msra.mxu1 %v6017_v12 }
0x11fa   :  { %3733 = vmatprep.subr.mxu1 %v3785_v0 }
0x11fb   :  { %3734 = vmatpush3.msra.mxu1 %v6018_v14 }
0x11fc   :  { %3735 = vmatprep.subr.mxu1 %v3785_v0 }
0x11fd   :  { %3736 = vmatpush3.msra.mxu1 %v6019_v32 }
0x11fe   :  { %3737 = vmatprep.subr.mxu1 %v3785_v0 }
0x11ff   :  { %3738 = vmatpush3.msra.mxu1 %v6020_v33 }
0x1200   :  { %3739 = vmatprep.subr.mxu1 %v3785_v0 }
0x1201   :  { %3740 = vmatpush3.msra.mxu1 %v6021_v34 }
0x1202   :  { %3741 = vmatprep.subr.mxu1 %v3785_v0 }
0x1203   :  { %3742 = vmatpush3.msra.mxu1 %v6022_v35 }
0x1204   :  { %3743 = vmatprep.subr.mxu1 %v3785_v0 }
0x1205   :  { %3744 = vmatpush3.msra.mxu1 %v6023_v36 }
0x12a6   :  { %v2104_v52 = vpop.f32.mrf.mxu1 }
0x12a7   :  { %v2105_v1 = vadd.f32 %v2104_v52, %v6024_v61 }
0x12a8   :  { %v3677_v51 = vpop.f32.mrf.mxu1 }
0x12a9   :  { %3711 = vmatmul.mubr.f32.vlgmr.msra.gmra.mxu0 %v2105_v1 }
0x12aa   :  { %3749 = vmatpush3.msra.mxu0 %v6025_v62  ;;  %3780 = vmatprep.mubr.msk.f32.mxu0 %vm3786_vm0, %v3785_v0 }
0x12ab   :  { %3750 = vmatprep.subr.mxu0 %v3785_v0 }
0x12ac   :  { %3751 = vmatpush3.msra.mxu0 %v6026_v18 }
0x12ad   :  { %3752 = vmatprep.subr.mxu0 %v3785_v0 }
0x12ae   :  { %3753 = vmatpush3.msra.mxu0 %v6027_v48 }
0x12af   :  { %3754 = vmatprep.subr.mxu0 %v3785_v0 }
0x12b0   :  { %3755 = vmatpush3.msra.mxu0 %v6028_v20 }
0x12b1   :  { %3756 = vmatprep.subr.mxu0 %v3785_v0 }
0x12b2   :  { %3757 = vmatpush3.msra.mxu0 %v6029_v21 }
0x12b3   :  { %3758 = vmatprep.subr.mxu0 %v3785_v0 }
0x12b4   :  { %3759 = vmatpush3.msra.mxu0 %v6030_v22 }
0x12b5   :  { %3760 = vmatprep.subr.mxu0 %v3785_v0 }
0x12b6   :  { %3761 = vmatpush3.msra.mxu0 %v6031_v23 }
0x12b7   :  { %3762 = vmatprep.subr.mxu0 %v3785_v0 }
0x12b8   :  { %3763 = vmatpush3.msra.mxu0 %v6032_v24 }
0x12b9   :  { %3764 = vmatprep.subr.mxu0 %v3785_v0 }
0x12ba   :  { %3765 = vmatpush3.msra.mxu0 %v6033_v25 }
0x12bb   :  { %3766 = vmatprep.subr.mxu0 %v3785_v0 }
0x12bc   :  { %3767 = vmatpush3.msra.mxu0 %v6034_v26 }
0x12bd   :  { %3768 = vmatprep.subr.mxu0 %v3785_v0 }
0x12be   :  { %3769 = vmatpush3.msra.mxu0 %v5525_v16 }
0x12bf   :  { %3770 = vmatprep.subr.mxu0 %v3785_v0 }
0x12c0   :  { %3771 = vmatpush3.msra.mxu0 %v5532_v37 }
0x12c1   :  { %3772 = vmatprep.subr.mxu0 %v3785_v0 }
0x12c2   :  { %3773 = vmatpush3.msra.mxu0 %v5576_v60 }
0x12c3   :  { %3774 = vmatprep.subr.mxu0 %v3785_v0 }
0x12c4   :  { %3775 = vmatpush3.msra.mxu0 %v5583_v2 }
0x12c5   :  { %3776 = vmatprep.subr.mxu0 %v3785_v0 }
0x12c6   :  { %3777 = vmatpush3.msra.mxu0 %v5590_v3 }
0x12c7   :  { %3778 = vmatprep.subr.mxu0 %v3785_v0 }
0x12c8   :  { %3779 = vmatpush3.msra.mxu0 %v5597_v4 }
0x1369   :  { %v2190_v16 = vpop.f32.mrf.mxu0 }
0x136a   :  { %v2191_v27 = vadd.f32 %v2190_v16, %v4622_v63 }
0x136b   :  { %v3712_v37 = vpop.f32.mrf.mxu0 }
0x136c   :  { %v2194_v28 = vmul.f32 0.01, %v2191_v27 }
0x136e   :  { %v2195_v30 = vmax.f32 %v2191_v27, %v2194_v28 }
0x1370   :  { %3746 = vmatmul.mubr.f32.vlgmr.msra.gmra.mxu1 %v2195_v30 }
0x1430   :  { %v2278_v60 = vpop.f32.mrf.mxu1 }
0x1431   :  { %v2279_v31 = vadd.f32 %v2278_v60, %v4689_v9 }
0x1432   :  { %v3747_v38 = vpop.f32.mrf.mxu1 }
0x1433   :  { %v2282_v2 = vmul.f32 0.01, %v2279_v31 }
0x1435   :  { %v2283_v39 = vmax.f32 %v2279_v31, %v2282_v2 }
0x1437   :  { %3781 = vmatmul.mubr.f32.vlgmr.msra.gmra.mxu0 %v2283_v39 }
0x14f7   :  { %v2366_v40 = vpop.f32.mrf.mxu0 }
0x14f8   :  { %v2367_v3 = vadd.f32 %v2366_v40, %v4728_v7 }
0x14f9   :  { %v3782_v0 = vpop.f32.mrf.mxu0 }
0x14fa   :  { %2378 = vst [vmem:[%s5791_s8 + $0x18] sm:$0xff] %v2367_v3 }

// kernel: _feed_forward_fused.1
= control target key start
LH: loop header
LB: loop body
LE: loop exit
PB: predicated region body
PF: predicated region fallthrough
CT: control target
= control target key end

     0   :  { %v3785_v0 = vmov 0.0   ;;  %vm3786_vm0 = vmmov 0   ;;  %v47_v46 = vlaneseq  ;;  %s5783_s2 = inlined_call_operand.vmem [shape: f32[128,128], index: 2, kind: input, shape index: {}]   ;;  %s5784_s3 = inlined_call_operand.vmem [shape: f32[128,128], index: 3, kind: input, shape index: {}]   ;;  %s5785_s0 = inlined_call_operand.vmem [shape: f32[8,128], index: 0, kind: input, shape index: {}]   ;;  %s5786_s4 = inlined_call_operand.vmem [shape: f32[128,128], index: 4, kind: input, shape index: {}]   ;;  %s5787_s1 = inlined_call_operand.vmem [shape: f32[8,128], index: 1, kind: input, shape index: {}]   ;;  %s5788_s5 = inlined_call_operand.vmem [shape: f32[128,128], index: 5, kind: input, shape index: {}]   ;;  %s5789_s6 = inlined_call_operand.vmem [shape: f32[128,128], index: 6, kind: input, shape index: {}]   ;;  %s5790_s7 = inlined_call_operand.vmem [shape: f32[128,128], index: 7, kind: input, shape index: {}]   ;;  %s5791_s8 = inlined_call_operand.vmem [shape: f32[4,8,128], index: 8, kind: output, shape index: {}]  }
   0x1   :  { %2838 = vmatprep.subr.mxu0 %v3785_v0  ;;  %v3836_v1 = vld [vmem:[%s5783_s2 + $0x78] sm:$0xff]  ;;  %v3841_v2 = vld [vmem:[%s5783_s2 + $0x70] sm:$0xff]  ;;  %2870 = vmatprep.mubr.msk.f32.mxu0 %vm3786_vm0, %v3785_v0  ;;  %v3851_v3 = vld [vmem:[%s5783_s2 + $0x68] sm:$0xff] }
   0x2   :  { %2839 = vmatpush3.msra.mxu0 %v3836_v1  ;;  %2873 = vmatprep.subr.mxu1 %v3785_v0  ;;  %v3860_v4 = vld [vmem:[%s5783_s2 + $0x60] sm:$0xff]  ;;  %v3866_v5 = vld [vmem:[%s5784_s3 + $0x78] sm:$0xff]  ;;  %v3878_v7 = vld [vmem:[%s5784_s3 + $0x70] sm:$0xff]  ;;  %v4151_v47 = vshrl.u32 %v47_v46, 7 }
   0x3   :  { %2840 = vmatprep.subr.mxu0 %v3785_v0  ;;  %2905 = vmatprep.mubr.msk.f32.mxu1 %vm3786_vm0, %v3785_v0  ;;  %v3872_v6 = vld [vmem:[%s5783_s2 + $0x58] sm:$0xff]  ;;  %v3885_v8 = vld [vmem:[%s5784_s3 + $0x68] sm:$0xff]  ;;  %v3891_v9 = vld [vmem:[%s5783_s2 + $0x50] sm:$0xff] }
   0x4   :  { %2841 = vmatpush3.msra.mxu0 %v3841_v2  ;;  %2874 = vmatpush3.msra.mxu1 %v3866_v5  ;;  %v3899_v10 = vld [vmem:[%s5784_s3 + $0x60] sm:$0xff]  ;;  %v3905_v11 = vld [vmem:[%s5783_s2 + $0x48] sm:$0xff]  ;;  %v3913_v12 = vld [vmem:[%s5784_s3 + $0x58] sm:$0xff]  ;;  %v49_v48 = vsub.s32 0, %v4151_v47  ;;  %v141_v60 = vsub.s32 1, %v4151_v47 }
   0x5   :  { %2842 = vmatprep.subr.mxu0 %v3785_v0  ;;  %2875 = vmatprep.subr.mxu1 %v3785_v0  ;;  %v3919_v13 = vld [vmem:[%s5783_s2 + $0x40] sm:$0xff]  ;;  %v3927_v14 = vld [vmem:[%s5784_s3 + $0x50] sm:$0xff]  ;;  %v3933_v15 = vld [vmem:[%s5783_s2 + $0x38] sm:$0xff] }
   0x6   :  { %2843 = vmatpush3.msra.mxu0 %v3851_v3  ;;  %2876 = vmatpush3.msra.mxu1 %v3878_v7  ;;  %v3941_v16 = vld [vmem:[%s5784_s3 + $0x48] sm:$0xff]  ;;  %v3947_v17 = vld [vmem:[%s5783_s2 + $0x30] sm:$0xff]  ;;  %v3955_v18 = vld [vmem:[%s5784_s3 + $0x40] sm:$0xff] }
   0x7   :  { %2844 = vmatprep.subr.mxu0 %v3785_v0  ;;  %2877 = vmatprep.subr.mxu1 %v3785_v0  ;;  %v3961_v19 = vld [vmem:[%s5783_s2 + $0x28] sm:$0xff]  ;;  %v3969_v20 = vld [vmem:[%s5784_s3 + $0x38] sm:$0xff]  ;;  %v3975_v21 = vld [vmem:[%s5783_s2 + $0x20] sm:$0xff] }
   0x8   :  { %2845 = vmatpush3.msra.mxu0 %v3860_v4  ;;  %2878 = vmatpush3.msra.mxu1 %v3885_v8  ;;  %v3983_v22 = vld [vmem:[%s5784_s3 + $0x30] sm:$0xff]  ;;  %v3989_v23 = vld [vmem:[%s5783_s2 + $0x18] sm:$0xff]  ;;  %v3997_v24 = vld [vmem:[%s5784_s3 + $0x28] sm:$0xff] }
   0x9   :  { %2846 = vmatprep.subr.mxu0 %v3785_v0  ;;  %2879 = vmatprep.subr.mxu1 %v3785_v0  ;;  %v4003_v25 = vld [vmem:[%s5783_s2 + $0x10] sm:$0xff]  ;;  %v4011_v26 = vld [vmem:[%s5784_s3 + $0x20] sm:$0xff]  ;;  %v4017_v27 = vld [vmem:[%s5783_s2 + $0x8] sm:$0xff] }
   0xa   :  { %2847 = vmatpush3.msra.mxu0 %v3872_v6  ;;  %2880 = vmatpush3.msra.mxu1 %v3899_v10  ;;  %v4026_v28 = vld [vmem:[%s5783_s2] sm:$0xff]  ;;  %v4042_v30 = vld [vmem:[%s5784_s3 + $0x18] sm:$0xff]  ;;  %v4049_v31 = vld [vmem:[%s5784_s3 + $0x10] sm:$0xff] }
   0xb   :  { %2848 = vmatprep.subr.mxu0 %v3785_v0  ;;  %2881 = vmatprep.subr.mxu1 %v3785_v0  ;;  %v30_v29 = vld [vmem:[%s5785_s0] sm:$0xff]  ;;  %v4056_v32 = vld [vmem:[%s5784_s3 + $0x8] sm:$0xff]  ;;  %v4070_v34 = vld [vmem:[%s5786_s4 + $0x78] sm:$0xff] }
   0xc   :  { %2849 = vmatpush3.msra.mxu0 %v3891_v9  ;;  %2882 = vmatpush3.msra.mxu1 %v3913_v12  ;;  %v4063_v33 = vld [vmem:[%s5784_s3] sm:$0xff]  ;;  %v4075_v35 = vld [vmem:[%s5786_s4 + $0x70] sm:$0xff]  ;;  %v4082_v36 = vld [vmem:[%s5786_s4 + $0x68] sm:$0xff] }
   0xd   :  { %2850 = vmatprep.subr.mxu0 %v3785_v0  ;;  %2883 = vmatprep.subr.mxu1 %v3785_v0  ;;  %v4089_v37 = vld [vmem:[%s5786_s4 + $0x60] sm:$0xff]  ;;  %v4096_v38 = vld [vmem:[%s5786_s4 + $0x58] sm:$0xff]  ;;  %v4103_v39 = vld [vmem:[%s5786_s4 + $0x50] sm:$0xff] }
   0xe   :  { %2851 = vmatpush3.msra.mxu0 %v3905_v11  ;;  %2884 = vmatpush3.msra.mxu1 %v3927_v14  ;;  %v4110_v40 = vld [vmem:[%s5786_s4 + $0x48] sm:$0xff]  ;;  %v4117_v41 = vld [vmem:[%s5786_s4 + $0x40] sm:$0xff]  ;;  %v4124_v42 = vld [vmem:[%s5786_s4 + $0x38] sm:$0xff] }
   0xf   :  { %2852 = vmatprep.subr.mxu0 %v3785_v0  ;;  %2885 = vmatprep.subr.mxu1 %v3785_v0  ;;  %v4131_v43 = vld [vmem:[%s5786_s4 + $0x30] sm:$0xff]  ;;  %v4138_v44 = vld [vmem:[%s5786_s4 + $0x28] sm:$0xff]  ;;  %v4145_v45 = vld [vmem:[%s5786_s4 + $0x20] sm:$0xff] }
  0x10   :  { %2853 = vmatpush3.msra.mxu0 %v3919_v13  ;;  %2886 = vmatpush3.msra.mxu1 %v3941_v16  ;;  %v4157_v49 = vld [vmem:[%s5787_s1] sm:$0xff]  ;;  %v4200_v56 = vld [vmem:[%s5786_s4 + $0x18] sm:$0xff]  ;;  %v4207_v57 = vld [vmem:[%s5786_s4 + $0x10] sm:$0xff] }
  0x11   :  { %2854 = vmatprep.subr.mxu0 %v3785_v0  ;;  %2887 = vmatprep.subr.mxu1 %v3785_v0  ;;  %v4160_v50 = vrot.slane %v4157_v49, %v49_v48  ;;  %v4214_v58 = vld [vmem:[%s5786_s4 + $0x8] sm:$0xff]  ;;  %v4221_v59 = vld [vmem:[%s5786_s4] sm:$0xff]  ;;  %v4227_v61 = vrot.slane %v4157_v49, %v141_v60 }
  0x12   :  { %2855 = vmatpush3.msra.mxu0 %v3933_v15  ;;  %2888 = vmatpush3.msra.mxu1 %v3955_v18 }
  0x13   :  { %2856 = vmatprep.subr.mxu0 %v3785_v0  ;;  %2889 = vmatprep.subr.mxu1 %v3785_v0  ;;  %5875 = vst [vmem:[#allocation2_spill] sm:$0xff] %v4227_v61 }
  0x14   :  { %2857 = vmatpush3.msra.mxu0 %v3947_v17  ;;  %2890 = vmatpush3.msra.mxu1 %v3969_v20 }
  0x15   :  { %2858 = vmatprep.subr.mxu0 %v3785_v0  ;;  %2891 = vmatprep.subr.mxu1 %v3785_v0 }
  0x16   :  { %2859 = vmatpush3.msra.mxu0 %v3961_v19  ;;  %2892 = vmatpush3.msra.mxu1 %v3983_v22 }
  0x17   :  { %2860 = vmatprep.subr.mxu0 %v3785_v0  ;;  %2893 = vmatprep.subr.mxu1 %v3785_v0 }
  0x18   :  { %2861 = vmatpush3.msra.mxu0 %v3975_v21  ;;  %2894 = vmatpush3.msra.mxu1 %v3997_v24 }
  0x19   :  { %2862 = vmatprep.subr.mxu0 %v3785_v0  ;;  %2895 = vmatprep.subr.mxu1 %v3785_v0 }
  0x1a   :  { %2863 = vmatpush3.msra.mxu0 %v3989_v23  ;;  %2896 = vmatpush3.msra.mxu1 %v4011_v26 }
  0x1b   :  { %2864 = vmatprep.subr.mxu0 %v3785_v0  ;;  %2897 = vmatprep.subr.mxu1 %v3785_v0 }
  0x1c   :  { %2865 = vmatpush3.msra.mxu0 %v4003_v25  ;;  %2898 = vmatpush3.msra.mxu1 %v4042_v30 }
  0x1d   :  { %2866 = vmatprep.subr.mxu0 %v3785_v0  ;;  %2899 = vmatprep.subr.mxu1 %v3785_v0 }
  0x1e   :  { %2867 = vmatpush3.msra.mxu0 %v4017_v27  ;;  %2900 = vmatpush3.msra.mxu1 %v4049_v31 }
  0x1f   :  { %2868 = vmatprep.subr.mxu0 %v3785_v0  ;;  %2901 = vmatprep.subr.mxu1 %v3785_v0 }
  0x20   :  { %2869 = vmatpush3.msra.mxu0 %v4026_v28  ;;  %2902 = vmatpush3.msra.mxu1 %v4056_v32 }
  0x21   :  { %2871 = vmatmul.mubr.f32.vlgmr.msra.gmra.mxu0 %v30_v29  ;;  %2908 = vmatprep.subr.mxu0 %v3785_v0 }
  0x22   :  { %2940 = vmatprep.mubr.msk.f32.mxu0 %vm3786_vm0, %v3785_v0  ;;  %2903 = vmatprep.subr.mxu1 %v3785_v0 }
  0x23   :  { %2904 = vmatpush3.msra.mxu1 %v4063_v33  ;;  %2909 = vmatpush3.msra.mxu0 %v4070_v34 }
  0x24   :  { %2943 = vmatprep.subr.mxu1 %v3785_v0  ;;  %2910 = vmatprep.subr.mxu0 %v3785_v0 }
  0x25   :  { %2911 = vmatpush3.msra.mxu0 %v4075_v35 }
  0x26   :  { %2912 = vmatprep.subr.mxu0 %v3785_v0 }
  0x27   :  { %2913 = vmatpush3.msra.mxu0 %v4082_v36 }
  0x28   :  { %2914 = vmatprep.subr.mxu0 %v3785_v0 }
  0x29   :  { %2915 = vmatpush3.msra.mxu0 %v4089_v37 }
  0x2a   :  { %2916 = vmatprep.subr.mxu0 %v3785_v0 }
  0x2b   :  { %2917 = vmatpush3.msra.mxu0 %v4096_v38 }
  0x2c   :  { %2918 = vmatprep.subr.mxu0 %v3785_v0 }
  0x2d   :  { %2919 = vmatpush3.msra.mxu0 %v4103_v39 }
  0x2e   :  { %2920 = vmatprep.subr.mxu0 %v3785_v0 }
  0x2f   :  { %2921 = vmatpush3.msra.mxu0 %v4110_v40 }
  0x30   :  { %2922 = vmatprep.subr.mxu0 %v3785_v0 }
  0x31   :  { %2923 = vmatpush3.msra.mxu0 %v4117_v41 }
  0x32   :  { %2924 = vmatprep.subr.mxu0 %v3785_v0 }
  0x33   :  { %2925 = vmatpush3.msra.mxu0 %v4124_v42 }
  0x34   :  { %2926 = vmatprep.subr.mxu0 %v3785_v0 }
  0x35   :  { %2927 = vmatpush3.msra.mxu0 %v4131_v43 }
  0x36   :  { %2928 = vmatprep.subr.mxu0 %v3785_v0 }
  0x37   :  { %2929 = vmatpush3.msra.mxu0 %v4138_v44 }
  0x38   :  { %2930 = vmatprep.subr.mxu0 %v3785_v0 }
  0x39   :  { %2931 = vmatpush3.msra.mxu0 %v4145_v45 }
  0x3a   :  { %2932 = vmatprep.subr.mxu0 %v3785_v0 }
  0x3b   :  { %2933 = vmatpush3.msra.mxu0 %v4200_v56 }
  0x3c   :  { %2934 = vmatprep.subr.mxu0 %v3785_v0 }
  0x3d   :  { %2935 = vmatpush3.msra.mxu0 %v4207_v57 }
  0x3e   :  { %2936 = vmatprep.subr.mxu0 %v3785_v0 }
  0x3f   :  { %2937 = vmatpush3.msra.mxu0 %v4214_v58 }
  0x40   :  { %2938 = vmatprep.subr.mxu0 %v3785_v0 }
  0x41   :  { %2939 = vmatpush3.msra.mxu0 %v4221_v59 }
  0x42   :  { %2978 = vmatprep.subr.mxu0 %v3785_v0 }
  0xe1   :  { %v117_v51 = vpop.f32.mrf.mxu0 }
  0xe2   :  { %v118_v52 = vadd.f32 %v117_v51, %v4160_v50  ;;  %v233_v51 = vsub.s32 2, %v4151_v47 }
  0xe3   :  { %v2872_v53 = vpop.f32.mrf.mxu0 }
  0xe4   :  { %v121_v54 = vmul.f32 0.01, %v118_v52 }
  0xe6   :  { %v122_v55 = vmax.f32 %v118_v52, %v121_v54  ;;  %v4266_v52 = vrot.slane %v4157_v49, %v233_v51  ;;  %v4314_v51 = vld [vmem:[%s5788_s5 + $0x70] sm:$0xff] }
  0xe8   :  { %2906 = vmatmul.mubr.f32.vlgmr.msra.gmra.mxu1 %v122_v55  ;;  %5876 = vst [vmem:[#allocation3_spill] sm:$0xff] %v4266_v52 }
  0xe9   :  { %2944 = vmatpush3.msra.mxu1 %v3836_v1  ;;  %2975 = vmatprep.mubr.msk.f32.mxu1 %vm3786_vm0, %v3785_v0 }
  0xea   :  { %2945 = vmatprep.subr.mxu1 %v3785_v0 }
  0xeb   :  { %2946 = vmatpush3.msra.mxu1 %v3841_v2 }
  0xec   :  { %2947 = vmatprep.subr.mxu1 %v3785_v0 }
  0xed   :  { %2948 = vmatpush3.msra.mxu1 %v3851_v3 }
  0xee   :  { %2949 = vmatprep.subr.mxu1 %v3785_v0 }
  0xef   :  { %2950 = vmatpush3.msra.mxu1 %v3860_v4 }
  0xf0   :  { %2951 = vmatprep.subr.mxu1 %v3785_v0 }
  0xf1   :  { %2952 = vmatpush3.msra.mxu1 %v3872_v6 }
  0xf2   :  { %2953 = vmatprep.subr.mxu1 %v3785_v0 }
  0xf3   :  { %2954 = vmatpush3.msra.mxu1 %v3891_v9 }
  0xf4   :  { %2955 = vmatprep.subr.mxu1 %v3785_v0 }
  0xf5   :  { %2956 = vmatpush3.msra.mxu1 %v3905_v11 }
  0xf6   :  { %2957 = vmatprep.subr.mxu1 %v3785_v0 }
  0xf7   :  { %2958 = vmatpush3.msra.mxu1 %v3919_v13 }
  0xf8   :  { %2959 = vmatprep.subr.mxu1 %v3785_v0 }
  0xf9   :  { %2960 = vmatpush3.msra.mxu1 %v3933_v15 }
  0xfa   :  { %2961 = vmatprep.subr.mxu1 %v3785_v0 }
  0xfb   :  { %2962 = vmatpush3.msra.mxu1 %v3947_v17 }
  0xfc   :  { %2963 = vmatprep.subr.mxu1 %v3785_v0 }
  0xfd   :  { %2964 = vmatpush3.msra.mxu1 %v3961_v19 }
  0xfe   :  { %2965 = vmatprep.subr.mxu1 %v3785_v0 }
  0xff   :  { %2966 = vmatpush3.msra.mxu1 %v3975_v21 }
 0x100   :  { %2967 = vmatprep.subr.mxu1 %v3785_v0 }
 0x101   :  { %2968 = vmatpush3.msra.mxu1 %v3989_v23 }
 0x102   :  { %2969 = vmatprep.subr.mxu1 %v3785_v0 }
 0x103   :  { %2970 = vmatpush3.msra.mxu1 %v4003_v25 }
 0x104   :  { %2971 = vmatprep.subr.mxu1 %v3785_v0 }
 0x105   :  { %2972 = vmatpush3.msra.mxu1 %v4017_v27 }
 0x106   :  { %2973 = vmatprep.subr.mxu1 %v3785_v0 }
 0x107   :  { %2974 = vmatpush3.msra.mxu1 %v4026_v28 }
 0x108   :  { %3013 = vmatprep.subr.mxu1 %v3785_v0 }
 0x1a8   :  { %v209_v62 = vpop.f32.mrf.mxu1 }
 0x1a9   :  { %v210_v63 = vadd.f32 %v209_v62, %v4227_v61 }
 0x1aa   :  { %v2907_v29 = vpop.f32.mrf.mxu1 }
 0x1ab   :  { %v213_v46 = vmul.f32 0.01, %v210_v63 }
 0x1ad   :  { %v214_v48 = vmax.f32 %v210_v63, %v213_v46 }
 0x1af   :  { %2941 = vmatmul.mubr.f32.vlgmr.msra.gmra.mxu0 %v214_v48  ;;  %v4309_v48 = vld [vmem:[%s5788_s5 + $0x78] sm:$0xff] }
 0x1b0   :  { %2979 = vmatpush3.msra.mxu0 %v3866_v5  ;;  %3010 = vmatprep.mubr.msk.f32.mxu0 %vm3786_vm0, %v3785_v0 }
 0x1b1   :  { %2980 = vmatprep.subr.mxu0 %v3785_v0 }
 0x1b2   :  { %2981 = vmatpush3.msra.mxu0 %v3878_v7 }
 0x1b3   :  { %2982 = vmatprep.subr.mxu0 %v3785_v0 }
 0x1b4   :  { %2983 = vmatpush3.msra.mxu0 %v3885_v8 }
 0x1b5   :  { %2984 = vmatprep.subr.mxu0 %v3785_v0 }
 0x1b6   :  { %2985 = vmatpush3.msra.mxu0 %v3899_v10 }
 0x1b7   :  { %2986 = vmatprep.subr.mxu0 %v3785_v0 }
 0x1b8   :  { %2987 = vmatpush3.msra.mxu0 %v3913_v12 }
 0x1b9   :  { %2988 = vmatprep.subr.mxu0 %v3785_v0 }
 0x1ba   :  { %2989 = vmatpush3.msra.mxu0 %v3927_v14 }
 0x1bb   :  { %2990 = vmatprep.subr.mxu0 %v3785_v0 }
 0x1bc   :  { %2991 = vmatpush3.msra.mxu0 %v3941_v16 }
 0x1bd   :  { %2992 = vmatprep.subr.mxu0 %v3785_v0 }
 0x1be   :  { %2993 = vmatpush3.msra.mxu0 %v3955_v18 }
 0x1bf   :  { %2994 = vmatprep.subr.mxu0 %v3785_v0 }
 0x1c0   :  { %2995 = vmatpush3.msra.mxu0 %v3969_v20 }
 0x1c1   :  { %2996 = vmatprep.subr.mxu0 %v3785_v0 }
 0x1c2   :  { %2997 = vmatpush3.msra.mxu0 %v3983_v22 }
 0x1c3   :  { %2998 = vmatprep.subr.mxu0 %v3785_v0 }
 0x1c4   :  { %2999 = vmatpush3.msra.mxu0 %v3997_v24 }
 0x1c5   :  { %3000 = vmatprep.subr.mxu0 %v3785_v0 }
 0x1c6   :  { %3001 = vmatpush3.msra.mxu0 %v4011_v26 }
 0x1c7   :  { %3002 = vmatprep.subr.mxu0 %v3785_v0 }
 0x1c8   :  { %3003 = vmatpush3.msra.mxu0 %v4042_v30 }
 0x1c9   :  { %3004 = vmatprep.subr.mxu0 %v3785_v0 }
 0x1ca   :  { %3005 = vmatpush3.msra.mxu0 %v4049_v31 }
 0x1cb   :  { %3006 = vmatprep.subr.mxu0 %v3785_v0 }
 0x1cc   :  { %3007 = vmatpush3.msra.mxu0 %v4056_v32 }
 0x1cd   :  { %3008 = vmatprep.subr.mxu0 %v3785_v0 }
 0x1ce   :  { %3009 = vmatpush3.msra.mxu0 %v4063_v33 }
 0x1cf   :  { %3048 = vmatprep.subr.mxu0 %v3785_v0 }
 0x26f   :  { %v301_v53 = vpop.f32.mrf.mxu0 }
 0x270   :  { %v302_v54 = vadd.f32 %v301_v53, %v4266_v52  ;;  %v4321_v53 = vld [vmem:[%s5788_s5 + $0x68] sm:$0xff] }
 0x271   :  { %v2942_v55 = vpop.f32.mrf.mxu0 }
 0x272   :  { %2976 = vmatmul.mubr.f32.vlgmr.msra.gmra.mxu1 %v302_v54  ;;  %v4328_v54 = vld [vmem:[%s5788_s5 + $0x60] sm:$0xff]  ;;  %v4335_v55 = vld [vmem:[%s5788_s5 + $0x58] sm:$0xff] }
 0x273   :  { %3014 = vmatpush3.msra.mxu1 %v4070_v34  ;;  %3045 = vmatprep.mubr.msk.f32.mxu1 %vm3786_vm0, %v3785_v0  ;;  %5877 = vst [vmem:[#allocation4_spill] sm:$0xff] %v4328_v54  ;;  %5878 = vst [vmem:[#allocation5_spill] sm:$0xff] %v4335_v55 }
 0x274   :  { %3015 = vmatprep.subr.mxu1 %v3785_v0 }
 0x275   :  { %3016 = vmatpush3.msra.mxu1 %v4075_v35 }
 0x276   :  { %3017 = vmatprep.subr.mxu1 %v3785_v0 }
 0x277   :  { %3018 = vmatpush3.msra.mxu1 %v4082_v36 }
 0x278   :  { %3019 = vmatprep.subr.mxu1 %v3785_v0 }
 0x279   :  { %3020 = vmatpush3.msra.mxu1 %v4089_v37 }
 0x27a   :  { %3021 = vmatprep.subr.mxu1 %v3785_v0 }
 0x27b   :  { %3022 = vmatpush3.msra.mxu1 %v4096_v38 }
 0x27c   :  { %3023 = vmatprep.subr.mxu1 %v3785_v0 }
 0x27d   :  { %3024 = vmatpush3.msra.mxu1 %v4103_v39 }
 0x27e   :  { %3025 = vmatprep.subr.mxu1 %v3785_v0 }
 0x27f   :  { %3026 = vmatpush3.msra.mxu1 %v4110_v40 }
 0x280   :  { %3027 = vmatprep.subr.mxu1 %v3785_v0 }
 0x281   :  { %3028 = vmatpush3.msra.mxu1 %v4117_v41 }
 0x282   :  { %3029 = vmatprep.subr.mxu1 %v3785_v0 }
 0x283   :  { %3030 = vmatpush3.msra.mxu1 %v4124_v42 }
 0x284   :  { %3031 = vmatprep.subr.mxu1 %v3785_v0 }
 0x285   :  { %3032 = vmatpush3.msra.mxu1 %v4131_v43 }
 0x286   :  { %3033 = vmatprep.subr.mxu1 %v3785_v0 }
 0x287   :  { %3034 = vmatpush3.msra.mxu1 %v4138_v44 }
 0x288   :  { %3035 = vmatprep.subr.mxu1 %v3785_v0 }
 0x289   :  { %3036 = vmatpush3.msra.mxu1 %v4145_v45 }
 0x28a   :  { %3037 = vmatprep.subr.mxu1 %v3785_v0 }
 0x28b   :  { %3038 = vmatpush3.msra.mxu1 %v4200_v56 }
 0x28c   :  { %3039 = vmatprep.subr.mxu1 %v3785_v0 }
 0x28d   :  { %3040 = vmatpush3.msra.mxu1 %v4207_v57 }
 0x28e   :  { %3041 = vmatprep.subr.mxu1 %v3785_v0 }
 0x28f   :  { %3042 = vmatpush3.msra.mxu1 %v4214_v58 }
 0x290   :  { %3043 = vmatprep.subr.mxu1 %v3785_v0 }
 0x291   :  { %3044 = vmatpush3.msra.mxu1 %v4221_v59 }
 0x292   :  { %3083 = vmatprep.subr.mxu1 %v3785_v0 }
 0x332   :  { %v371_v60 = vpop.f32.mrf.mxu1 }
 0x333   :  { %v372_v62 = vadd.f32 %v371_v60, %v4160_v50  ;;  %v4342_v60 = vld [vmem:[%s5788_s5 + $0x50] sm:$0xff] }
 0x334   :  { %v2977_v63 = vpop.f32.mrf.mxu1  ;;  %5879 = vst [vmem:[#allocation6_spill] sm:$0xff] %v4342_v60 }
 0x335   :  { %v375_v29 = vmul.f32 0.01, %v372_v62  ;;  %v4356_v63 = vld [vmem:[%s5788_s5 + $0x40] sm:$0xff] }
 0x336   :  { %5881 = vst [vmem:[#allocation8_spill] sm:$0xff] %v4356_v63 }
 0x337   :  { %v376_v46 = vmax.f32 %v372_v62, %v375_v29  ;;  %v4349_v62 = vld [vmem:[%s5788_s5 + $0x48] sm:$0xff]  ;;  %v4363_v29 = vld [vmem:[%s5788_s5 + $0x38] sm:$0xff] }
 0x338   :  { %5880 = vst [vmem:[#allocation7_spill] sm:$0xff] %v4349_v62  ;;  %5882 = vst [vmem:[#allocation9_spill] sm:$0xff] %v4363_v29 }
 0x339   :  { %3011 = vmatmul.mubr.f32.vlgmr.msra.gmra.mxu0 %v376_v46  ;;  %v4370_v46 = vld [vmem:[%s5788_s5 + $0x30] sm:$0xff] }
 0x33a   :  { %3080 = vmatprep.mubr.msk.f32.mxu0 %vm3786_vm0, %v3785_v0  ;;  %3049 = vmatpush3.msra.mxu0 %v4309_v48  ;;  %5883 = vst [vmem:[#allocation10_spill] sm:$0xff] %v4370_v46 }
 0x33b   :  { %3050 = vmatprep.subr.mxu0 %v3785_v0 }
 0x33c   :  { %3051 = vmatpush3.msra.mxu0 %v4314_v51 }
 0x33d   :  { %3052 = vmatprep.subr.mxu0 %v3785_v0 }
 0x33e   :  { %3053 = vmatpush3.msra.mxu0 %v4321_v53 }
 0x33f   :  { %3054 = vmatprep.subr.mxu0 %v3785_v0 }
 0x340   :  { %3055 = vmatpush3.msra.mxu0 %v4328_v54 }
 0x341   :  { %3056 = vmatprep.subr.mxu0 %v3785_v0 }
 0x342   :  { %3057 = vmatpush3.msra.mxu0 %v4335_v55 }
 0x343   :  { %3058 = vmatprep.subr.mxu0 %v3785_v0 }
 0x344   :  { %3059 = vmatpush3.msra.mxu0 %v4342_v60 }
 0x345   :  { %3060 = vmatprep.subr.mxu0 %v3785_v0 }
 0x346   :  { %3061 = vmatpush3.msra.mxu0 %v4349_v62  ;;  %v4377_v62 = vld [vmem:[%s5788_s5 + $0x28] sm:$0xff] }
 0x347   :  { %3062 = vmatprep.subr.mxu0 %v3785_v0  ;;  %5884 = vst [vmem:[#allocation11_spill] sm:$0xff] %v4377_v62 }
 0x348   :  { %3063 = vmatpush3.msra.mxu0 %v4356_v63  ;;  %v4384_v63 = vld [vmem:[%s5788_s5 + $0x20] sm:$0xff] }
 0x349   :  { %3064 = vmatprep.subr.mxu0 %v3785_v0  ;;  %5885 = vst [vmem:[#allocation12_spill] sm:$0xff] %v4384_v63 }
 0x34a   :  { %3065 = vmatpush3.msra.mxu0 %v4363_v29  ;;  %v4391_v29 = vld [vmem:[%s5788_s5 + $0x18] sm:$0xff] }
 0x34b   :  { %3066 = vmatprep.subr.mxu0 %v3785_v0  ;;  %5886 = vst [vmem:[#allocation13_spill] sm:$0xff] %v4391_v29 }
 0x34c   :  { %3067 = vmatpush3.msra.mxu0 %v4370_v46  ;;  %v4398_v46 = vld [vmem:[%s5788_s5 + $0x10] sm:$0xff] }
 0x34d   :  { %3068 = vmatprep.subr.mxu0 %v3785_v0  ;;  %5887 = vst [vmem:[#allocation14_spill] sm:$0xff] %v4398_v46 }
 0x34e   :  { %3069 = vmatpush3.msra.mxu0 %v4377_v62 }
 0x34f   :  { %3070 = vmatprep.subr.mxu0 %v3785_v0 }
 0x350   :  { %3071 = vmatpush3.msra.mxu0 %v4384_v63 }
 0x351   :  { %3072 = vmatprep.subr.mxu0 %v3785_v0 }
 0x352   :  { %3073 = vmatpush3.msra.mxu0 %v4391_v29  ;;  %v4410_v29 = vld [vmem:[%s5788_s5 + $0x8] sm:$0xff] }
 0x353   :  { %3074 = vmatprep.subr.mxu0 %v3785_v0  ;;  %5888 = vst [vmem:[#allocation15_spill] sm:$0xff] %v4410_v29 }
 0x354   :  { %3075 = vmatpush3.msra.mxu0 %v4398_v46 }
 0x355   :  { %3076 = vmatprep.subr.mxu0 %v3785_v0 }
 0x356   :  { %3077 = vmatpush3.msra.mxu0 %v4410_v29 }
 0x357   :  { %3078 = vmatprep.subr.mxu0 %v3785_v0 }
 0x3f9   :  { %v443_v62 = vpop.f32.mrf.mxu0 }
 0x3fa   :  { %v444_v60 = vadd.f32 %v443_v62, %v4227_v61  ;;  %v4417_v62 = vld [vmem:[%s5788_s5] sm:$0xff] }
 0x3fb   :  { %v3012_v55 = vpop.f32.mrf.mxu0  ;;  %5889 = vst [vmem:[#allocation16_spill] sm:$0xff] %v4417_v62  ;;  %3079 = vmatpush3.msra.mxu0 %v4417_v62 }
 0x3fc   :  { %v447_v63 = vmul.f32 0.01, %v444_v60  ;;  %3118 = vmatprep.subr.mxu0 %v3785_v0  ;;  %v4429_v55 = vld [vmem:[%s5789_s6 + $0x70] sm:$0xff] }
 0x3fd   :  { %5891 = vst [vmem:[#allocation18_spill] sm:$0xff] %v4429_v55 }
 0x3fe   :  { %v448_v54 = vmax.f32 %v444_v60, %v447_v63  ;;  %v4436_v60 = vld [vmem:[%s5789_s6 + $0x68] sm:$0xff]  ;;  %v4443_v63 = vld [vmem:[%s5789_s6 + $0x60] sm:$0xff] }
 0x3ff   :  { %5892 = vst [vmem:[#allocation19_spill] sm:$0xff] %v4436_v60  ;;  %5893 = vst [vmem:[#allocation20_spill] sm:$0xff] %v4443_v63 }
 0x400   :  { %3046 = vmatmul.mubr.f32.vlgmr.msra.gmra.mxu1 %v448_v54  ;;  %v4424_v54 = vld [vmem:[%s5789_s6 + $0x78] sm:$0xff] }
 0x401   :  { %3115 = vmatprep.mubr.msk.f32.mxu1 %vm3786_vm0, %v3785_v0  ;;  %5890 = vst [vmem:[#allocation17_spill] sm:$0xff] %v4424_v54  ;;  %3084 = vmatpush3.msra.mxu1 %v4424_v54  ;;  %v4450_v54 = vld [vmem:[%s5789_s6 + $0x58] sm:$0xff] }
 0x402   :  { %3085 = vmatprep.subr.mxu1 %v3785_v0  ;;  %5894 = vst [vmem:[#allocation21_spill] sm:$0xff] %v4450_v54 }
 0x403   :  { %3086 = vmatpush3.msra.mxu1 %v4429_v55  ;;  %v4457_v55 = vld [vmem:[%s5789_s6 + $0x50] sm:$0xff] }
 0x404   :  { %3087 = vmatprep.subr.mxu1 %v3785_v0  ;;  %5895 = vst [vmem:[#allocation22_spill] sm:$0xff] %v4457_v55 }
 0x405   :  { %3088 = vmatpush3.msra.mxu1 %v4436_v60  ;;  %v4464_v60 = vld [vmem:[%s5789_s6 + $0x48] sm:$0xff] }
 0x406   :  { %3089 = vmatprep.subr.mxu1 %v3785_v0  ;;  %5896 = vst [vmem:[#allocation23_spill] sm:$0xff] %v4464_v60 }
 0x407   :  { %3090 = vmatpush3.msra.mxu1 %v4443_v63  ;;  %v4471_v63 = vld [vmem:[%s5789_s6 + $0x40] sm:$0xff] }
 0x408   :  { %3091 = vmatprep.subr.mxu1 %v3785_v0  ;;  %5897 = vst [vmem:[#allocation24_spill] sm:$0xff] %v4471_v63 }
 0x409   :  { %3092 = vmatpush3.msra.mxu1 %v4450_v54  ;;  %v4478_v54 = vld [vmem:[%s5789_s6 + $0x38] sm:$0xff] }
 0x40a   :  { %3093 = vmatprep.subr.mxu1 %v3785_v0  ;;  %5898 = vst [vmem:[#allocation25_spill] sm:$0xff] %v4478_v54 }
 0x40b   :  { %3094 = vmatpush3.msra.mxu1 %v4457_v55  ;;  %v4485_v55 = vld [vmem:[%s5789_s6 + $0x30] sm:$0xff] }
 0x40c   :  { %3095 = vmatprep.subr.mxu1 %v3785_v0  ;;  %5899 = vst [vmem:[#allocation26_spill] sm:$0xff] %v4485_v55 }
 0x40d   :  { %3096 = vmatpush3.msra.mxu1 %v4464_v60  ;;  %v4492_v60 = vld [vmem:[%s5789_s6 + $0x28] sm:$0xff] }
 0x40e   :  { %3097 = vmatprep.subr.mxu1 %v3785_v0  ;;  %5900 = vst [vmem:[#allocation27_spill] sm:$0xff] %v4492_v60 }
 0x40f   :  { %3098 = vmatpush3.msra.mxu1 %v4471_v63  ;;  %v4499_v63 = vld [vmem:[%s5789_s6 + $0x20] sm:$0xff] }
 0x410   :  { %3099 = vmatprep.subr.mxu1 %v3785_v0  ;;  %5901 = vst [vmem:[#allocation28_spill] sm:$0xff] %v4499_v63 }
 0x411   :  { %3100 = vmatpush3.msra.mxu1 %v4478_v54 }
 0x412   :  { %3101 = vmatprep.subr.mxu1 %v3785_v0 }
 0x413   :  { %3102 = vmatpush3.msra.mxu1 %v4485_v55  ;;  %v4511_v55 = vld [vmem:[%s5789_s6 + $0x18] sm:$0xff] }
 0x414   :  { %3103 = vmatprep.subr.mxu1 %v3785_v0  ;;  %5902 = vst [vmem:[#allocation29_spill] sm:$0xff] %v4511_v55 }
 0x415   :  { %3104 = vmatpush3.msra.mxu1 %v4492_v60 }
 0x416   :  { %3105 = vmatprep.subr.mxu1 %v3785_v0 }
 0x417   :  { %3106 = vmatpush3.msra.mxu1 %v4499_v63  ;;  %v4518_v63 = vld [vmem:[%s5789_s6 + $0x10] sm:$0xff] }
 0x418   :  { %3107 = vmatprep.subr.mxu1 %v3785_v0  ;;  %5903 = vst [vmem:[#allocation30_spill] sm:$0xff] %v4518_v63 }
 0x419   :  { %3108 = vmatpush3.msra.mxu1 %v4511_v55 }
 0x41a   :  { %3109 = vmatprep.subr.mxu1 %v3785_v0 }
 0x41b   :  { %3110 = vmatpush3.msra.mxu1 %v4518_v63 }
 0x41c   :  { %3111 = vmatprep.subr.mxu1 %v3785_v0 }
 0x4c0   :  { %v515_v54 = vpop.f32.mrf.mxu1 }
 0x4c1   :  { %v516_v61 = vadd.f32 %v515_v54, %v4266_v52  ;;  %v4539_v54 = vld [vmem:[%s5790_s7 + $0x78] sm:$0xff]  ;;  %v4544_v52 = vld [vmem:[%s5790_s7 + $0x70] sm:$0xff] }
 0x4c2   :  { %v3047_v62 = vpop.f32.mrf.mxu1  ;;  %5906 = vst [vmem:[#allocation33_spill] sm:$0xff] %v4539_v54  ;;  %5907 = vst [vmem:[#allocation34_spill] sm:$0xff] %v4544_v52 }
 0x4c3   :  { %3081 = vmatmul.mubr.f32.vlgmr.msra.gmra.mxu0 %v516_v61  ;;  %v4525_v61 = vld [vmem:[%s5789_s6 + $0x8] sm:$0xff]  ;;  %v4532_v62 = vld [vmem:[%s5789_s6] sm:$0xff] }
 0x4c4   :  { %3150 = vmatprep.mubr.msk.f32.mxu0 %vm3786_vm0, %v3785_v0  ;;  %5904 = vst [vmem:[#allocation31_spill] sm:$0xff] %v4525_v61  ;;  %3112 = vmatpush3.msra.mxu1 %v4525_v61  ;;  %5905 = vst [vmem:[#allocation32_spill] sm:$0xff] %v4532_v62  ;;  %v4558_v61 = vld [vmem:[%s5790_s7 + $0x60] sm:$0xff] }
 0x4c5   :  { %3113 = vmatprep.subr.mxu1 %v3785_v0  ;;  %3119 = vmatpush3.msra.mxu0 %v4539_v54  ;;  %5909 = vst [vmem:[#allocation36_spill] sm:$0xff] %v4558_v61  ;;  %v4565_v54 = vld [vmem:[%s5790_s7 + $0x58] sm:$0xff] }
 0x4c6   :  { %3114 = vmatpush3.msra.mxu1 %v4532_v62  ;;  %3120 = vmatprep.subr.mxu0 %v3785_v0  ;;  %v4551_v62 = vld [vmem:[%s5790_s7 + $0x68] sm:$0xff]  ;;  %5910 = vst [vmem:[#allocation37_spill] sm:$0xff] %v4565_v54 }
 0x4c7   :  { %3153 = vmatprep.subr.mxu1 %v3785_v0  ;;  %5908 = vst [vmem:[#allocation35_spill] sm:$0xff] %v4551_v62  ;;  %3121 = vmatpush3.msra.mxu0 %v4544_v52  ;;  %v4572_v52 = vld [vmem:[%s5790_s7 + $0x50] sm:$0xff] }
 0x4c8   :  { %3122 = vmatprep.subr.mxu0 %v3785_v0  ;;  %5911 = vst [vmem:[#allocation38_spill] sm:$0xff] %v4572_v52 }
 0x4c9   :  { %3123 = vmatpush3.msra.mxu0 %v4551_v62  ;;  %v4579_v62 = vld [vmem:[%s5790_s7 + $0x48] sm:$0xff] }
 0x4ca   :  { %3124 = vmatprep.subr.mxu0 %v3785_v0  ;;  %5912 = vst [vmem:[#allocation39_spill] sm:$0xff] %v4579_v62 }
 0x4cb   :  { %3125 = vmatpush3.msra.mxu0 %v4558_v61  ;;  %v4586_v61 = vld [vmem:[%s5790_s7 + $0x40] sm:$0xff] }
 0x4cc   :  { %3126 = vmatprep.subr.mxu0 %v3785_v0  ;;  %5913 = vst [vmem:[#allocation40_spill] sm:$0xff] %v4586_v61 }
 0x4cd   :  { %3127 = vmatpush3.msra.mxu0 %v4565_v54  ;;  %v4593_v54 = vld [vmem:[%s5790_s7 + $0x38] sm:$0xff] }
 0x4ce   :  { %3128 = vmatprep.subr.mxu0 %v3785_v0  ;;  %5914 = vst [vmem:[#allocation41_spill] sm:$0xff] %v4593_v54 }
 0x4cf   :  { %3129 = vmatpush3.msra.mxu0 %v4572_v52  ;;  %v4600_v52 = vld [vmem:[%s5790_s7 + $0x30] sm:$0xff] }
 0x4d0   :  { %3130 = vmatprep.subr.mxu0 %v3785_v0  ;;  %5915 = vst [vmem:[#allocation42_spill] sm:$0xff] %v4600_v52 }
 0x4d1   :  { %3131 = vmatpush3.msra.mxu0 %v4579_v62  ;;  %v4607_v62 = vld [vmem:[%s5790_s7 + $0x28] sm:$0xff] }
 0x4d2   :  { %3132 = vmatprep.subr.mxu0 %v3785_v0 }
 0x4d3   :  { %3133 = vmatpush3.msra.mxu0 %v4586_v61  ;;  %v4614_v61 = vld [vmem:[%s5790_s7 + $0x20] sm:$0xff] }
 0x4d4   :  { %3134 = vmatprep.subr.mxu0 %v3785_v0 }
 0x4d5   :  { %3135 = vmatpush3.msra.mxu0 %v4593_v54  ;;  %v537_v54 = vsub.s32 3, %v4151_v47 }
 0x4d6   :  { %3136 = vmatprep.subr.mxu0 %v3785_v0 }
 0x4d7   :  { %3137 = vmatpush3.msra.mxu0 %v4600_v52  ;;  %v4622_v63 = vrot.slane %v4157_v49, %v537_v54 }
 0x4d8   :  { %3138 = vmatprep.subr.mxu0 %v3785_v0 }
 0x4d9   :  { %3139 = vmatpush3.msra.mxu0 %v4607_v62 }
 0x4da   :  { %3140 = vmatprep.subr.mxu0 %v3785_v0 }
 0x4db   :  { %3141 = vmatpush3.msra.mxu0 %v4614_v61 }
 0x4dc   :  { %3142 = vmatprep.subr.mxu0 %v3785_v0 }
 0x583   :  { %v605_v52 = vpop.f32.mrf.mxu0 }
 0x584   :  { %v606_v55 = vadd.f32 %v605_v52, %v4622_v63  ;;  %v5940_v52 = vld [vmem:[#allocation27_spill] sm:$0xff] }
 0x585   :  { %v3082_v60 = vpop.f32.mrf.mxu0 }
 0x586   :  { %v609_v29 = vmul.f32 0.01, %v606_v55  ;;  %v5946_v60 = vld [vmem:[#allocation3_spill] sm:$0xff] }
 0x588   :  { %v610_v46 = vmax.f32 %v606_v55, %v609_v29  ;;  %v5944_v29 = vld [vmem:[#allocation31_spill] sm:$0xff] }
 0x58a   :  { %3116 = vmatmul.mubr.f32.vlgmr.msra.gmra.mxu1 %v610_v46  ;;  %v5945_v46 = vld [vmem:[#allocation32_spill] sm:$0xff] }
 0x58b   :  { %3154 = vmatpush3.msra.mxu1 %v3836_v1  ;;  %3185 = vmatprep.mubr.msk.f32.mxu1 %vm3786_vm0, %v3785_v0  ;;  %v4662_v1 = vld [vmem:[%s5790_s7 + $0x18] sm:$0xff] }
 0x58c   :  { %3155 = vmatprep.subr.mxu1 %v3785_v0  ;;  %3143 = vmatpush3.msra.mxu0 %v4662_v1 }
 0x58d   :  { %3156 = vmatpush3.msra.mxu1 %v3841_v2  ;;  %3144 = vmatprep.subr.mxu0 %v3785_v0  ;;  %v4669_v2 = vld [vmem:[%s5790_s7 + $0x10] sm:$0xff] }
 0x58e   :  { %3157 = vmatprep.subr.mxu1 %v3785_v0  ;;  %3145 = vmatpush3.msra.mxu0 %v4669_v2 }
 0x58f   :  { %3158 = vmatpush3.msra.mxu1 %v3851_v3  ;;  %3146 = vmatprep.subr.mxu0 %v3785_v0  ;;  %v4676_v3 = vld [vmem:[%s5790_s7 + $0x8] sm:$0xff] }
 0x590   :  { %3159 = vmatprep.subr.mxu1 %v3785_v0  ;;  %3147 = vmatpush3.msra.mxu0 %v4676_v3 }
 0x591   :  { %3160 = vmatpush3.msra.mxu1 %v3860_v4  ;;  %3148 = vmatprep.subr.mxu0 %v3785_v0  ;;  %v4683_v4 = vld [vmem:[%s5790_s7] sm:$0xff] }
 0x592   :  { %3161 = vmatprep.subr.mxu1 %v3785_v0  ;;  %3149 = vmatpush3.msra.mxu0 %v4683_v4 }
 0x593   :  { %3162 = vmatpush3.msra.mxu1 %v3872_v6  ;;  %3188 = vmatprep.subr.mxu0 %v3785_v0  ;;  %v629_v6 = vsub.s32 4, %v4151_v47 }
 0x594   :  { %3163 = vmatprep.subr.mxu1 %v3785_v0 }
 0x595   :  { %3164 = vmatpush3.msra.mxu1 %v3891_v9  ;;  %v4689_v9 = vrot.slane %v4157_v49, %v629_v6 }
 0x596   :  { %3165 = vmatprep.subr.mxu1 %v3785_v0 }
 0x597   :  { %3166 = vmatpush3.msra.mxu1 %v3905_v11 }
 0x598   :  { %3167 = vmatprep.subr.mxu1 %v3785_v0 }
 0x599   :  { %3168 = vmatpush3.msra.mxu1 %v3919_v13 }
 0x59a   :  { %3169 = vmatprep.subr.mxu1 %v3785_v0 }
 0x59b   :  { %3170 = vmatpush3.msra.mxu1 %v3933_v15 }
 0x59c   :  { %3171 = vmatprep.subr.mxu1 %v3785_v0 }
 0x59d   :  { %3172 = vmatpush3.msra.mxu1 %v3947_v17 }
 0x59e   :  { %3173 = vmatprep.subr.mxu1 %v3785_v0 }
 0x59f   :  { %3174 = vmatpush3.msra.mxu1 %v3961_v19 }
 0x5a0   :  { %3175 = vmatprep.subr.mxu1 %v3785_v0 }
 0x5a1   :  { %3176 = vmatpush3.msra.mxu1 %v3975_v21 }
 0x5a2   :  { %3177 = vmatprep.subr.mxu1 %v3785_v0 }
 0x5a3   :  { %3178 = vmatpush3.msra.mxu1 %v3989_v23  ;;  %v5917_v23 = vld [vmem:[#allocation5_spill] sm:$0xff] }
 0x5a4   :  { %3179 = vmatprep.subr.mxu1 %v3785_v0 }
 0x5a5   :  { %3180 = vmatpush3.msra.mxu1 %v4003_v25  ;;  %v5919_v25 = vld [vmem:[#allocation7_spill] sm:$0xff] }
 0x5a6   :  { %3181 = vmatprep.subr.mxu1 %v3785_v0 }
 0x5a7   :  { %3182 = vmatpush3.msra.mxu1 %v4017_v27  ;;  %v5921_v27 = vld [vmem:[#allocation9_spill] sm:$0xff] }
 0x5a8   :  { %3183 = vmatprep.subr.mxu1 %v3785_v0 }
 0x5a9   :  { %3184 = vmatpush3.msra.mxu1 %v4026_v28  ;;  %v5922_v28 = vld [vmem:[#allocation10_spill] sm:$0xff] }
 0x5aa   :  { %3223 = vmatprep.subr.mxu1 %v3785_v0 }
 0x64a   :  { %v697_v11 = vpop.f32.mrf.mxu1 }
 0x64b   :  { %v698_v13 = vadd.f32 %v697_v11, %v4689_v9  ;;  %v5947_v11 = vld [vmem:[#allocation33_spill] sm:$0xff] }
 0x64c   :  { %v3117_v15 = vpop.f32.mrf.mxu1 }
 0x64d   :  { %v701_v17 = vmul.f32 0.01, %v698_v13  ;;  %v5949_v15 = vld [vmem:[#allocation35_spill] sm:$0xff] }
 0x64f   :  { %v702_v19 = vmax.f32 %v698_v13, %v701_v17  ;;  %v5948_v13 = vld [vmem:[#allocation34_spill] sm:$0xff]  ;;  %v5950_v17 = vld [vmem:[#allocation36_spill] sm:$0xff] }
 0x651   :  { %3151 = vmatmul.mubr.f32.vlgmr.msra.gmra.mxu0 %v702_v19  ;;  %v5951_v19 = vld [vmem:[#allocation37_spill] sm:$0xff] }
 0x652   :  { %3189 = vmatpush3.msra.mxu0 %v3866_v5  ;;  %3220 = vmatprep.mubr.msk.f32.mxu0 %vm3786_vm0, %v3785_v0  ;;  %v721_v5 = vsub.s32 5, %v4151_v47  ;;  %v5934_v47 = vld [vmem:[#allocation21_spill] sm:$0xff] }
 0x653   :  { %3190 = vmatprep.subr.mxu0 %v3785_v0 }
 0x654   :  { %3191 = vmatpush3.msra.mxu0 %v3878_v7  ;;  %v4728_v7 = vrot.slane %v4157_v49, %v721_v5  ;;  %v5935_v49 = vld [vmem:[#allocation22_spill] sm:$0xff] }
 0x655   :  { %3192 = vmatprep.subr.mxu0 %v3785_v0  ;;  %v5952_v5 = vld [vmem:[#allocation38_spill] sm:$0xff] }
 0x656   :  { %3193 = vmatpush3.msra.mxu0 %v3885_v8 }
 0x657   :  { %3194 = vmatprep.subr.mxu0 %v3785_v0 }
 0x658   :  { %3195 = vmatpush3.msra.mxu0 %v3899_v10 }
 0x659   :  { %3196 = vmatprep.subr.mxu0 %v3785_v0 }
 0x65a   :  { %3197 = vmatpush3.msra.mxu0 %v3913_v12 }
 0x65b   :  { %3198 = vmatprep.subr.mxu0 %v3785_v0 }
 0x65c   :  { %3199 = vmatpush3.msra.mxu0 %v3927_v14 }
 0x65d   :  { %3200 = vmatprep.subr.mxu0 %v3785_v0 }
 0x65e   :  { %3201 = vmatpush3.msra.mxu0 %v3941_v16 }
 0x65f   :  { %3202 = vmatprep.subr.mxu0 %v3785_v0 }
 0x660   :  { %3203 = vmatpush3.msra.mxu0 %v3955_v18 }
 0x661   :  { %3204 = vmatprep.subr.mxu0 %v3785_v0 }
 0x662   :  { %3205 = vmatpush3.msra.mxu0 %v3969_v20 }
 0x663   :  { %3206 = vmatprep.subr.mxu0 %v3785_v0 }
 0x664   :  { %3207 = vmatpush3.msra.mxu0 %v3983_v22  ;;  %v5916_v22 = vld [vmem:[#allocation4_spill] sm:$0xff] }
 0x665   :  { %3208 = vmatprep.subr.mxu0 %v3785_v0 }
 0x666   :  { %3209 = vmatpush3.msra.mxu0 %v3997_v24  ;;  %v5918_v24 = vld [vmem:[#allocation6_spill] sm:$0xff] }
 0x667   :  { %3210 = vmatprep.subr.mxu0 %v3785_v0 }
 0x668   :  { %3211 = vmatpush3.msra.mxu0 %v4011_v26  ;;  %v5920_v26 = vld [vmem:[#allocation8_spill] sm:$0xff] }
 0x669   :  { %3212 = vmatprep.subr.mxu0 %v3785_v0 }
 0x66a   :  { %3213 = vmatpush3.msra.mxu0 %v4042_v30  ;;  %v5923_v30 = vld [vmem:[#allocation11_spill] sm:$0xff] }
 0x66b   :  { %3214 = vmatprep.subr.mxu0 %v3785_v0 }
 0x66c   :  { %3215 = vmatpush3.msra.mxu0 %v4049_v31  ;;  %v5924_v31 = vld [vmem:[#allocation12_spill] sm:$0xff] }
 0x66d   :  { %3216 = vmatprep.subr.mxu0 %v3785_v0 }
 0x66e   :  { %3217 = vmatpush3.msra.mxu0 %v4056_v32  ;;  %v5925_v32 = vld [vmem:[#allocation13_spill] sm:$0xff] }
 0x66f   :  { %3218 = vmatprep.subr.mxu0 %v3785_v0 }
 0x670   :  { %3219 = vmatpush3.msra.mxu0 %v4063_v33  ;;  %v5926_v33 = vld [vmem:[#allocation14_spill] sm:$0xff] }
 0x671   :  { %3258 = vmatprep.subr.mxu0 %v3785_v0 }
 0x711   :  { %v789_v8 = vpop.f32.mrf.mxu0 }
 0x712   :  { %v790_v10 = vadd.f32 %v789_v8, %v4728_v7  ;;  %v5953_v8 = vld [vmem:[#allocation39_spill] sm:$0xff] }
 0x713   :  { %v3152_v12 = vpop.f32.mrf.mxu0 }
 0x714   :  { %793 = vst [vmem:[%s5791_s8] sm:$0xff] %v790_v10  ;;  %3186 = vmatmul.mubr.f32.vlgmr.msra.gmra.mxu1 %v790_v10  ;;  %v5954_v10 = vld [vmem:[#allocation40_spill] sm:$0xff]  ;;  %v5955_v12 = vld [vmem:[#allocation41_spill] sm:$0xff] }
 0x715   :  { %3224 = vmatpush3.msra.mxu1 %v4070_v34  ;;  %3255 = vmatprep.mubr.msk.f32.mxu1 %vm3786_vm0, %v3785_v0  ;;  %v5927_v34 = vld [vmem:[#allocation15_spill] sm:$0xff] }
 0x716   :  { %3225 = vmatprep.subr.mxu1 %v3785_v0 }
 0x717   :  { %3226 = vmatpush3.msra.mxu1 %v4075_v35  ;;  %v5928_v35 = vld [vmem:[#allocation16_spill] sm:$0xff] }
 0x718   :  { %3227 = vmatprep.subr.mxu1 %v3785_v0 }
 0x719   :  { %3228 = vmatpush3.msra.mxu1 %v4082_v36 }
 0x71a   :  { %3229 = vmatprep.subr.mxu1 %v3785_v0 }
 0x71b   :  { %3230 = vmatpush3.msra.mxu1 %v4089_v37  ;;  %v5929_v37 = vld [vmem:[#allocation2_spill] sm:$0xff] }
 0x71c   :  { %3231 = vmatprep.subr.mxu1 %v3785_v0 }
 0x71d   :  { %3232 = vmatpush3.msra.mxu1 %v4096_v38 }
 0x71e   :  { %3233 = vmatprep.subr.mxu1 %v3785_v0 }
 0x71f   :  { %3234 = vmatpush3.msra.mxu1 %v4103_v39 }
 0x720   :  { %3235 = vmatprep.subr.mxu1 %v3785_v0 }
 0x721   :  { %3236 = vmatpush3.msra.mxu1 %v4110_v40 }
 0x722   :  { %3237 = vmatprep.subr.mxu1 %v3785_v0 }
 0x723   :  { %3238 = vmatpush3.msra.mxu1 %v4117_v41 }
 0x724   :  { %3239 = vmatprep.subr.mxu1 %v3785_v0 }
 0x725   :  { %3240 = vmatpush3.msra.mxu1 %v4124_v42  ;;  %v5930_v42 = vld [vmem:[#allocation17_spill] sm:$0xff] }
 0x726   :  { %3241 = vmatprep.subr.mxu1 %v3785_v0 }
 0x727   :  { %3242 = vmatpush3.msra.mxu1 %v4131_v43  ;;  %v5931_v43 = vld [vmem:[#allocation18_spill] sm:$0xff] }
 0x728   :  { %3243 = vmatprep.subr.mxu1 %v3785_v0 }
 0x729   :  { %3244 = vmatpush3.msra.mxu1 %v4138_v44  ;;  %v5932_v44 = vld [vmem:[#allocation19_spill] sm:$0xff] }
 0x72a   :  { %3245 = vmatprep.subr.mxu1 %v3785_v0 }
 0x72b   :  { %3246 = vmatpush3.msra.mxu1 %v4145_v45  ;;  %v5933_v45 = vld [vmem:[#allocation20_spill] sm:$0xff] }
 0x72c   :  { %3247 = vmatprep.subr.mxu1 %v3785_v0 }
 0x72d   :  { %3248 = vmatpush3.msra.mxu1 %v4200_v56  ;;  %v5936_v56 = vld [vmem:[#allocation23_spill] sm:$0xff] }
 0x72e   :  { %3249 = vmatprep.subr.mxu1 %v3785_v0 }
 0x72f   :  { %3250 = vmatpush3.msra.mxu1 %v4207_v57  ;;  %v5937_v57 = vld [vmem:[#allocation24_spill] sm:$0xff] }
 0x730   :  { %3251 = vmatprep.subr.mxu1 %v3785_v0 }
 0x731   :  { %3252 = vmatpush3.msra.mxu1 %v4214_v58  ;;  %v5938_v58 = vld [vmem:[#allocation25_spill] sm:$0xff] }
 0x732   :  { %3253 = vmatprep.subr.mxu1 %v3785_v0 }
 0x733   :  { %3254 = vmatpush3.msra.mxu1 %v4221_v59  ;;  %v5939_v59 = vld [vmem:[#allocation26_spill] sm:$0xff] }
 0x734   :  { %3293 = vmatprep.subr.mxu1 %v3785_v0 }
 0x7d4   :  { %v876_v14 = vpop.f32.mrf.mxu1 }
 0x7d5   :  { %v877_v16 = vadd.f32 %v876_v14, %v4160_v50  ;;  %v5956_v14 = vld [vmem:[#allocation42_spill] sm:$0xff] }
 0x7d6   :  { %v3187_v18 = vpop.f32.mrf.mxu1 }
 0x7d7   :  { %v880_v20 = vmul.f32 0.01, %v877_v16 }
 0x7d9   :  { %v881_v21 = vmax.f32 %v877_v16, %v880_v20  ;;  %v4898_v20 = vld [vmem:[%s5783_s2 + $0x60] sm:$0xff] }
 0x7db   :  { %3221 = vmatmul.mubr.f32.vlgmr.msra.gmra.mxu0 %v881_v21  ;;  %v4905_v21 = vld [vmem:[%s5783_s2 + $0x58] sm:$0xff] }
 0x7dc   :  { %3259 = vmatpush3.msra.mxu0 %v4309_v48  ;;  %3290 = vmatprep.mubr.msk.f32.mxu0 %vm3786_vm0, %v3785_v0  ;;  %v5941_v48 = vld [vmem:[#allocation28_spill] sm:$0xff] }
 0x7dd   :  { %3260 = vmatprep.subr.mxu0 %v3785_v0 }
 0x7de   :  { %3261 = vmatpush3.msra.mxu0 %v4314_v51  ;;  %v5942_v51 = vld [vmem:[#allocation29_spill] sm:$0xff] }
 0x7df   :  { %3262 = vmatprep.subr.mxu0 %v3785_v0 }
 0x7e0   :  { %3263 = vmatpush3.msra.mxu0 %v4321_v53  ;;  %v5943_v53 = vld [vmem:[#allocation30_spill] sm:$0xff] }
 0x7e1   :  { %3264 = vmatprep.subr.mxu0 %v3785_v0 }
 0x7e2   :  { %3265 = vmatpush3.msra.mxu0 %v5916_v22  ;;  %v4912_v22 = vld [vmem:[%s5783_s2 + $0x50] sm:$0xff] }
 0x7e3   :  { %3266 = vmatprep.subr.mxu0 %v3785_v0 }
 0x7e4   :  { %3267 = vmatpush3.msra.mxu0 %v5917_v23  ;;  %v4919_v23 = vld [vmem:[%s5783_s2 + $0x48] sm:$0xff] }
 0x7e5   :  { %3268 = vmatprep.subr.mxu0 %v3785_v0 }
 0x7e6   :  { %3269 = vmatpush3.msra.mxu0 %v5918_v24  ;;  %v4926_v24 = vld [vmem:[%s5783_s2 + $0x40] sm:$0xff] }
 0x7e7   :  { %3270 = vmatprep.subr.mxu0 %v3785_v0 }
 0x7e8   :  { %3271 = vmatpush3.msra.mxu0 %v5919_v25  ;;  %v4933_v25 = vld [vmem:[%s5783_s2 + $0x38] sm:$0xff] }
 0x7e9   :  { %3272 = vmatprep.subr.mxu0 %v3785_v0 }
 0x7ea   :  { %3273 = vmatpush3.msra.mxu0 %v5920_v26  ;;  %v4940_v26 = vld [vmem:[%s5783_s2 + $0x30] sm:$0xff] }
 0x7eb   :  { %3274 = vmatprep.subr.mxu0 %v3785_v0 }
 0x7ec   :  { %3275 = vmatpush3.msra.mxu0 %v5921_v27  ;;  %v4947_v27 = vld [vmem:[%s5783_s2 + $0x28] sm:$0xff] }
 0x7ed   :  { %3276 = vmatprep.subr.mxu0 %v3785_v0 }
 0x7ee   :  { %3277 = vmatpush3.msra.mxu0 %v5922_v28  ;;  %v4954_v28 = vld [vmem:[%s5783_s2 + $0x20] sm:$0xff] }
 0x7ef   :  { %3278 = vmatprep.subr.mxu0 %v3785_v0 }
 0x7f0   :  { %3279 = vmatpush3.msra.mxu0 %v5923_v30  ;;  %v4961_v30 = vld [vmem:[%s5783_s2 + $0x18] sm:$0xff] }
 0x7f1   :  { %3280 = vmatprep.subr.mxu0 %v3785_v0 }
 0x7f2   :  { %3281 = vmatpush3.msra.mxu0 %v5924_v31  ;;  %v4968_v31 = vld [vmem:[%s5783_s2 + $0x10] sm:$0xff] }
 0x7f3   :  { %3282 = vmatprep.subr.mxu0 %v3785_v0 }
 0x7f4   :  { %3283 = vmatpush3.msra.mxu0 %v5925_v32 }
 0x7f5   :  { %3284 = vmatprep.subr.mxu0 %v3785_v0 }
 0x7f6   :  { %3285 = vmatpush3.msra.mxu0 %v5926_v33 }
 0x7f7   :  { %3286 = vmatprep.subr.mxu0 %v3785_v0 }
 0x7f8   :  { %3287 = vmatpush3.msra.mxu0 %v5927_v34 }
 0x7f9   :  { %3288 = vmatprep.subr.mxu0 %v3785_v0 }
 0x7fa   :  { %3289 = vmatpush3.msra.mxu0 %v5928_v35 }
 0x7fb   :  { %3328 = vmatprep.subr.mxu0 %v3785_v0 }
 0x89b   :  { %v964_v36 = vpop.f32.mrf.mxu0 }
 0x89c   :  { %v965_v38 = vadd.f32 %v964_v36, %v5929_v37 }
 0x89d   :  { %v3222_v39 = vpop.f32.mrf.mxu0 }
 0x89e   :  { %v968_v40 = vmul.f32 0.01, %v965_v38  ;;  %v4987_v39 = vld [vmem:[%s5783_s2] sm:$0xff] }
 0x8a0   :  { %v969_v41 = vmax.f32 %v965_v38, %v968_v40  ;;  %v4980_v38 = vld [vmem:[%s5783_s2 + $0x8] sm:$0xff]  ;;  %v4993_v40 = vld [vmem:[%s5784_s3 + $0x78] sm:$0xff] }
 0x8a2   :  { %3256 = vmatmul.mubr.f32.vlgmr.msra.gmra.mxu1 %v969_v41  ;;  %v4998_v41 = vld [vmem:[%s5784_s3 + $0x70] sm:$0xff] }
 0x8a3   :  { %3294 = vmatpush3.msra.mxu1 %v5930_v42  ;;  %3325 = vmatprep.mubr.msk.f32.mxu1 %vm3786_vm0, %v3785_v0  ;;  %v5006_v42 = vld [vmem:[%s5784_s3 + $0x68] sm:$0xff] }
 0x8a4   :  { %3295 = vmatprep.subr.mxu1 %v3785_v0 }
 0x8a5   :  { %3296 = vmatpush3.msra.mxu1 %v5931_v43  ;;  %v5013_v43 = vld [vmem:[%s5784_s3 + $0x60] sm:$0xff] }
 0x8a6   :  { %3297 = vmatprep.subr.mxu1 %v3785_v0 }
 0x8a7   :  { %3298 = vmatpush3.msra.mxu1 %v5932_v44  ;;  %v5020_v44 = vld [vmem:[%s5784_s3 + $0x58] sm:$0xff] }
 0x8a8   :  { %3299 = vmatprep.subr.mxu1 %v3785_v0 }
 0x8a9   :  { %3300 = vmatpush3.msra.mxu1 %v5933_v45  ;;  %v5027_v45 = vld [vmem:[%s5784_s3 + $0x50] sm:$0xff] }
 0x8aa   :  { %3301 = vmatprep.subr.mxu1 %v3785_v0 }
 0x8ab   :  { %3302 = vmatpush3.msra.mxu1 %v5934_v47  ;;  %v5034_v47 = vld [vmem:[%s5784_s3 + $0x48] sm:$0xff] }
 0x8ac   :  { %3303 = vmatprep.subr.mxu1 %v3785_v0 }
 0x8ad   :  { %3304 = vmatpush3.msra.mxu1 %v5935_v49  ;;  %v5041_v49 = vld [vmem:[%s5784_s3 + $0x40] sm:$0xff] }
 0x8ae   :  { %3305 = vmatprep.subr.mxu1 %v3785_v0 }
 0x8af   :  { %3306 = vmatpush3.msra.mxu1 %v5936_v56  ;;  %v5048_v56 = vld [vmem:[%s5784_s3 + $0x38] sm:$0xff] }
 0x8b0   :  { %3307 = vmatprep.subr.mxu1 %v3785_v0 }
 0x8b1   :  { %3308 = vmatpush3.msra.mxu1 %v5937_v57  ;;  %v5055_v57 = vld [vmem:[%s5784_s3 + $0x30] sm:$0xff] }
 0x8b2   :  { %3309 = vmatprep.subr.mxu1 %v3785_v0 }
 0x8b3   :  { %3310 = vmatpush3.msra.mxu1 %v5938_v58  ;;  %v5062_v58 = vld [vmem:[%s5784_s3 + $0x28] sm:$0xff] }
 0x8b4   :  { %3311 = vmatprep.subr.mxu1 %v3785_v0 }
 0x8b5   :  { %3312 = vmatpush3.msra.mxu1 %v5939_v59  ;;  %v5069_v59 = vld [vmem:[%s5784_s3 + $0x20] sm:$0xff] }
 0x8b6   :  { %3313 = vmatprep.subr.mxu1 %v3785_v0 }
 0x8b7   :  { %3314 = vmatpush3.msra.mxu1 %v5940_v52 }
 0x8b8   :  { %3315 = vmatprep.subr.mxu1 %v3785_v0 }
 0x8b9   :  { %3316 = vmatpush3.msra.mxu1 %v5941_v48 }
 0x8ba   :  { %3317 = vmatprep.subr.mxu1 %v3785_v0 }
 0x8bb   :  { %3318 = vmatpush3.msra.mxu1 %v5942_v51 }
 0x8bc   :  { %3319 = vmatprep.subr.mxu1 %v3785_v0 }
 0x8bd   :  { %3320 = vmatpush3.msra.mxu1 %v5943_v53  ;;  %v5084_v53 = vld [vmem:[%s5784_s3 + $0x18] sm:$0xff] }
 0x8be   :  { %3321 = vmatprep.subr.mxu1 %v3785_v0 }
 0x8bf   :  { %3322 = vmatpush3.msra.mxu1 %v5944_v29  ;;  %v5091_v29 = vld [vmem:[%s5784_s3 + $0x10] sm:$0xff] }
 0x8c0   :  { %3323 = vmatprep.subr.mxu1 %v3785_v0 }
 0x8c1   :  { %3324 = vmatpush3.msra.mxu1 %v5945_v46  ;;  %v5098_v46 = vld [vmem:[%s5784_s3 + $0x8] sm:$0xff] }
 0x8c2   :  { %3363 = vmatprep.subr.mxu1 %v3785_v0 }
 0x962   :  { %v1052_v55 = vpop.f32.mrf.mxu1 }
 0x963   :  { %v1053_v54 = vadd.f32 %v1052_v55, %v5946_v60  ;;  %v5105_v55 = vld [vmem:[%s5784_s3] sm:$0xff] }
 0x964   :  { %v3257_v6 = vpop.f32.mrf.mxu1 }
 0x965   :  { %3291 = vmatmul.mubr.f32.vlgmr.msra.gmra.mxu0 %v1053_v54  ;;  %v5111_v54 = vld [vmem:[%s5786_s4 + $0x78] sm:$0xff]  ;;  %v5116_v6 = vld [vmem:[%s5786_s4 + $0x70] sm:$0xff] }
 0x966   :  { %3329 = vmatpush3.msra.mxu0 %v5947_v11  ;;  %3360 = vmatprep.mubr.msk.f32.mxu0 %vm3786_vm0, %v3785_v0  ;;  %v5124_v11 = vld [vmem:[%s5786_s4 + $0x68] sm:$0xff] }
 0x967   :  { %3330 = vmatprep.subr.mxu0 %v3785_v0 }
 0x968   :  { %3331 = vmatpush3.msra.mxu0 %v5948_v13  ;;  %v5131_v13 = vld [vmem:[%s5786_s4 + $0x60] sm:$0xff] }
 0x969   :  { %3332 = vmatprep.subr.mxu0 %v3785_v0 }
 0x96a   :  { %3333 = vmatpush3.msra.mxu0 %v5949_v15  ;;  %v5138_v15 = vld [vmem:[%s5786_s4 + $0x58] sm:$0xff] }
 0x96b   :  { %3334 = vmatprep.subr.mxu0 %v3785_v0 }
 0x96c   :  { %3335 = vmatpush3.msra.mxu0 %v5950_v17  ;;  %v5145_v17 = vld [vmem:[%s5786_s4 + $0x50] sm:$0xff] }
 0x96d   :  { %3336 = vmatprep.subr.mxu0 %v3785_v0 }
 0x96e   :  { %3337 = vmatpush3.msra.mxu0 %v5951_v19  ;;  %v5152_v19 = vld [vmem:[%s5786_s4 + $0x48] sm:$0xff] }
 0x96f   :  { %3338 = vmatprep.subr.mxu0 %v3785_v0 }
 0x970   :  { %3339 = vmatpush3.msra.mxu0 %v5952_v5  ;;  %v5159_v5 = vld [vmem:[%s5786_s4 + $0x40] sm:$0xff] }
 0x971   :  { %3340 = vmatprep.subr.mxu0 %v3785_v0 }
 0x972   :  { %3341 = vmatpush3.msra.mxu0 %v5953_v8  ;;  %v5166_v8 = vld [vmem:[%s5786_s4 + $0x38] sm:$0xff] }
 0x973   :  { %3342 = vmatprep.subr.mxu0 %v3785_v0 }
 0x974   :  { %3343 = vmatpush3.msra.mxu0 %v5954_v10  ;;  %v5173_v10 = vld [vmem:[%s5786_s4 + $0x30] sm:$0xff] }
 0x975   :  { %3344 = vmatprep.subr.mxu0 %v3785_v0 }
 0x976   :  { %3345 = vmatpush3.msra.mxu0 %v5955_v12  ;;  %v5180_v12 = vld [vmem:[%s5786_s4 + $0x28] sm:$0xff] }
 0x977   :  { %3346 = vmatprep.subr.mxu0 %v3785_v0 }
 0x978   :  { %3347 = vmatpush3.msra.mxu0 %v5956_v14  ;;  %v5187_v14 = vld [vmem:[%s5786_s4 + $0x20] sm:$0xff] }
 0x979   :  { %3348 = vmatprep.subr.mxu0 %v3785_v0 }
 0x97a   :  { %3349 = vmatpush3.msra.mxu0 %v4607_v62 }
 0x97b   :  { %3350 = vmatprep.subr.mxu0 %v3785_v0 }
 0x97c   :  { %3351 = vmatpush3.msra.mxu0 %v4614_v61 }
 0x97d   :  { %3352 = vmatprep.subr.mxu0 %v3785_v0 }
 0x97e   :  { %3353 = vmatpush3.msra.mxu0 %v4662_v1 }
 0x97f   :  { %3354 = vmatprep.subr.mxu0 %v3785_v0 }
 0x980   :  { %3355 = vmatpush3.msra.mxu0 %v4669_v2  ;;  %v4879_v2 = vld [vmem:[%s5783_s2 + $0x78] sm:$0xff] }
 0x981   :  { %3356 = vmatprep.subr.mxu0 %v3785_v0 }
 0x982   :  { %3357 = vmatpush3.msra.mxu0 %v4676_v3  ;;  %v4884_v3 = vld [vmem:[%s5783_s2 + $0x70] sm:$0xff] }
 0x983   :  { %3358 = vmatprep.subr.mxu0 %v3785_v0 }
 0x984   :  { %3359 = vmatpush3.msra.mxu0 %v4683_v4  ;;  %v4891_v4 = vld [vmem:[%s5783_s2 + $0x68] sm:$0xff] }
 0x985   :  { %3398 = vmatprep.subr.mxu0 %v3785_v0 }
 0xa25   :  { %v1138_v62 = vpop.f32.mrf.mxu0 }
 0xa26   :  { %v1139_v61 = vadd.f32 %v1138_v62, %v4622_v63 }
 0xa27   :  { %v3292_v16 = vpop.f32.mrf.mxu0 }
 0xa28   :  { %v1142_v18 = vmul.f32 0.01, %v1139_v61 }
 0xa2a   :  { %v1143_v1 = vmax.f32 %v1139_v61, %v1142_v18 }
 0xa2c   :  { %3326 = vmatmul.mubr.f32.vlgmr.msra.gmra.mxu1 %v1143_v1 }
 0xa2d   :  { %3395 = vmatprep.mubr.msk.f32.mxu1 %vm3786_vm0, %v3785_v0  ;;  %3364 = vmatpush3.msra.mxu1 %v4879_v2 }
 0xa2e   :  { %3365 = vmatprep.subr.mxu1 %v3785_v0 }
 0xa2f   :  { %3366 = vmatpush3.msra.mxu1 %v4884_v3 }
 0xa30   :  { %3367 = vmatprep.subr.mxu1 %v3785_v0 }
 0xa31   :  { %3368 = vmatpush3.msra.mxu1 %v4891_v4 }
 0xa32   :  { %3369 = vmatprep.subr.mxu1 %v3785_v0 }
 0xa33   :  { %3370 = vmatpush3.msra.mxu1 %v4898_v20 }
 0xa34   :  { %3371 = vmatprep.subr.mxu1 %v3785_v0 }
 0xa35   :  { %3372 = vmatpush3.msra.mxu1 %v4905_v21 }
 0xa36   :  { %3373 = vmatprep.subr.mxu1 %v3785_v0 }
 0xa37   :  { %3374 = vmatpush3.msra.mxu1 %v4912_v22 }
 0xa38   :  { %3375 = vmatprep.subr.mxu1 %v3785_v0 }
 0xa39   :  { %3376 = vmatpush3.msra.mxu1 %v4919_v23 }
 0xa3a   :  { %3377 = vmatprep.subr.mxu1 %v3785_v0 }
 0xa3b   :  { %3378 = vmatpush3.msra.mxu1 %v4926_v24 }
 0xa3c   :  { %3379 = vmatprep.subr.mxu1 %v3785_v0 }
 0xa3d   :  { %3380 = vmatpush3.msra.mxu1 %v4933_v25 }
 0xa3e   :  { %3381 = vmatprep.subr.mxu1 %v3785_v0 }
 0xa3f   :  { %3382 = vmatpush3.msra.mxu1 %v4940_v26 }
 0xa40   :  { %3383 = vmatprep.subr.mxu1 %v3785_v0 }
 0xa41   :  { %3384 = vmatpush3.msra.mxu1 %v4947_v27 }
 0xa42   :  { %3385 = vmatprep.subr.mxu1 %v3785_v0 }
 0xa43   :  { %3386 = vmatpush3.msra.mxu1 %v4954_v28 }
 0xa44   :  { %3387 = vmatprep.subr.mxu1 %v3785_v0 }
 0xa45   :  { %3388 = vmatpush3.msra.mxu1 %v4961_v30 }
 0xa46   :  { %3389 = vmatprep.subr.mxu1 %v3785_v0 }
 0xa47   :  { %3390 = vmatpush3.msra.mxu1 %v4968_v31 }
 0xa48   :  { %3391 = vmatprep.subr.mxu1 %v3785_v0 }
 0xa49   :  { %3392 = vmatpush3.msra.mxu1 %v4980_v38 }
 0xa4a   :  { %3393 = vmatprep.subr.mxu1 %v3785_v0 }
 0xa4b   :  { %3394 = vmatpush3.msra.mxu1 %v4987_v39 }
 0xa4c   :  { %3433 = vmatprep.subr.mxu1 %v3785_v0 }
 0xaec   :  { %v1226_v32 = vpop.f32.mrf.mxu1 }
 0xaed   :  { %v1227_v33 = vadd.f32 %v1226_v32, %v4689_v9  ;;  %v5199_v32 = vld [vmem:[%s5786_s4 + $0x18] sm:$0xff] }
 0xaee   :  { %v3327_v34 = vpop.f32.mrf.mxu1 }
 0xaef   :  { %v1230_v35 = vmul.f32 0.01, %v1227_v33  ;;  %v5213_v34 = vld [vmem:[%s5786_s4 + $0x8] sm:$0xff] }
 0xaf1   :  { %v1231_v36 = vmax.f32 %v1227_v33, %v1230_v35  ;;  %v5206_v33 = vld [vmem:[%s5786_s4 + $0x10] sm:$0xff]  ;;  %v5220_v35 = vld [vmem:[%s5786_s4] sm:$0xff] }
 0xaf3   :  { %3361 = vmatmul.mubr.f32.vlgmr.msra.gmra.mxu0 %v1231_v36  ;;  %v5226_v36 = vld [vmem:[%s5788_s5 + $0x78] sm:$0xff] }
 0xaf4   :  { %3430 = vmatprep.mubr.msk.f32.mxu0 %vm3786_vm0, %v3785_v0  ;;  %3399 = vmatpush3.msra.mxu0 %v4993_v40 }
 0xaf5   :  { %3400 = vmatprep.subr.mxu0 %v3785_v0 }
 0xaf6   :  { %3401 = vmatpush3.msra.mxu0 %v4998_v41 }
 0xaf7   :  { %3402 = vmatprep.subr.mxu0 %v3785_v0 }
 0xaf8   :  { %3403 = vmatpush3.msra.mxu0 %v5006_v42 }
 0xaf9   :  { %3404 = vmatprep.subr.mxu0 %v3785_v0 }
 0xafa   :  { %3405 = vmatpush3.msra.mxu0 %v5013_v43 }
 0xafb   :  { %3406 = vmatprep.subr.mxu0 %v3785_v0 }
 0xafc   :  { %3407 = vmatpush3.msra.mxu0 %v5020_v44 }
 0xafd   :  { %3408 = vmatprep.subr.mxu0 %v3785_v0 }
 0xafe   :  { %3409 = vmatpush3.msra.mxu0 %v5027_v45 }
 0xaff   :  { %3410 = vmatprep.subr.mxu0 %v3785_v0 }
 0xb00   :  { %3411 = vmatpush3.msra.mxu0 %v5034_v47 }
 0xb01   :  { %3412 = vmatprep.subr.mxu0 %v3785_v0 }
 0xb02   :  { %3413 = vmatpush3.msra.mxu0 %v5041_v49 }
 0xb03   :  { %3414 = vmatprep.subr.mxu0 %v3785_v0 }
 0xb04   :  { %3415 = vmatpush3.msra.mxu0 %v5048_v56 }
 0xb05   :  { %3416 = vmatprep.subr.mxu0 %v3785_v0 }
 0xb06   :  { %3417 = vmatpush3.msra.mxu0 %v5055_v57 }
 0xb07   :  { %3418 = vmatprep.subr.mxu0 %v3785_v0 }
 0xb08   :  { %3419 = vmatpush3.msra.mxu0 %v5062_v58 }
 0xb09   :  { %3420 = vmatprep.subr.mxu0 %v3785_v0 }
 0xb0a   :  { %3421 = vmatpush3.msra.mxu0 %v5069_v59 }
 0xb0b   :  { %3422 = vmatprep.subr.mxu0 %v3785_v0 }
 0xb0c   :  { %3423 = vmatpush3.msra.mxu0 %v5084_v53 }
 0xb0d   :  { %3424 = vmatprep.subr.mxu0 %v3785_v0 }
 0xb0e   :  { %3425 = vmatpush3.msra.mxu0 %v5091_v29 }
 0xb0f   :  { %3426 = vmatprep.subr.mxu0 %v3785_v0 }
 0xb10   :  { %3427 = vmatpush3.msra.mxu0 %v5098_v46 }
 0xb11   :  { %3428 = vmatprep.subr.mxu0 %v3785_v0 }
 0xb12   :  { %3429 = vmatpush3.msra.mxu0 %v5105_v55 }
 0xb13   :  { %3468 = vmatprep.subr.mxu0 %v3785_v0 }
 0xbb3   :  { %v1314_v52 = vpop.f32.mrf.mxu0 }
 0xbb4   :  { %v1315_v48 = vadd.f32 %v1314_v52, %v4728_v7  ;;  %v5231_v52 = vld [vmem:[%s5788_s5 + $0x70] sm:$0xff] }
 0xbb5   :  { %v3362_v51 = vpop.f32.mrf.mxu0 }
 0xbb6   :  { %2376 = vst [vmem:[%s5791_s8 + $0x8] sm:$0xff] %v1315_v48  ;;  %3396 = vmatmul.mubr.f32.vlgmr.msra.gmra.mxu1 %v1315_v48  ;;  %v5239_v48 = vld [vmem:[%s5788_s5 + $0x68] sm:$0xff]  ;;  %v5246_v51 = vld [vmem:[%s5788_s5 + $0x60] sm:$0xff] }
 0xbb7   :  { %3465 = vmatprep.mubr.msk.f32.mxu1 %vm3786_vm0, %v3785_v0  ;;  %3434 = vmatpush3.msra.mxu1 %v5111_v54  ;;  %5957 = vst [vmem:[#allocation4_spill] sm:$0xff] %v5239_v48  ;;  %5958 = vst [vmem:[#allocation5_spill] sm:$0xff] %v5246_v51 }
 0xbb8   :  { %3435 = vmatprep.subr.mxu1 %v3785_v0 }
 0xbb9   :  { %3436 = vmatpush3.msra.mxu1 %v5116_v6 }
 0xbba   :  { %3437 = vmatprep.subr.mxu1 %v3785_v0 }
 0xbbb   :  { %3438 = vmatpush3.msra.mxu1 %v5124_v11 }
 0xbbc   :  { %3439 = vmatprep.subr.mxu1 %v3785_v0 }
 0xbbd   :  { %3440 = vmatpush3.msra.mxu1 %v5131_v13 }
 0xbbe   :  { %3441 = vmatprep.subr.mxu1 %v3785_v0 }
 0xbbf   :  { %3442 = vmatpush3.msra.mxu1 %v5138_v15 }
 0xbc0   :  { %3443 = vmatprep.subr.mxu1 %v3785_v0 }
 0xbc1   :  { %3444 = vmatpush3.msra.mxu1 %v5145_v17 }
 0xbc2   :  { %3445 = vmatprep.subr.mxu1 %v3785_v0 }
 0xbc3   :  { %3446 = vmatpush3.msra.mxu1 %v5152_v19 }
 0xbc4   :  { %3447 = vmatprep.subr.mxu1 %v3785_v0 }
 0xbc5   :  { %3448 = vmatpush3.msra.mxu1 %v5159_v5 }
 0xbc6   :  { %3449 = vmatprep.subr.mxu1 %v3785_v0 }
 0xbc7   :  { %3450 = vmatpush3.msra.mxu1 %v5166_v8 }
 0xbc8   :  { %3451 = vmatprep.subr.mxu1 %v3785_v0 }
 0xbc9   :  { %3452 = vmatpush3.msra.mxu1 %v5173_v10 }
 0xbca   :  { %3453 = vmatprep.subr.mxu1 %v3785_v0 }
 0xbcb   :  { %3454 = vmatpush3.msra.mxu1 %v5180_v12 }
 0xbcc   :  { %3455 = vmatprep.subr.mxu1 %v3785_v0 }
 0xbcd   :  { %3456 = vmatpush3.msra.mxu1 %v5187_v14 }
 0xbce   :  { %3457 = vmatprep.subr.mxu1 %v3785_v0 }
 0xbcf   :  { %3458 = vmatpush3.msra.mxu1 %v5199_v32 }
 0xbd0   :  { %3459 = vmatprep.subr.mxu1 %v3785_v0 }
 0xbd1   :  { %3460 = vmatpush3.msra.mxu1 %v5206_v33 }
 0xbd2   :  { %3461 = vmatprep.subr.mxu1 %v3785_v0 }
 0xbd3   :  { %3462 = vmatpush3.msra.mxu1 %v5213_v34 }
 0xbd4   :  { %3463 = vmatprep.subr.mxu1 %v3785_v0 }
 0xbd5   :  { %3464 = vmatpush3.msra.mxu1 %v5220_v35 }
 0xbd6   :  { %3503 = vmatprep.subr.mxu1 %v3785_v0 }
 0xc76   :  { %v1402_v62 = vpop.f32.mrf.mxu1 }
 0xc77   :  { %v1403_v61 = vadd.f32 %v1402_v62, %v4160_v50  ;;  %v5253_v62 = vld [vmem:[%s5788_s5 + $0x58] sm:$0xff] }
 0xc78   :  { %v3397_v16 = vpop.f32.mrf.mxu1  ;;  %5959 = vst [vmem:[#allocation6_spill] sm:$0xff] %v5253_v62 }
 0xc79   :  { %v1406_v18 = vmul.f32 0.01, %v1403_v61  ;;  %v5267_v16 = vld [vmem:[%s5788_s5 + $0x48] sm:$0xff] }
 0xc7a   :  { %5961 = vst [vmem:[#allocation8_spill] sm:$0xff] %v5267_v16 }
 0xc7b   :  { %v1407_v1 = vmax.f32 %v1403_v61, %v1406_v18  ;;  %v5260_v61 = vld [vmem:[%s5788_s5 + $0x50] sm:$0xff]  ;;  %v5274_v18 = vld [vmem:[%s5788_s5 + $0x40] sm:$0xff] }
 0xc7c   :  { %5960 = vst [vmem:[#allocation7_spill] sm:$0xff] %v5260_v61  ;;  %5962 = vst [vmem:[#allocation9_spill] sm:$0xff] %v5274_v18 }
 0xc7d   :  { %3431 = vmatmul.mubr.f32.vlgmr.msra.gmra.mxu0 %v1407_v1  ;;  %v5281_v1 = vld [vmem:[%s5788_s5 + $0x38] sm:$0xff] }
 0xc7e   :  { %3500 = vmatprep.mubr.msk.f32.mxu0 %vm3786_vm0, %v3785_v0  ;;  %3469 = vmatpush3.msra.mxu0 %v5226_v36  ;;  %5963 = vst [vmem:[#allocation10_spill] sm:$0xff] %v5281_v1 }
 0xc7f   :  { %3470 = vmatprep.subr.mxu0 %v3785_v0 }
 0xc80   :  { %3471 = vmatpush3.msra.mxu0 %v5231_v52 }
 0xc81   :  { %3472 = vmatprep.subr.mxu0 %v3785_v0 }
 0xc82   :  { %3473 = vmatpush3.msra.mxu0 %v5239_v48 }
 0xc83   :  { %3474 = vmatprep.subr.mxu0 %v3785_v0 }
 0xc84   :  { %3475 = vmatpush3.msra.mxu0 %v5246_v51 }
 0xc85   :  { %3476 = vmatprep.subr.mxu0 %v3785_v0 }
 0xc86   :  { %3477 = vmatpush3.msra.mxu0 %v5253_v62 }
 0xc87   :  { %3478 = vmatprep.subr.mxu0 %v3785_v0 }
 0xc88   :  { %3479 = vmatpush3.msra.mxu0 %v5260_v61  ;;  %v5288_v61 = vld [vmem:[%s5788_s5 + $0x30] sm:$0xff] }
 0xc89   :  { %3480 = vmatprep.subr.mxu0 %v3785_v0  ;;  %5964 = vst [vmem:[#allocation11_spill] sm:$0xff] %v5288_v61 }
 0xc8a   :  { %3481 = vmatpush3.msra.mxu0 %v5267_v16  ;;  %v5295_v16 = vld [vmem:[%s5788_s5 + $0x28] sm:$0xff] }
 0xc8b   :  { %3482 = vmatprep.subr.mxu0 %v3785_v0  ;;  %5965 = vst [vmem:[#allocation12_spill] sm:$0xff] %v5295_v16 }
 0xc8c   :  { %3483 = vmatpush3.msra.mxu0 %v5274_v18  ;;  %v5302_v18 = vld [vmem:[%s5788_s5 + $0x20] sm:$0xff] }
 0xc8d   :  { %3484 = vmatprep.subr.mxu0 %v3785_v0  ;;  %5966 = vst [vmem:[#allocation13_spill] sm:$0xff] %v5302_v18 }
 0xc8e   :  { %3485 = vmatpush3.msra.mxu0 %v5281_v1  ;;  %v5309_v1 = vld [vmem:[%s5788_s5 + $0x18] sm:$0xff] }
 0xc8f   :  { %3486 = vmatprep.subr.mxu0 %v3785_v0  ;;  %5967 = vst [vmem:[#allocation14_spill] sm:$0xff] %v5309_v1 }
 0xc90   :  { %3487 = vmatpush3.msra.mxu0 %v5288_v61  ;;  %v5316_v61 = vld [vmem:[%s5788_s5 + $0x10] sm:$0xff] }
 0xc91   :  { %3488 = vmatprep.subr.mxu0 %v3785_v0 }
 0xc92   :  { %3489 = vmatpush3.msra.mxu0 %v5295_v16 }
 0xc93   :  { %3490 = vmatprep.subr.mxu0 %v3785_v0 }
 0xc94   :  { %3491 = vmatpush3.msra.mxu0 %v5302_v18 }
 0xc95   :  { %3492 = vmatprep.subr.mxu0 %v3785_v0 }
 0xc96   :  { %3493 = vmatpush3.msra.mxu0 %v5309_v1  ;;  %v5328_v1 = vld [vmem:[%s5788_s5 + $0x8] sm:$0xff] }
 0xc97   :  { %3494 = vmatprep.subr.mxu0 %v3785_v0 }
 0xc98   :  { %3495 = vmatpush3.msra.mxu0 %v5316_v61 }
 0xc99   :  { %3496 = vmatprep.subr.mxu0 %v3785_v0 }
 0xc9a   :  { %3497 = vmatpush3.msra.mxu0 %v5328_v1 }
 0xc9b   :  { %3498 = vmatprep.subr.mxu0 %v3785_v0 }
 0xd3d   :  { %v1490_v16 = vpop.f32.mrf.mxu0 }
 0xd3e   :  { %v1491_v62 = vadd.f32 %v1490_v16, %v5929_v37  ;;  %v5335_v16 = vld [vmem:[%s5788_s5] sm:$0xff] }
 0xd3f   :  { %v3432_v51 = vpop.f32.mrf.mxu0  ;;  %5968 = vst [vmem:[#allocation15_spill] sm:$0xff] %v5335_v16  ;;  %3499 = vmatpush3.msra.mxu0 %v5335_v16 }
 0xd40   :  { %v1494_v18 = vmul.f32 0.01, %v1491_v62  ;;  %v5346_v51 = vld [vmem:[%s5789_s6 + $0x70] sm:$0xff]  ;;  %3538 = vmatprep.subr.mxu0 %v3785_v0 }
 0xd41   :  { %5970 = vst [vmem:[#allocation17_spill] sm:$0xff] %v5346_v51 }
 0xd42   :  { %v1495_v48 = vmax.f32 %v1491_v62, %v1494_v18  ;;  %v5354_v62 = vld [vmem:[%s5789_s6 + $0x68] sm:$0xff]  ;;  %v5361_v18 = vld [vmem:[%s5789_s6 + $0x60] sm:$0xff] }
 0xd43   :  { %5971 = vst [vmem:[#allocation18_spill] sm:$0xff] %v5354_v62  ;;  %5972 = vst [vmem:[#allocation19_spill] sm:$0xff] %v5361_v18 }
 0xd44   :  { %3466 = vmatmul.mubr.f32.vlgmr.msra.gmra.mxu1 %v1495_v48  ;;  %v5341_v48 = vld [vmem:[%s5789_s6 + $0x78] sm:$0xff] }
 0xd45   :  { %3535 = vmatprep.mubr.msk.f32.mxu1 %vm3786_vm0, %v3785_v0  ;;  %5969 = vst [vmem:[#allocation16_spill] sm:$0xff] %v5341_v48  ;;  %3504 = vmatpush3.msra.mxu1 %v5341_v48  ;;  %v5368_v48 = vld [vmem:[%s5789_s6 + $0x58] sm:$0xff] }
 0xd46   :  { %3505 = vmatprep.subr.mxu1 %v3785_v0  ;;  %5973 = vst [vmem:[#allocation20_spill] sm:$0xff] %v5368_v48 }
 0xd47   :  { %3506 = vmatpush3.msra.mxu1 %v5346_v51  ;;  %v5375_v51 = vld [vmem:[%s5789_s6 + $0x50] sm:$0xff] }
 0xd48   :  { %3507 = vmatprep.subr.mxu1 %v3785_v0  ;;  %5974 = vst [vmem:[#allocation21_spill] sm:$0xff] %v5375_v51 }
 0xd49   :  { %3508 = vmatpush3.msra.mxu1 %v5354_v62  ;;  %v5382_v62 = vld [vmem:[%s5789_s6 + $0x48] sm:$0xff] }
 0xd4a   :  { %3509 = vmatprep.subr.mxu1 %v3785_v0  ;;  %5975 = vst [vmem:[#allocation22_spill] sm:$0xff] %v5382_v62 }
 0xd4b   :  { %3510 = vmatpush3.msra.mxu1 %v5361_v18  ;;  %v5389_v18 = vld [vmem:[%s5789_s6 + $0x40] sm:$0xff] }
 0xd4c   :  { %3511 = vmatprep.subr.mxu1 %v3785_v0  ;;  %5976 = vst [vmem:[#allocation23_spill] sm:$0xff] %v5389_v18 }
 0xd4d   :  { %3512 = vmatpush3.msra.mxu1 %v5368_v48  ;;  %v5396_v48 = vld [vmem:[%s5789_s6 + $0x38] sm:$0xff] }
 0xd4e   :  { %3513 = vmatprep.subr.mxu1 %v3785_v0  ;;  %5977 = vst [vmem:[#allocation24_spill] sm:$0xff] %v5396_v48 }
 0xd4f   :  { %3514 = vmatpush3.msra.mxu1 %v5375_v51  ;;  %v5403_v51 = vld [vmem:[%s5789_s6 + $0x30] sm:$0xff] }
 0xd50   :  { %3515 = vmatprep.subr.mxu1 %v3785_v0  ;;  %5978 = vst [vmem:[#allocation25_spill] sm:$0xff] %v5403_v51 }
 0xd51   :  { %3516 = vmatpush3.msra.mxu1 %v5382_v62  ;;  %v5410_v62 = vld [vmem:[%s5789_s6 + $0x28] sm:$0xff] }
 0xd52   :  { %3517 = vmatprep.subr.mxu1 %v3785_v0  ;;  %5979 = vst [vmem:[#allocation26_spill] sm:$0xff] %v5410_v62 }
 0xd53   :  { %3518 = vmatpush3.msra.mxu1 %v5389_v18  ;;  %v5417_v18 = vld [vmem:[%s5789_s6 + $0x20] sm:$0xff] }
 0xd54   :  { %3519 = vmatprep.subr.mxu1 %v3785_v0  ;;  %5980 = vst [vmem:[#allocation27_spill] sm:$0xff] %v5417_v18 }
 0xd55   :  { %3520 = vmatpush3.msra.mxu1 %v5396_v48 }
 0xd56   :  { %3521 = vmatprep.subr.mxu1 %v3785_v0 }
 0xd57   :  { %3522 = vmatpush3.msra.mxu1 %v5403_v51  ;;  %v5429_v51 = vld [vmem:[%s5789_s6 + $0x18] sm:$0xff] }
 0xd58   :  { %3523 = vmatprep.subr.mxu1 %v3785_v0  ;;  %5981 = vst [vmem:[#allocation28_spill] sm:$0xff] %v5429_v51 }
 0xd59   :  { %3524 = vmatpush3.msra.mxu1 %v5410_v62 }
 0xd5a   :  { %3525 = vmatprep.subr.mxu1 %v3785_v0 }
 0xd5b   :  { %3526 = vmatpush3.msra.mxu1 %v5417_v18  ;;  %v5436_v18 = vld [vmem:[%s5789_s6 + $0x10] sm:$0xff] }
 0xd5c   :  { %3527 = vmatprep.subr.mxu1 %v3785_v0  ;;  %5982 = vst [vmem:[#allocation29_spill] sm:$0xff] %v5436_v18 }
 0xd5d   :  { %3528 = vmatpush3.msra.mxu1 %v5429_v51 }
 0xd5e   :  { %3529 = vmatprep.subr.mxu1 %v3785_v0 }
 0xd5f   :  { %3530 = vmatpush3.msra.mxu1 %v5436_v18 }
 0xd60   :  { %3531 = vmatprep.subr.mxu1 %v3785_v0 }
 0xe04   :  { %v1578_v48 = vpop.f32.mrf.mxu1 }
 0xe05   :  { %v1579_v37 = vadd.f32 %v1578_v48, %v5946_v60  ;;  %v5456_v48 = vld [vmem:[%s5790_s7 + $0x78] sm:$0xff]  ;;  %v5461_v60 = vld [vmem:[%s5790_s7 + $0x70] sm:$0xff] }
 0xe06   :  { %v3467_v16 = vpop.f32.mrf.mxu1  ;;  %5985 = vst [vmem:[#allocation32_spill] sm:$0xff] %v5456_v48  ;;  %5986 = vst [vmem:[#allocation33_spill] sm:$0xff] %v5461_v60 }
 0xe07   :  { %3501 = vmatmul.mubr.f32.vlgmr.msra.gmra.mxu0 %v1579_v37  ;;  %v5443_v37 = vld [vmem:[%s5789_s6 + $0x8] sm:$0xff]  ;;  %v5450_v16 = vld [vmem:[%s5789_s6] sm:$0xff] }
 0xe08   :  { %3570 = vmatprep.mubr.msk.f32.mxu0 %vm3786_vm0, %v3785_v0  ;;  %5983 = vst [vmem:[#allocation30_spill] sm:$0xff] %v5443_v37  ;;  %3532 = vmatpush3.msra.mxu1 %v5443_v37  ;;  %5984 = vst [vmem:[#allocation31_spill] sm:$0xff] %v5450_v16  ;;  %v5476_v37 = vld [vmem:[%s5790_s7 + $0x60] sm:$0xff] }
 0xe09   :  { %3533 = vmatprep.subr.mxu1 %v3785_v0  ;;  %3539 = vmatpush3.msra.mxu0 %v5456_v48  ;;  %5988 = vst [vmem:[#allocation35_spill] sm:$0xff] %v5476_v37  ;;  %v5483_v48 = vld [vmem:[%s5790_s7 + $0x58] sm:$0xff] }
 0xe0a   :  { %3534 = vmatpush3.msra.mxu1 %v5450_v16  ;;  %3540 = vmatprep.subr.mxu0 %v3785_v0  ;;  %v5469_v16 = vld [vmem:[%s5790_s7 + $0x68] sm:$0xff]  ;;  %5989 = vst [vmem:[#allocation36_spill] sm:$0xff] %v5483_v48 }
 0xe0b   :  { %3573 = vmatprep.subr.mxu1 %v3785_v0  ;;  %5987 = vst [vmem:[#allocation34_spill] sm:$0xff] %v5469_v16  ;;  %3541 = vmatpush3.msra.mxu0 %v5461_v60  ;;  %v5490_v60 = vld [vmem:[%s5790_s7 + $0x50] sm:$0xff] }
 0xe0c   :  { %3542 = vmatprep.subr.mxu0 %v3785_v0  ;;  %5990 = vst [vmem:[#allocation37_spill] sm:$0xff] %v5490_v60 }
 0xe0d   :  { %3543 = vmatpush3.msra.mxu0 %v5469_v16  ;;  %v5497_v16 = vld [vmem:[%s5790_s7 + $0x48] sm:$0xff] }
 0xe0e   :  { %3544 = vmatprep.subr.mxu0 %v3785_v0  ;;  %5991 = vst [vmem:[#allocation38_spill] sm:$0xff] %v5497_v16 }
 0xe0f   :  { %3545 = vmatpush3.msra.mxu0 %v5476_v37  ;;  %v5504_v37 = vld [vmem:[%s5790_s7 + $0x40] sm:$0xff] }
 0xe10   :  { %3546 = vmatprep.subr.mxu0 %v3785_v0  ;;  %5992 = vst [vmem:[#allocation39_spill] sm:$0xff] %v5504_v37 }
 0xe11   :  { %3547 = vmatpush3.msra.mxu0 %v5483_v48  ;;  %v5511_v48 = vld [vmem:[%s5790_s7 + $0x38] sm:$0xff] }
 0xe12   :  { %3548 = vmatprep.subr.mxu0 %v3785_v0  ;;  %5993 = vst [vmem:[#allocation40_spill] sm:$0xff] %v5511_v48 }
 0xe13   :  { %3549 = vmatpush3.msra.mxu0 %v5490_v60  ;;  %v5518_v60 = vld [vmem:[%s5790_s7 + $0x30] sm:$0xff] }
 0xe14   :  { %3550 = vmatprep.subr.mxu0 %v3785_v0  ;;  %5994 = vst [vmem:[#allocation41_spill] sm:$0xff] %v5518_v60 }
 0xe15   :  { %3551 = vmatpush3.msra.mxu0 %v5497_v16  ;;  %v5525_v16 = vld [vmem:[%s5790_s7 + $0x28] sm:$0xff] }
 0xe16   :  { %3552 = vmatprep.subr.mxu0 %v3785_v0 }
 0xe17   :  { %3553 = vmatpush3.msra.mxu0 %v5504_v37  ;;  %v5532_v37 = vld [vmem:[%s5790_s7 + $0x20] sm:$0xff] }
 0xe18   :  { %3554 = vmatprep.subr.mxu0 %v3785_v0 }
 0xe19   :  { %3555 = vmatpush3.msra.mxu0 %v5511_v48 }
 0xe1a   :  { %3556 = vmatprep.subr.mxu0 %v3785_v0 }
 0xe1b   :  { %3557 = vmatpush3.msra.mxu0 %v5518_v60 }
 0xe1c   :  { %3558 = vmatprep.subr.mxu0 %v3785_v0 }
 0xe1d   :  { %3559 = vmatpush3.msra.mxu0 %v5525_v16 }
 0xe1e   :  { %3560 = vmatprep.subr.mxu0 %v3785_v0 }
 0xe1f   :  { %3561 = vmatpush3.msra.mxu0 %v5532_v37 }
 0xe20   :  { %3562 = vmatprep.subr.mxu0 %v3785_v0 }
 0xec7   :  { %v1664_v48 = vpop.f32.mrf.mxu0 }
 0xec8   :  { %v1665_v18 = vadd.f32 %v1664_v48, %v4622_v63  ;;  %v6027_v48 = vld [vmem:[#allocation34_spill] sm:$0xff] }
 0xec9   :  { %v3502_v51 = vpop.f32.mrf.mxu0 }
 0xeca   :  { %v1668_v60 = vmul.f32 0.01, %v1665_v18 }
 0xecc   :  { %v1669_v62 = vmax.f32 %v1665_v18, %v1668_v60  ;;  %v5576_v60 = vld [vmem:[%s5790_s7 + $0x18] sm:$0xff] }
 0xecd   :  { %3563 = vmatpush3.msra.mxu0 %v5576_v60  ;;  %v6026_v18 = vld [vmem:[#allocation33_spill] sm:$0xff] }
 0xece   :  { %3536 = vmatmul.mubr.f32.vlgmr.msra.gmra.mxu1 %v1669_v62  ;;  %3564 = vmatprep.subr.mxu0 %v3785_v0  ;;  %v6025_v62 = vld [vmem:[#allocation32_spill] sm:$0xff] }
 0xecf   :  { %3574 = vmatpush3.msra.mxu1 %v4879_v2  ;;  %3605 = vmatprep.mubr.msk.f32.mxu1 %vm3786_vm0, %v3785_v0  ;;  %v5583_v2 = vld [vmem:[%s5790_s7 + $0x10] sm:$0xff] }
 0xed0   :  { %3575 = vmatprep.subr.mxu1 %v3785_v0  ;;  %3565 = vmatpush3.msra.mxu0 %v5583_v2 }
 0xed1   :  { %3576 = vmatpush3.msra.mxu1 %v4884_v3  ;;  %3566 = vmatprep.subr.mxu0 %v3785_v0  ;;  %v5590_v3 = vld [vmem:[%s5790_s7 + $0x8] sm:$0xff] }
 0xed2   :  { %3577 = vmatprep.subr.mxu1 %v3785_v0  ;;  %3567 = vmatpush3.msra.mxu0 %v5590_v3 }
 0xed3   :  { %3578 = vmatpush3.msra.mxu1 %v4891_v4  ;;  %3568 = vmatprep.subr.mxu0 %v3785_v0  ;;  %v5597_v4 = vld [vmem:[%s5790_s7] sm:$0xff] }
 0xed4   :  { %3579 = vmatprep.subr.mxu1 %v3785_v0  ;;  %3569 = vmatpush3.msra.mxu0 %v5597_v4 }
 0xed5   :  { %3580 = vmatpush3.msra.mxu1 %v4898_v20  ;;  %3608 = vmatprep.subr.mxu0 %v3785_v0 }
 0xed6   :  { %3581 = vmatprep.subr.mxu1 %v3785_v0 }
 0xed7   :  { %3582 = vmatpush3.msra.mxu1 %v4905_v21 }
 0xed8   :  { %3583 = vmatprep.subr.mxu1 %v3785_v0 }
 0xed9   :  { %3584 = vmatpush3.msra.mxu1 %v4912_v22 }
 0xeda   :  { %3585 = vmatprep.subr.mxu1 %v3785_v0 }
 0xedb   :  { %3586 = vmatpush3.msra.mxu1 %v4919_v23 }
 0xedc   :  { %3587 = vmatprep.subr.mxu1 %v3785_v0 }
 0xedd   :  { %3588 = vmatpush3.msra.mxu1 %v4926_v24 }
 0xede   :  { %3589 = vmatprep.subr.mxu1 %v3785_v0 }
 0xedf   :  { %3590 = vmatpush3.msra.mxu1 %v4933_v25 }
 0xee0   :  { %3591 = vmatprep.subr.mxu1 %v3785_v0 }
 0xee1   :  { %3592 = vmatpush3.msra.mxu1 %v4940_v26 }
 0xee2   :  { %3593 = vmatprep.subr.mxu1 %v3785_v0 }
 0xee3   :  { %3594 = vmatpush3.msra.mxu1 %v4947_v27 }
 0xee4   :  { %3595 = vmatprep.subr.mxu1 %v3785_v0 }
 0xee5   :  { %3596 = vmatpush3.msra.mxu1 %v4954_v28 }
 0xee6   :  { %3597 = vmatprep.subr.mxu1 %v3785_v0 }
 0xee7   :  { %3598 = vmatpush3.msra.mxu1 %v4961_v30 }
 0xee8   :  { %3599 = vmatprep.subr.mxu1 %v3785_v0 }
 0xee9   :  { %3600 = vmatpush3.msra.mxu1 %v4968_v31 }
 0xeea   :  { %3601 = vmatprep.subr.mxu1 %v3785_v0 }
 0xeeb   :  { %3602 = vmatpush3.msra.mxu1 %v4980_v38 }
 0xeec   :  { %3603 = vmatprep.subr.mxu1 %v3785_v0 }
 0xeed   :  { %3604 = vmatpush3.msra.mxu1 %v4987_v39 }
 0xeee   :  { %3643 = vmatprep.subr.mxu1 %v3785_v0 }
 0xf8e   :  { %v1752_v20 = vpop.f32.mrf.mxu1 }
 0xf8f   :  { %v1753_v21 = vadd.f32 %v1752_v20, %v4689_v9  ;;  %v6028_v20 = vld [vmem:[#allocation35_spill] sm:$0xff] }
 0xf90   :  { %v3537_v22 = vpop.f32.mrf.mxu1 }
 0xf91   :  { %v1756_v23 = vmul.f32 0.01, %v1753_v21  ;;  %v6030_v22 = vld [vmem:[#allocation37_spill] sm:$0xff] }
 0xf93   :  { %v1757_v24 = vmax.f32 %v1753_v21, %v1756_v23  ;;  %v6029_v21 = vld [vmem:[#allocation36_spill] sm:$0xff]  ;;  %v6031_v23 = vld [vmem:[#allocation38_spill] sm:$0xff] }
 0xf95   :  { %3571 = vmatmul.mubr.f32.vlgmr.msra.gmra.mxu0 %v1757_v24  ;;  %v6032_v24 = vld [vmem:[#allocation39_spill] sm:$0xff] }
 0xf96   :  { %3609 = vmatpush3.msra.mxu0 %v4993_v40  ;;  %3640 = vmatprep.mubr.msk.f32.mxu0 %vm3786_vm0, %v3785_v0  ;;  %v5995_v40 = vld [vmem:[#allocation4_spill] sm:$0xff] }
 0xf97   :  { %3610 = vmatprep.subr.mxu0 %v3785_v0 }
 0xf98   :  { %3611 = vmatpush3.msra.mxu0 %v4998_v41  ;;  %v5997_v41 = vld [vmem:[#allocation6_spill] sm:$0xff] }
 0xf99   :  { %3612 = vmatprep.subr.mxu0 %v3785_v0 }
 0xf9a   :  { %3613 = vmatpush3.msra.mxu0 %v5006_v42  ;;  %v5998_v42 = vld [vmem:[#allocation7_spill] sm:$0xff] }
 0xf9b   :  { %3614 = vmatprep.subr.mxu0 %v3785_v0 }
 0xf9c   :  { %3615 = vmatpush3.msra.mxu0 %v5013_v43  ;;  %v5999_v43 = vld [vmem:[#allocation8_spill] sm:$0xff] }
 0xf9d   :  { %3616 = vmatprep.subr.mxu0 %v3785_v0 }
 0xf9e   :  { %3617 = vmatpush3.msra.mxu0 %v5020_v44  ;;  %v6000_v44 = vld [vmem:[#allocation9_spill] sm:$0xff] }
 0xf9f   :  { %3618 = vmatprep.subr.mxu0 %v3785_v0 }
 0xfa0   :  { %3619 = vmatpush3.msra.mxu0 %v5027_v45  ;;  %v6001_v45 = vld [vmem:[#allocation10_spill] sm:$0xff] }
 0xfa1   :  { %3620 = vmatprep.subr.mxu0 %v3785_v0 }
 0xfa2   :  { %3621 = vmatpush3.msra.mxu0 %v5034_v47  ;;  %v6002_v47 = vld [vmem:[#allocation11_spill] sm:$0xff] }
 0xfa3   :  { %3622 = vmatprep.subr.mxu0 %v3785_v0 }
 0xfa4   :  { %3623 = vmatpush3.msra.mxu0 %v5041_v49  ;;  %v6003_v49 = vld [vmem:[#allocation12_spill] sm:$0xff] }
 0xfa5   :  { %3624 = vmatprep.subr.mxu0 %v3785_v0 }
 0xfa6   :  { %3625 = vmatpush3.msra.mxu0 %v5048_v56  ;;  %v6004_v56 = vld [vmem:[#allocation13_spill] sm:$0xff] }
 0xfa7   :  { %3626 = vmatprep.subr.mxu0 %v3785_v0 }
 0xfa8   :  { %3627 = vmatpush3.msra.mxu0 %v5055_v57  ;;  %v6005_v57 = vld [vmem:[#allocation14_spill] sm:$0xff] }
 0xfa9   :  { %3628 = vmatprep.subr.mxu0 %v3785_v0 }
 0xfaa   :  { %3629 = vmatpush3.msra.mxu0 %v5062_v58  ;;  %v6006_v58 = vld [vmem:[#allocation15_spill] sm:$0xff] }
 0xfab   :  { %3630 = vmatprep.subr.mxu0 %v3785_v0 }
 0xfac   :  { %3631 = vmatpush3.msra.mxu0 %v5069_v59 }
 0xfad   :  { %3632 = vmatprep.subr.mxu0 %v3785_v0 }
 0xfae   :  { %3633 = vmatpush3.msra.mxu0 %v5084_v53  ;;  %v6007_v53 = vld [vmem:[#allocation2_spill] sm:$0xff] }
 0xfaf   :  { %3634 = vmatprep.subr.mxu0 %v3785_v0 }
 0xfb0   :  { %3635 = vmatpush3.msra.mxu0 %v5091_v29 }
 0xfb1   :  { %3636 = vmatprep.subr.mxu0 %v3785_v0 }
 0xfb2   :  { %3637 = vmatpush3.msra.mxu0 %v5098_v46 }
 0xfb3   :  { %3638 = vmatprep.subr.mxu0 %v3785_v0 }
 0xfb4   :  { %3639 = vmatpush3.msra.mxu0 %v5105_v55 }
 0xfb5   :  { %3678 = vmatprep.subr.mxu0 %v3785_v0 }
0x1055   :  { %v1840_v25 = vpop.f32.mrf.mxu0 }
0x1056   :  { %v1841_v26 = vadd.f32 %v1840_v25, %v4728_v7  ;;  %v6033_v25 = vld [vmem:[#allocation40_spill] sm:$0xff] }
0x1057   :  { %v3572_v27 = vpop.f32.mrf.mxu0 }
0x1058   :  { %2377 = vst [vmem:[%s5791_s8 + $0x10] sm:$0xff] %v1841_v26  ;;  %3606 = vmatmul.mubr.f32.vlgmr.msra.gmra.mxu1 %v1841_v26  ;;  %v6034_v26 = vld [vmem:[#allocation41_spill] sm:$0xff] }
0x1059   :  { %3644 = vmatpush3.msra.mxu1 %v5111_v54  ;;  %3675 = vmatprep.mubr.msk.f32.mxu1 %vm3786_vm0, %v3785_v0 }
0x105a   :  { %3645 = vmatprep.subr.mxu1 %v3785_v0 }
0x105b   :  { %3646 = vmatpush3.msra.mxu1 %v5116_v6  ;;  %v6008_v6 = vld [vmem:[#allocation16_spill] sm:$0xff] }
0x105c   :  { %3647 = vmatprep.subr.mxu1 %v3785_v0 }
0x105d   :  { %3648 = vmatpush3.msra.mxu1 %v5124_v11  ;;  %v6009_v11 = vld [vmem:[#allocation17_spill] sm:$0xff] }
0x105e   :  { %3649 = vmatprep.subr.mxu1 %v3785_v0 }
0x105f   :  { %3650 = vmatpush3.msra.mxu1 %v5131_v13  ;;  %v6010_v13 = vld [vmem:[#allocation18_spill] sm:$0xff] }
0x1060   :  { %3651 = vmatprep.subr.mxu1 %v3785_v0 }
0x1061   :  { %3652 = vmatpush3.msra.mxu1 %v5138_v15  ;;  %v6011_v15 = vld [vmem:[#allocation19_spill] sm:$0xff] }
0x1062   :  { %3653 = vmatprep.subr.mxu1 %v3785_v0 }
0x1063   :  { %3654 = vmatpush3.msra.mxu1 %v5145_v17  ;;  %v6012_v17 = vld [vmem:[#allocation20_spill] sm:$0xff] }
0x1064   :  { %3655 = vmatprep.subr.mxu1 %v3785_v0 }
0x1065   :  { %3656 = vmatpush3.msra.mxu1 %v5152_v19  ;;  %v6013_v19 = vld [vmem:[#allocation21_spill] sm:$0xff] }
0x1066   :  { %3657 = vmatprep.subr.mxu1 %v3785_v0 }
0x1067   :  { %3658 = vmatpush3.msra.mxu1 %v5159_v5  ;;  %v6014_v5 = vld [vmem:[#allocation22_spill] sm:$0xff] }
0x1068   :  { %3659 = vmatprep.subr.mxu1 %v3785_v0 }
0x1069   :  { %3660 = vmatpush3.msra.mxu1 %v5166_v8  ;;  %v6015_v8 = vld [vmem:[#allocation23_spill] sm:$0xff] }
0x106a   :  { %3661 = vmatprep.subr.mxu1 %v3785_v0 }
0x106b   :  { %3662 = vmatpush3.msra.mxu1 %v5173_v10  ;;  %v6016_v10 = vld [vmem:[#allocation24_spill] sm:$0xff] }
0x106c   :  { %3663 = vmatprep.subr.mxu1 %v3785_v0 }
0x106d   :  { %3664 = vmatpush3.msra.mxu1 %v5180_v12  ;;  %v6017_v12 = vld [vmem:[#allocation25_spill] sm:$0xff] }
0x106e   :  { %3665 = vmatprep.subr.mxu1 %v3785_v0 }
0x106f   :  { %3666 = vmatpush3.msra.mxu1 %v5187_v14  ;;  %v6018_v14 = vld [vmem:[#allocation26_spill] sm:$0xff] }
0x1070   :  { %3667 = vmatprep.subr.mxu1 %v3785_v0 }
0x1071   :  { %3668 = vmatpush3.msra.mxu1 %v5199_v32  ;;  %v6019_v32 = vld [vmem:[#allocation27_spill] sm:$0xff] }
0x1072   :  { %3669 = vmatprep.subr.mxu1 %v3785_v0 }
0x1073   :  { %3670 = vmatpush3.msra.mxu1 %v5206_v33  ;;  %v6020_v33 = vld [vmem:[#allocation28_spill] sm:$0xff] }
0x1074   :  { %3671 = vmatprep.subr.mxu1 %v3785_v0 }
0x1075   :  { %3672 = vmatpush3.msra.mxu1 %v5213_v34  ;;  %v6021_v34 = vld [vmem:[#allocation29_spill] sm:$0xff] }
0x1076   :  { %3673 = vmatprep.subr.mxu1 %v3785_v0 }
0x1077   :  { %3674 = vmatpush3.msra.mxu1 %v5220_v35  ;;  %v6022_v35 = vld [vmem:[#allocation30_spill] sm:$0xff] }
0x1078   :  { %3713 = vmatprep.subr.mxu1 %v3785_v0 }
0x1118   :  { %v1928_v28 = vpop.f32.mrf.mxu1 }
0x1119   :  { %v1929_v30 = vadd.f32 %v1928_v28, %v4160_v50  ;;  %v5996_v50 = vld [vmem:[#allocation5_spill] sm:$0xff] }
0x111a   :  { %v3607_v31 = vpop.f32.mrf.mxu1 }
0x111b   :  { %v1932_v38 = vmul.f32 0.01, %v1929_v30 }
0x111d   :  { %v1933_v39 = vmax.f32 %v1929_v30, %v1932_v38 }
0x111f   :  { %3641 = vmatmul.mubr.f32.vlgmr.msra.gmra.mxu0 %v1933_v39 }
0x1120   :  { %3679 = vmatpush3.msra.mxu0 %v5226_v36  ;;  %3710 = vmatprep.mubr.msk.f32.mxu0 %vm3786_vm0, %v3785_v0  ;;  %v6023_v36 = vld [vmem:[#allocation31_spill] sm:$0xff] }
0x1121   :  { %3680 = vmatprep.subr.mxu0 %v3785_v0 }
0x1122   :  { %3681 = vmatpush3.msra.mxu0 %v5231_v52 }
0x1123   :  { %3682 = vmatprep.subr.mxu0 %v3785_v0 }
0x1124   :  { %3683 = vmatpush3.msra.mxu0 %v5995_v40 }
0x1125   :  { %3684 = vmatprep.subr.mxu0 %v3785_v0 }
0x1126   :  { %3685 = vmatpush3.msra.mxu0 %v5996_v50 }
0x1127   :  { %3686 = vmatprep.subr.mxu0 %v3785_v0 }
0x1128   :  { %3687 = vmatpush3.msra.mxu0 %v5997_v41 }
0x1129   :  { %3688 = vmatprep.subr.mxu0 %v3785_v0 }
0x112a   :  { %3689 = vmatpush3.msra.mxu0 %v5998_v42 }
0x112b   :  { %3690 = vmatprep.subr.mxu0 %v3785_v0 }
0x112c   :  { %3691 = vmatpush3.msra.mxu0 %v5999_v43 }
0x112d   :  { %3692 = vmatprep.subr.mxu0 %v3785_v0 }
0x112e   :  { %3693 = vmatpush3.msra.mxu0 %v6000_v44 }
0x112f   :  { %3694 = vmatprep.subr.mxu0 %v3785_v0 }
0x1130   :  { %3695 = vmatpush3.msra.mxu0 %v6001_v45 }
0x1131   :  { %3696 = vmatprep.subr.mxu0 %v3785_v0 }
0x1132   :  { %3697 = vmatpush3.msra.mxu0 %v6002_v47 }
0x1133   :  { %3698 = vmatprep.subr.mxu0 %v3785_v0 }
0x1134   :  { %3699 = vmatpush3.msra.mxu0 %v6003_v49 }
0x1135   :  { %3700 = vmatprep.subr.mxu0 %v3785_v0 }
0x1136   :  { %3701 = vmatpush3.msra.mxu0 %v6004_v56 }
0x1137   :  { %3702 = vmatprep.subr.mxu0 %v3785_v0 }
0x1138   :  { %3703 = vmatpush3.msra.mxu0 %v6005_v57 }
0x1139   :  { %3704 = vmatprep.subr.mxu0 %v3785_v0 }
0x113a   :  { %3705 = vmatpush3.msra.mxu0 %v5316_v61  ;;  %v6024_v61 = vld [vmem:[#allocation3_spill] sm:$0xff] }
0x113b   :  { %3706 = vmatprep.subr.mxu0 %v3785_v0 }
0x113c   :  { %3707 = vmatpush3.msra.mxu0 %v5328_v1 }
0x113d   :  { %3708 = vmatprep.subr.mxu0 %v3785_v0 }
0x113e   :  { %3709 = vmatpush3.msra.mxu0 %v6006_v58 }
0x113f   :  { %3748 = vmatprep.subr.mxu0 %v3785_v0 }
0x11df   :  { %v2016_v59 = vpop.f32.mrf.mxu0 }
0x11e0   :  { %v2017_v29 = vadd.f32 %v2016_v59, %v6007_v53 }
0x11e1   :  { %v3642_v46 = vpop.f32.mrf.mxu0 }
0x11e2   :  { %v2020_v55 = vmul.f32 0.01, %v2017_v29 }
0x11e4   :  { %v2021_v54 = vmax.f32 %v2017_v29, %v2020_v55 }
0x11e6   :  { %3676 = vmatmul.mubr.f32.vlgmr.msra.gmra.mxu1 %v2021_v54 }
0x11e7   :  { %3714 = vmatpush3.msra.mxu1 %v6008_v6  ;;  %3745 = vmatprep.mubr.msk.f32.mxu1 %vm3786_vm0, %v3785_v0 }
0x11e8   :  { %3715 = vmatprep.subr.mxu1 %v3785_v0 }
0x11e9   :  { %3716 = vmatpush3.msra.mxu1 %v6009_v11 }
0x11ea   :  { %3717 = vmatprep.subr.mxu1 %v3785_v0 }
0x11eb   :  { %3718 = vmatpush3.msra.mxu1 %v6010_v13 }
0x11ec   :  { %3719 = vmatprep.subr.mxu1 %v3785_v0 }
0x11ed   :  { %3720 = vmatpush3.msra.mxu1 %v6011_v15 }
0x11ee   :  { %3721 = vmatprep.subr.mxu1 %v3785_v0 }
0x11ef   :  { %3722 = vmatpush3.msra.mxu1 %v6012_v17 }
0x11f0   :  { %3723 = vmatprep.subr.mxu1 %v3785_v0 }
0x11f1   :  { %3724 = vmatpush3.msra.mxu1 %v6013_v19 }
0x11f2   :  { %3725 = vmatprep.subr.mxu1 %v3785_v0 }
0x11f3   :  { %3726 = vmatpush3.msra.mxu1 %v6014_v5 }
0x11f4   :  { %3727 = vmatprep.subr.mxu1 %v3785_v0 }
0x11f5   :  { %3728 = vmatpush3.msra.mxu1 %v6015_v8 }
0x11f6   :  { %3729 = vmatprep.subr.mxu1 %v3785_v0 }
0x11f7   :  { %3730 = vmatpush3.msra.mxu1 %v6016_v10 }
0x11f8   :  { %3731 = vmatprep.subr.mxu1 %v3785_v0 }
0x11f9   :  { %3732 = vmatpush3.msra.mxu1 %v6017_v12 }
0x11fa   :  { %3733 = vmatprep.subr.mxu1 %v3785_v0 }
0x11fb   :  { %3734 = vmatpush3.msra.mxu1 %v6018_v14 }
0x11fc   :  { %3735 = vmatprep.subr.mxu1 %v3785_v0 }
0x11fd   :  { %3736 = vmatpush3.msra.mxu1 %v6019_v32 }
0x11fe   :  { %3737 = vmatprep.subr.mxu1 %v3785_v0 }
0x11ff   :  { %3738 = vmatpush3.msra.mxu1 %v6020_v33 }
0x1200   :  { %3739 = vmatprep.subr.mxu1 %v3785_v0 }
0x1201   :  { %3740 = vmatpush3.msra.mxu1 %v6021_v34 }
0x1202   :  { %3741 = vmatprep.subr.mxu1 %v3785_v0 }
0x1203   :  { %3742 = vmatpush3.msra.mxu1 %v6022_v35 }
0x1204   :  { %3743 = vmatprep.subr.mxu1 %v3785_v0 }
0x1205   :  { %3744 = vmatpush3.msra.mxu1 %v6023_v36 }
0x12a6   :  { %v2104_v52 = vpop.f32.mrf.mxu1 }
0x12a7   :  { %v2105_v1 = vadd.f32 %v2104_v52, %v6024_v61 }
0x12a8   :  { %v3677_v51 = vpop.f32.mrf.mxu1 }
0x12a9   :  { %3711 = vmatmul.mubr.f32.vlgmr.msra.gmra.mxu0 %v2105_v1 }
0x12aa   :  { %3749 = vmatpush3.msra.mxu0 %v6025_v62  ;;  %3780 = vmatprep.mubr.msk.f32.mxu0 %vm3786_vm0, %v3785_v0 }
0x12ab   :  { %3750 = vmatprep.subr.mxu0 %v3785_v0 }
0x12ac   :  { %3751 = vmatpush3.msra.mxu0 %v6026_v18 }
0x12ad   :  { %3752 = vmatprep.subr.mxu0 %v3785_v0 }
0x12ae   :  { %3753 = vmatpush3.msra.mxu0 %v6027_v48 }
0x12af   :  { %3754 = vmatprep.subr.mxu0 %v3785_v0 }
0x12b0   :  { %3755 = vmatpush3.msra.mxu0 %v6028_v20 }
0x12b1   :  { %3756 = vmatprep.subr.mxu0 %v3785_v0 }
0x12b2   :  { %3757 = vmatpush3.msra.mxu0 %v6029_v21 }
0x12b3   :  { %3758 = vmatprep.subr.mxu0 %v3785_v0 }
0x12b4   :  { %3759 = vmatpush3.msra.mxu0 %v6030_v22 }
0x12b5   :  { %3760 = vmatprep.subr.mxu0 %v3785_v0 }
0x12b6   :  { %3761 = vmatpush3.msra.mxu0 %v6031_v23 }
0x12b7   :  { %3762 = vmatprep.subr.mxu0 %v3785_v0 }
0x12b8   :  { %3763 = vmatpush3.msra.mxu0 %v6032_v24 }
0x12b9   :  { %3764 = vmatprep.subr.mxu0 %v3785_v0 }
0x12ba   :  { %3765 = vmatpush3.msra.mxu0 %v6033_v25 }
0x12bb   :  { %3766 = vmatprep.subr.mxu0 %v3785_v0 }
0x12bc   :  { %3767 = vmatpush3.msra.mxu0 %v6034_v26 }
0x12bd   :  { %3768 = vmatprep.subr.mxu0 %v3785_v0 }
0x12be   :  { %3769 = vmatpush3.msra.mxu0 %v5525_v16 }
0x12bf   :  { %3770 = vmatprep.subr.mxu0 %v3785_v0 }
0x12c0   :  { %3771 = vmatpush3.msra.mxu0 %v5532_v37 }
0x12c1   :  { %3772 = vmatprep.subr.mxu0 %v3785_v0 }
0x12c2   :  { %3773 = vmatpush3.msra.mxu0 %v5576_v60 }
0x12c3   :  { %3774 = vmatprep.subr.mxu0 %v3785_v0 }
0x12c4   :  { %3775 = vmatpush3.msra.mxu0 %v5583_v2 }
0x12c5   :  { %3776 = vmatprep.subr.mxu0 %v3785_v0 }
0x12c6   :  { %3777 = vmatpush3.msra.mxu0 %v5590_v3 }
0x12c7   :  { %3778 = vmatprep.subr.mxu0 %v3785_v0 }
0x12c8   :  { %3779 = vmatpush3.msra.mxu0 %v5597_v4 }
0x1369   :  { %v2190_v16 = vpop.f32.mrf.mxu0 }
0x136a   :  { %v2191_v27 = vadd.f32 %v2190_v16, %v4622_v63 }
0x136b   :  { %v3712_v37 = vpop.f32.mrf.mxu0 }
0x136c   :  { %v2194_v28 = vmul.f32 0.01, %v2191_v27 }
0x136e   :  { %v2195_v30 = vmax.f32 %v2191_v27, %v2194_v28 }
0x1370   :  { %3746 = vmatmul.mubr.f32.vlgmr.msra.gmra.mxu1 %v2195_v30 }
0x1430   :  { %v2278_v60 = vpop.f32.mrf.mxu1 }
0x1431   :  { %v2279_v31 = vadd.f32 %v2278_v60, %v4689_v9 }
0x1432   :  { %v3747_v38 = vpop.f32.mrf.mxu1 }
0x1433   :  { %v2282_v2 = vmul.f32 0.01, %v2279_v31 }
0x1435   :  { %v2283_v39 = vmax.f32 %v2279_v31, %v2282_v2 }
0x1437   :  { %3781 = vmatmul.mubr.f32.vlgmr.msra.gmra.mxu0 %v2283_v39 }
0x14f7   :  { %v2366_v40 = vpop.f32.mrf.mxu0 }
0x14f8   :  { %v2367_v3 = vadd.f32 %v2366_v40, %v4728_v7 }
0x14f9   :  { %v3782_v0 = vpop.f32.mrf.mxu0 }
0x14fa   :  { %2378 = vst [vmem:[%s5791_s8 + $0x18] sm:$0xff] %v2367_v3 }

</bundles_post_ra>
